<compile_context>
chip_gen: v7x
topology: tpu7x:2x2x1
jax: 0.10.0
libtpu: 0.0.40
codegen_flags: <defaults>
</compile_context>

<pallas_src>
import functools

import numpy as np
import jax
import jax.numpy as jnp
from jax import lax
from jax.experimental import pallas as pl
from jax.experimental.pallas import tpu as pltpu


def _tl_conv_kernel(x_ref, w_ref, cmask_ref, scale_ref, shift_ref, o_ref,
                    s_ref, acc_ref, *,
                    T, K, d, RB, fh, wo_t, C, col_needs_mask, cdtype):
    """One grid step = (batch b, group of RB consecutive conv output row-blocks).

    x_ref     : (twin, C, wneed)      input window, twin = RB*T + (K-1)*d
    w_ref     : (Cout, K*K*C)         tap-major packed conv weights
    cmask_ref : (K, 1, wo_t)          per-kx column-validity mask
    scale_ref : (Cout, 1) f32         folded eval-mode BN scale
    shift_ref : (Cout, 1) f32         folded eval-mode BN shift
    o_ref     : (Cout, RB*T*wo_t)     image rows [gy*RB*T, (gy+1)*RB*T), (row,col)->lanes
    s_ref     : (K*K*C, RB*T*wo_t)    packed im2col rhs slab (scratch, compute dtype)
    acc_ref   : (Cout, RB*T*wo_t)     f32 accumulator (scratch)
    """
    gy = pl.program_id(1)
    NBLK = T * wo_t                     # lanes covered by one conv-row block

    # ---- Stage 1: build the packed rhs slab S (single im2col pass in VMEM) ----
    for ky in range(K):
        for rb in range(RB):
            # conv output row block oy = gy*RB + rb.  Validity of the per-shift
            # conv zero padding depends only on (oy, ky) -> scalar pl.when,
            # no weight masking, no per-row data masks (review item 4).
            base = gy * (RB * T) + rb * T + ky * d
            row_ok = jnp.logical_and(base >= d, base < fh + d)

            @pl.when(row_ok)
            def _():
                for kx in range(K):
                    tap = ky * K + kx
                    for si in range(T):
                        ly = rb * T + si
                        # contiguous (C, wo_t) row tile; kx*d is a small lane shift
                        v = x_ref[ly + ky * d, :, kx * d:kx * d + wo_t]
                        if col_needs_mask[kx]:
                            v = v * cmask_ref[kx]          # (1, wo_t) broadcast
                        s_ref[tap * C:(tap + 1) * C,
                              ly * wo_t:(ly + 1) * wo_t] = v

            @pl.when(jnp.logical_not(row_ok))
            def _():
                for kx in range(K):
                    tap = ky * K + kx
                    s_ref[tap * C:(tap + 1) * C,
                          rb * NBLK:(rb + 1) * NBLK] = jnp.zeros((C, NBLK), cdtype)

    # ---- Stage 2: one deep MXU matmul (contraction K*K*C, N = RB*T*wo_t) ------
    acc_ref[...] = jnp.dot(w_ref[...], s_ref[...],
                           preferred_element_type=jnp.float32)

    # BN (folded, eval mode) + ReLU in f32, then one lane-dense whole-tile store.
    y = jnp.maximum(acc_ref[...] * scale_ref[...] + shift_ref[...], 0.0)
    o_ref[...] = y.astype(o_ref.dtype)


def tl_conv_forward(x, weight, bn_gamma, bn_beta, bn_mean, bn_var, *,
                    kernel_size, dilation=1, tl_size=8, eps=1e-5,
                    compute_dtype=jnp.bfloat16, out_dtype=jnp.float32):
    b, c, h, w = x.shape
    oc = weight.shape[0]
    T, K, d = tl_size, kernel_size, dilation
    po = T // 2

    # Geometry of the reference: manual pad by po, shifted views of size
    # (fh, fw), then Conv2d(stride=T, padding=d, dilation=d).
    fh = h + 2 * po - T
    fw = w + 2 * po - T
    ho = (fh + 2 * d - d * (K - 1) - 1) // T + 1
    wo = (fw + 2 * d - d * (K - 1) - 1) // T + 1
    wo_t = wo * T

    # ---- pick RB = conv-row blocks per grid step (amortize per-step overhead,
    # stay inside a conservative VMEM budget valid on v5e/v6e/v7x) -------------
    in_b = jnp.dtype(compute_dtype).itemsize
    out_b = jnp.dtype(out_dtype).itemsize
    RB = 1
    for cand in (4, 3, 2):
        if ho % cand:
            continue
        rows_c = cand * T
        twin_c = rows_c + (K - 1) * d
        wneed_c = wo_t + (K - 1) * d
        est = (2 * twin_c * c * wneed_c * in_b       # input window (double buffered)
               + 2 * oc * K * K * c * in_b           # packed weights
               + K * K * c * rows_c * wo_t * in_b    # S scratch
               + oc * rows_c * wo_t * 4              # f32 accumulator
               + 2 * oc * rows_c * wo_t * out_b)     # output block (double buffered)
        if est <= 24 * 1024 * 1024:
            RB = cand
            break
    nG = ho // RB
    ROWS = RB * T
    twin = ROWS + (K - 1) * d            # padded-input rows needed per step
    wneed = wo_t + (K - 1) * d           # padded-input cols needed per step

    # One combined zero pad: manual TL padding (po) + the conv's own padding (d).
    pp = po + d
    x_pad = jnp.pad(x, ((0, 0), (0, 0), (pp, pp), (pp, pp)))

    # Overlapping row windows, layout (B, nG, twin, C, wneed): twin is OFF the
    # sublane axis so every staged row load is a contiguous (C, wneed) tile.
    rows_idx = (jnp.arange(nG) * ROWS)[:, None] + jnp.arange(twin)[None, :]
    xwin = x_pad[:, :, rows_idx, :wneed]                       # (B, C, nG, twin, wneed)
    xwin = jnp.transpose(xwin, (0, 2, 3, 1, 4)).astype(compute_dtype)

    # Tap-major packed weights: W2[co, (ky*K+kx)*C + cin] = weight[co, cin, ky, kx].
    w2 = jnp.transpose(weight, (0, 2, 3, 1)).reshape(oc, K * K * c).astype(compute_dtype)

    # Folded eval-mode BatchNorm.
    inv_std = 1.0 / jnp.sqrt(bn_var + eps)
    scale = (bn_gamma * inv_std).astype(jnp.float32).reshape(oc, 1)
    shift = (bn_beta - bn_mean * bn_gamma * inv_std).astype(jnp.float32).reshape(oc, 1)

    # Static per-kx column validity of the per-shift conv zero padding.
    ox = np.arange(wo_t) // T
    cmask_np = np.stack(
        [((ox * T + kx * d) >= d) & ((ox * T + kx * d) < fw + d) for kx in range(K)],
        axis=0).astype(np.float32)                              # (K, wo_t)
    col_needs_mask = tuple(bool((cmask_np[kx] < 0.5).any()) for kx in range(K))
    cmask = jnp.asarray(cmask_np).astype(compute_dtype).reshape(K, 1, wo_t)

    kernel = functools.partial(
        _tl_conv_kernel, T=T, K=K, d=d, RB=RB, fh=fh, wo_t=wo_t, C=c,
        col_needs_mask=col_needs_mask, cdtype=compute_dtype)

    out = pl.pallas_call(
        kernel,
        out_shape=jax.ShapeDtypeStruct((b, nG, oc, ROWS * wo_t), out_dtype),
        grid=(b, nG),
        in_specs=[
            pl.BlockSpec((None, None, twin, c, wneed),
                         lambda bi, gi: (bi, gi, 0, 0, 0)),
            pl.BlockSpec((oc, K * K * c), lambda bi, gi: (0, 0)),
            pl.BlockSpec((K, 1, wo_t),    lambda bi, gi: (0, 0, 0)),
            pl.BlockSpec((oc, 1),         lambda bi, gi: (0, 0)),
            pl.BlockSpec((oc, 1),         lambda bi, gi: (0, 0)),
        ],
        out_specs=pl.BlockSpec((None, None, oc, ROWS * wo_t),
                               lambda bi, gi: (bi, gi, 0, 0)),
        scratch_shapes=[
            pltpu.VMEM((K * K * c, ROWS * wo_t), compute_dtype),   # packed rhs S
            pltpu.VMEM((oc, ROWS * wo_t), jnp.float32),            # f32 accumulator
        ],
        compiler_params=pltpu.CompilerParams(
            dimension_semantics=("parallel", "parallel"),
            vmem_limit_bytes=32 * 1024 * 1024),
    )(xwin, w2, cmask, scale, shift)

    # (B, nG, Cout, RB*T*wo_t) -> NCHW (B, Cout, ho*T, wo*T).  The transpose is
    # the only post-kernel op; the trailing reshape is a free row-major view.
    out = jnp.transpose(out, (0, 2, 1, 3)).reshape(b, oc, ho * T, wo_t)
    return out


def tl_conv_reference(x, weight, gamma, beta, mean, var,
                      *, kernel_size, dilation=1, tl_size=8, eps=1e-5):
    """Pure-JAX reference (lax.conv) used only to validate the kernel."""
    b, c, h, w = x.shape
    T, K, d = tl_size, kernel_size, dilation
    po = T // 2
    x_pad = jnp.pad(x, ((0, 0), (0, 0), (po, po), (po, po)))
    Hp, Wp = h + 2 * po, w + 2 * po
    fh, fw = Hp - T, Wp - T
    feats = jnp.stack(
        [jnp.stack([x_pad[:, :, si:si + fh, sj:sj + fw] for sj in range(T)], 0)
         for si in range(T)], 0).reshape(T * T * b, c, fh, fw)
    y = lax.conv_general_dilated(
        feats, weight, window_strides=(T, T), padding=[(d, d), (d, d)],
        rhs_dilation=(d, d), dimension_numbers=("NCHW", "OIHW", "NCHW"))
    scale = gamma / jnp.sqrt(var + eps)
    shift = beta - mean * scale
    y = jnp.maximum(y * scale[None, :, None, None] + shift[None, :, None, None], 0.0)
    oc = weight.shape[0]
    _, _, ho, wo = y.shape
    y = y.reshape(T, T, b, oc, ho, wo)
    return jnp.transpose(y, (2, 3, 4, 0, 5, 1)).reshape(b, oc, ho * T, wo * T)


if __name__ == "__main__":
    key = jax.random.PRNGKey(0)

    def run_case(B, Cin, H, W, Cout, Ksz, dil, T, k):
        kx, kw = jax.random.split(k)
        x = jax.random.normal(kx, (B, Cin, H, W), jnp.float32)
        # Only tl_conv_list[0]'s parameters are ever used by the reference forward.
        weight = jax.random.normal(kw, (Cout, Cin, Ksz, Ksz), jnp.float32) * 0.1
        gamma = 1.0 + 0.1 * jnp.arange(Cout, dtype=jnp.float32)
        beta = 0.05 * jnp.arange(Cout, dtype=jnp.float32)
        mean = 0.01 * jnp.arange(Cout, dtype=jnp.float32)
        var = 1.0 + 0.02 * jnp.arange(Cout, dtype=jnp.float32)

        fwd = jax.jit(functools.partial(
            tl_conv_forward, kernel_size=Ksz, dilation=dil, tl_size=T))
        out = jax.block_until_ready(fwd(x, weight, gamma, beta, mean, var))

        ref = tl_conv_reference(x, weight, gamma, beta, mean, var,
                                kernel_size=Ksz, dilation=dil, tl_size=T)
        assert out.shape == ref.shape, (out.shape, ref.shape)
        # bf16 inputs to the MXU vs a pure-f32 reference -> looser tolerance.
        assert jnp.allclose(out, ref, atol=3e-2, rtol=3e-2), \
            float(jnp.max(jnp.abs(out - ref)))
        return out

    k1, k2 = jax.random.split(key)
    # Primary small config (exercises top/left per-shift padding masks, RB=2).
    o1 = run_case(B=2, Cin=4, H=16, W=16, Cout=8, Ksz=3, dil=1, T=8, k=k1)
    assert o1.shape == (2, 8, 16, 16), o1.shape
    # Odd spatial size (exercises bottom/right per-shift padding masks, RB=3).
    run_case(B=2, Cin=4, H=17, W=17, Cout=8, Ksz=3, dil=1, T=8, k=k2)

    print("KERNEL_OK")
</pallas_src>

<mosaic_0001>
module attributes {stable_mosaic.version = 11 : i64} {
  func.func @_tl_conv_kernel(%arg0: i32, %arg1: i32, %arg2: memref<1x1x18x4x18xbf16, #tpu.memory_space<vmem>>, %arg3: memref<8x36xbf16, #tpu.memory_space<vmem>>, %arg4: memref<3x1x16xbf16, #tpu.memory_space<vmem>>, %arg5: memref<8x1xf32, #tpu.memory_space<vmem>>, %arg6: memref<8x1xf32, #tpu.memory_space<vmem>>, %arg7: memref<1x1x8x256xf32, #tpu.memory_space<vmem>>, %arg8: memref<36x256xbf16, #tpu.memory_space<vmem>>, %arg9: memref<8x256xf32, #tpu.memory_space<vmem>>) attributes {dimension_semantics = [#tpu.dimension_semantics<parallel>, #tpu.dimension_semantics<parallel>], iteration_bounds = array<i64: 2, 1>, scalar_prefetch = 0 : i64, scratch_operands = 2 : i64, tpu.core_type = #tpu.core_type<tc>, window_params = [{transform_indices = @transform_0, window_bounds = array<i64: 1, 1, 18, 4, 18>}, {pipeline_mode = #tpu.pipeline_mode<synchronous>, transform_indices = @transform_1, window_bounds = array<i64: 8, 36>}, {pipeline_mode = #tpu.pipeline_mode<synchronous>, transform_indices = @transform_2, window_bounds = array<i64: 3, 1, 16>}, {pipeline_mode = #tpu.pipeline_mode<synchronous>, transform_indices = @transform_3, window_bounds = array<i64: 8, 1>}, {pipeline_mode = #tpu.pipeline_mode<synchronous>, transform_indices = @transform_4, window_bounds = array<i64: 8, 1>}, {transform_indices = @transform_5, window_bounds = array<i64: 1, 1, 8, 256>}]} {
    %c16_i32 = arith.constant 16 : i32
    %0 = arith.muli %arg1, %c16_i32 : i32
    %c0_i32 = arith.constant 0 : i32
    %1 = arith.addi %0, %c0_i32 : i32
    %c0_i32_0 = arith.constant 0 : i32
    %2 = arith.addi %1, %c0_i32_0 : i32
    %c1_i32 = arith.constant 1 : i32
    %3 = arith.cmpi sge, %2, %c1_i32 : i32
    %c17_i32 = arith.constant 17 : i32
    %4 = arith.cmpi slt, %2, %c17_i32 : i32
    %5 = arith.andi %3, %4 : i1
    %6 = arith.extui %5 : i1 to i32
    %c0_i32_1 = arith.constant 0 : i32
    %7 = arith.cmpi ne, %6, %c0_i32_1 : i32
    scf.if %7 {
      %c0_57 = arith.constant 0 : index
      %c0_58 = arith.constant 0 : index
      %c0_59 = arith.constant 0 : index
      %c0_60 = arith.constant 0 : index
      %c0_61 = arith.constant 0 : index
      %82 = vector.load %arg2[%c0_57, %c0_58, %c0_59, %c0_60, %c0_61] : memref<1x1x18x4x18xbf16, #tpu.memory_space<vmem>>, vector<1x1x1x4x16xbf16>
      %83 = vector.shape_cast %82 : vector<1x1x1x4x16xbf16> to vector<4x16xbf16>
      %c0_62 = arith.constant 0 : index
      %c0_63 = arith.constant 0 : index
      %c0_64 = arith.constant 0 : index
      %84 = vector.load %arg4[%c0_62, %c0_63, %c0_64] : memref<3x1x16xbf16, #tpu.memory_space<vmem>>, vector<1x1x16xbf16>
      %85 = vector.shape_cast %84 : vector<1x1x16xbf16> to vector<1x16xbf16>
      %86 = vector.broadcast %85 : vector<1x16xbf16> to vector<4x16xbf16>
      %87 = arith.mulf %83, %86 : vector<4x16xbf16>
      %c0_65 = arith.constant 0 : index
      %c0_66 = arith.constant 0 : index
      %88 = vector.load %arg8[%c0_65, %c0_66] : memref<36x256xbf16, #tpu.memory_space<vmem>>, vector<4x16xbf16>
      tpu.vector_store %arg8[%c0_65, %c0_66], %87 {strides = array<i32>} : memref<36x256xbf16, #tpu.memory_space<vmem>>, vector<4x16xbf16>,
      %c0_67 = arith.constant 0 : index
      %c0_68 = arith.constant 0 : index
      %c1 = arith.constant 1 : index
      %c0_69 = arith.constant 0 : index
      %c0_70 = arith.constant 0 : index
      %89 = vector.load %arg2[%c0_67, %c0_68, %c1, %c0_69, %c0_70] : memref<1x1x18x4x18xbf16, #tpu.memory_space<vmem>>, vector<1x1x1x4x16xbf16>
      %90 = vector.shape_cast %89 : vector<1x1x1x4x16xbf16> to vector<4x16xbf16>
      %c0_71 = arith.constant 0 : index
      %c0_72 = arith.constant 0 : index
      %c0_73 = arith.constant 0 : index
      %91 = vector.load %arg4[%c0_71, %c0_72, %c0_73] : memref<3x1x16xbf16, #tpu.memory_space<vmem>>, vector<1x1x16xbf16>
      %92 = vector.shape_cast %91 : vector<1x1x16xbf16> to vector<1x16xbf16>
      %93 = vector.broadcast %92 : vector<1x16xbf16> to vector<4x16xbf16>
      %94 = arith.mulf %90, %93 : vector<4x16xbf16>
      %c0_74 = arith.constant 0 : index
      %c16 = arith.constant 16 : index
      %95 = vector.load %arg8[%c0_74, %c16] : memref<36x256xbf16, #tpu.memory_space<vmem>>, vector<4x16xbf16>
      tpu.vector_store %arg8[%c0_74, %c16], %94 {strides = array<i32>} : memref<36x256xbf16, #tpu.memory_space<vmem>>, vector<4x16xbf16>,
      %c0_75 = arith.constant 0 : index
      %c0_76 = arith.constant 0 : index
      %c2 = arith.constant 2 : index
      %c0_77 = arith.constant 0 : index
      %c0_78 = arith.constant 0 : index
      %96 = vector.load %arg2[%c0_75, %c0_76, %c2, %c0_77, %c0_78] : memref<1x1x18x4x18xbf16, #tpu.memory_space<vmem>>, vector<1x1x1x4x16xbf16>
      %97 = vector.shape_cast %96 : vector<1x1x1x4x16xbf16> to vector<4x16xbf16>
      %c0_79 = arith.constant 0 : index
      %c0_80 = arith.constant 0 : index
      %c0_81 = arith.constant 0 : index
      %98 = vector.load %arg4[%c0_79, %c0_80, %c0_81] : memref<3x1x16xbf16, #tpu.memory_space<vmem>>, vector<1x1x16xbf16>
      %99 = vector.shape_cast %98 : vector<1x1x16xbf16> to vector<1x16xbf16>
      %100 = vector.broadcast %99 : vector<1x16xbf16> to vector<4x16xbf16>
      %101 = arith.mulf %97, %100 : vector<4x16xbf16>
      %c0_82 = arith.constant 0 : index
      %c32 = arith.constant 32 : index
      %102 = vector.load %arg8[%c0_82, %c32] : memref<36x256xbf16, #tpu.memory_space<vmem>>, vector<4x16xbf16>
      tpu.vector_store %arg8[%c0_82, %c32], %101 {strides = array<i32>} : memref<36x256xbf16, #tpu.memory_space<vmem>>, vector<4x16xbf16>,
      %c0_83 = arith.constant 0 : index
      %c0_84 = arith.constant 0 : index
      %c3 = arith.constant 3 : index
      %c0_85 = arith.constant 0 : index
      %c0_86 = arith.constant 0 : index
      %103 = vector.load %arg2[%c0_83, %c0_84, %c3, %c0_85, %c0_86] : memref<1x1x18x4x18xbf16, #tpu.memory_space<vmem>>, vector<1x1x1x4x16xbf16>
      %104 = vector.shape_cast %103 : vector<1x1x1x4x16xbf16> to vector<4x16xbf16>
      %c0_87 = arith.constant 0 : index
      %c0_88 = arith.constant 0 : index
      %c0_89 = arith.constant 0 : index
      %105 = vector.load %arg4[%c0_87, %c0_88, %c0_89] : memref<3x1x16xbf16, #tpu.memory_space<vmem>>, vector<1x1x16xbf16>
      %106 = vector.shape_cast %105 : vector<1x1x16xbf16> to vector<1x16xbf16>
      %107 = vector.broadcast %106 : vector<1x16xbf16> to vector<4x16xbf16>
      %108 = arith.mulf %104, %107 : vector<4x16xbf16>
      %c0_90 = arith.constant 0 : index
      %c48 = arith.constant 48 : index
      %109 = vector.load %arg8[%c0_90, %c48] : memref<36x256xbf16, #tpu.memory_space<vmem>>, vector<4x16xbf16>
      tpu.vector_store %arg8[%c0_90, %c48], %108 {strides = array<i32>} : memref<36x256xbf16, #tpu.memory_space<vmem>>, vector<4x16xbf16>,
      %c0_91 = arith.constant 0 : index
      %c0_92 = arith.constant 0 : index
      %c4 = arith.constant 4 : index
      %c0_93 = arith.constant 0 : index
      %c0_94 = arith.constant 0 : index
      %110 = vector.load %arg2[%c0_91, %c0_92, %c4, %c0_93, %c0_94] : memref<1x1x18x4x18xbf16, #tpu.memory_space<vmem>>, vector<1x1x1x4x16xbf16>
      %111 = vector.shape_cast %110 : vector<1x1x1x4x16xbf16> to vector<4x16xbf16>
      %c0_95 = arith.constant 0 : index
      %c0_96 = arith.constant 0 : index
      %c0_97 = arith.constant 0 : index
      %112 = vector.load %arg4[%c0_95, %c0_96, %c0_97] : memref<3x1x16xbf16, #tpu.memory_space<vmem>>, vector<1x1x16xbf16>
      %113 = vector.shape_cast %112 : vector<1x1x16xbf16> to vector<1x16xbf16>
      %114 = vector.broadcast %113 : vector<1x16xbf16> to vector<4x16xbf16>
      %115 = arith.mulf %111, %114 : vector<4x16xbf16>
      %c0_98 = arith.constant 0 : index
      %c64 = arith.constant 64 : index
      %116 = vector.load %arg8[%c0_98, %c64] : memref<36x256xbf16, #tpu.memory_space<vmem>>, vector<4x16xbf16>
      tpu.vector_store %arg8[%c0_98, %c64], %115 {strides = array<i32>} : memref<36x256xbf16, #tpu.memory_space<vmem>>, vector<4x16xbf16>,
      %c0_99 = arith.constant 0 : index
      %c0_100 = arith.constant 0 : index
      %c5 = arith.constant 5 : index
      %c0_101 = arith.constant 0 : index
      %c0_102 = arith.constant 0 : index
      %117 = vector.load %arg2[%c0_99, %c0_100, %c5, %c0_101, %c0_102] : memref<1x1x18x4x18xbf16, #tpu.memory_space<vmem>>, vector<1x1x1x4x16xbf16>
      %118 = vector.shape_cast %117 : vector<1x1x1x4x16xbf16> to vector<4x16xbf16>
      %c0_103 = arith.constant 0 : index
      %c0_104 = arith.constant 0 : index
      %c0_105 = arith.constant 0 : index
      %119 = vector.load %arg4[%c0_103, %c0_104, %c0_105] : memref<3x1x16xbf16, #tpu.memory_space<vmem>>, vector<1x1x16xbf16>
      %120 = vector.shape_cast %119 : vector<1x1x16xbf16> to vector<1x16xbf16>
      %121 = vector.broadcast %120 : vector<1x16xbf16> to vector<4x16xbf16>
      %122 = arith.mulf %118, %121 : vector<4x16xbf16>
      %c0_106 = arith.constant 0 : index
      %c80 = arith.constant 80 : index
      %123 = vector.load %arg8[%c0_106, %c80] : memref<36x256xbf16, #tpu.memory_space<vmem>>, vector<4x16xbf16>
      tpu.vector_store %arg8[%c0_106, %c80], %122 {strides = array<i32>} : memref<36x256xbf16, #tpu.memory_space<vmem>>, vector<4x16xbf16>,
      %c0_107 = arith.constant 0 : index
      %c0_108 = arith.constant 0 : index
      %c6 = arith.constant 6 : index
      %c0_109 = arith.constant 0 : index
      %c0_110 = arith.constant 0 : index
      %124 = vector.load %arg2[%c0_107, %c0_108, %c6, %c0_109, %c0_110] : memref<1x1x18x4x18xbf16, #tpu.memory_space<vmem>>, vector<1x1x1x4x16xbf16>
      %125 = vector.shape_cast %124 : vector<1x1x1x4x16xbf16> to vector<4x16xbf16>
      %c0_111 = arith.constant 0 : index
      %c0_112 = arith.constant 0 : index
      %c0_113 = arith.constant 0 : index
      %126 = vector.load %arg4[%c0_111, %c0_112, %c0_113] : memref<3x1x16xbf16, #tpu.memory_space<vmem>>, vector<1x1x16xbf16>
      %127 = vector.shape_cast %126 : vector<1x1x16xbf16> to vector<1x16xbf16>
      %128 = vector.broadcast %127 : vector<1x16xbf16> to vector<4x16xbf16>
      %129 = arith.mulf %125, %128 : vector<4x16xbf16>
      %c0_114 = arith.constant 0 : index
      %c96 = arith.constant 96 : index
      %130 = vector.load %arg8[%c0_114, %c96] : memref<36x256xbf16, #tpu.memory_space<vmem>>, vector<4x16xbf16>
      tpu.vector_store %arg8[%c0_114, %c96], %129 {strides = array<i32>} : memref<36x256xbf16, #tpu.memory_space<vmem>>, vector<4x16xbf16>,
      %c0_115 = arith.constant 0 : index
      %c0_116 = arith.constant 0 : index
      %c7 = arith.constant 7 : index
      %c0_117 = arith.constant 0 : index
      %c0_118 = arith.constant 0 : index
      %131 = vector.load %arg2[%c0_115, %c0_116, %c7, %c0_117, %c0_118] : memref<1x1x18x4x18xbf16, #tpu.memory_space<vmem>>, vector<1x1x1x4x16xbf16>
      %132 = vector.shape_cast %131 : vector<1x1x1x4x16xbf16> to vector<4x16xbf16>
      %c0_119 = arith.constant 0 : index
      %c0_120 = arith.constant 0 : index
      %c0_121 = arith.constant 0 : index
      %133 = vector.load %arg4[%c0_119, %c0_120, %c0_121] : memref<3x1x16xbf16, #tpu.memory_space<vmem>>, vector<1x1x16xbf16>
      %134 = vector.shape_cast %133 : vector<1x1x16xbf16> to vector<1x16xbf16>
      %135 = vector.broadcast %134 : vector<1x16xbf16> to vector<4x16xbf16>
      %136 = arith.mulf %132, %135 : vector<4x16xbf16>
      %c0_122 = arith.constant 0 : index
      %c112 = arith.constant 112 : index
      %137 = vector.load %arg8[%c0_122, %c112] : memref<36x256xbf16, #tpu.memory_space<vmem>>, vector<4x16xbf16>
      tpu.vector_store %arg8[%c0_122, %c112], %136 {strides = array<i32>} : memref<36x256xbf16, #tpu.memory_space<vmem>>, vector<4x16xbf16>,
      %c0_123 = arith.constant 0 : index
      %c0_124 = arith.constant 0 : index
      %c0_125 = arith.constant 0 : index
      %c0_126 = arith.constant 0 : index
      %c1_127 = arith.constant 1 : index
      %138 = vector.load %arg2[%c0_123, %c0_124, %c0_125, %c0_126, %c1_127] : memref<1x1x18x4x18xbf16, #tpu.memory_space<vmem>>, vector<1x1x1x4x16xbf16>
      %139 = vector.shape_cast %138 : vector<1x1x1x4x16xbf16> to vector<4x16xbf16>
      %c4_128 = arith.constant 4 : index
      %c0_129 = arith.constant 0 : index
      %140 = vector.load %arg8[%c4_128, %c0_129] : memref<36x256xbf16, #tpu.memory_space<vmem>>, vector<4x16xbf16>
      tpu.vector_store %arg8[%c4_128, %c0_129], %139 {strides = array<i32>} : memref<36x256xbf16, #tpu.memory_space<vmem>>, vector<4x16xbf16>,
      %c0_130 = arith.constant 0 : index
      %c0_131 = arith.constant 0 : index
      %c1_132 = arith.constant 1 : index
      %c0_133 = arith.constant 0 : index
      %c1_134 = arith.constant 1 : index
      %141 = vector.load %arg2[%c0_130, %c0_131, %c1_132, %c0_133, %c1_134] : memref<1x1x18x4x18xbf16, #tpu.memory_space<vmem>>, vector<1x1x1x4x16xbf16>
      %142 = vector.shape_cast %141 : vector<1x1x1x4x16xbf16> to vector<4x16xbf16>
      %c4_135 = arith.constant 4 : index
      %c16_136 = arith.constant 16 : index
      %143 = vector.load %arg8[%c4_135, %c16_136] : memref<36x256xbf16, #tpu.memory_space<vmem>>, vector<4x16xbf16>
      tpu.vector_store %arg8[%c4_135, %c16_136], %142 {strides = array<i32>} : memref<36x256xbf16, #tpu.memory_space<vmem>>, vector<4x16xbf16>,
      %c0_137 = arith.constant 0 : index
      %c0_138 = arith.constant 0 : index
      %c2_139 = arith.constant 2 : index
      %c0_140 = arith.constant 0 : index
      %c1_141 = arith.constant 1 : index
      %144 = vector.load %arg2[%c0_137, %c0_138, %c2_139, %c0_140, %c1_141] : memref<1x1x18x4x18xbf16, #tpu.memory_space<vmem>>, vector<1x1x1x4x16xbf16>
      %145 = vector.shape_cast %144 : vector<1x1x1x4x16xbf16> to vector<4x16xbf16>
      %c4_142 = arith.constant 4 : index
      %c32_143 = arith.constant 32 : index
      %146 = vector.load %arg8[%c4_142, %c32_143] : memref<36x256xbf16, #tpu.memory_space<vmem>>, vector<4x16xbf16>
      tpu.vector_store %arg8[%c4_142, %c32_143], %145 {strides = array<i32>} : memref<36x256xbf16, #tpu.memory_space<vmem>>, vector<4x16xbf16>,
      %c0_144 = arith.constant 0 : index
      %c0_145 = arith.constant 0 : index
      %c3_146 = arith.constant 3 : index
      %c0_147 = arith.constant 0 : index
      %c1_148 = arith.constant 1 : index
      %147 = vector.load %arg2[%c0_144, %c0_145, %c3_146, %c0_147, %c1_148] : memref<1x1x18x4x18xbf16, #tpu.memory_space<vmem>>, vector<1x1x1x4x16xbf16>
      %148 = vector.shape_cast %147 : vector<1x1x1x4x16xbf16> to vector<4x16xbf16>
      %c4_149 = arith.constant 4 : index
      %c48_150 = arith.constant 48 : index
      %149 = vector.load %arg8[%c4_149, %c48_150] : memref<36x256xbf16, #tpu.memory_space<vmem>>, vector<4x16xbf16>
      tpu.vector_store %arg8[%c4_149, %c48_150], %148 {strides = array<i32>} : memref<36x256xbf16, #tpu.memory_space<vmem>>, vector<4x16xbf16>,
      %c0_151 = arith.constant 0 : index
      %c0_152 = arith.constant 0 : index
      %c4_153 = arith.constant 4 : index
      %c0_154 = arith.constant 0 : index
      %c1_155 = arith.constant 1 : index
      %150 = vector.load %arg2[%c0_151, %c0_152, %c4_153, %c0_154, %c1_155] : memref<1x1x18x4x18xbf16, #tpu.memory_space<vmem>>, vector<1x1x1x4x16xbf16>
      %151 = vector.shape_cast %150 : vector<1x1x1x4x16xbf16> to vector<4x16xbf16>
      %c4_156 = arith.constant 4 : index
      %c64_157 = arith.constant 64 : index
      %152 = vector.load %arg8[%c4_156, %c64_157] : memref<36x256xbf16, #tpu.memory_space<vmem>>, vector<4x16xbf16>
      tpu.vector_store %arg8[%c4_156, %c64_157], %151 {strides = array<i32>} : memref<36x256xbf16, #tpu.memory_space<vmem>>, vector<4x16xbf16>,
      %c0_158 = arith.constant 0 : index
      %c0_159 = arith.constant 0 : index
      %c5_160 = arith.constant 5 : index
      %c0_161 = arith.constant 0 : index
      %c1_162 = arith.constant 1 : index
      %153 = vector.load %arg2[%c0_158, %c0_159, %c5_160, %c0_161, %c1_162] : memref<1x1x18x4x18xbf16, #tpu.memory_space<vmem>>, vector<1x1x1x4x16xbf16>
      %154 = vector.shape_cast %153 : vector<1x1x1x4x16xbf16> to vector<4x16xbf16>
      %c4_163 = arith.constant 4 : index
      %c80_164 = arith.constant 80 : index
      %155 = vector.load %arg8[%c4_163, %c80_164] : memref<36x256xbf16, #tpu.memory_space<vmem>>, vector<4x16xbf16>
      tpu.vector_store %arg8[%c4_163, %c80_164], %154 {strides = array<i32>} : memref<36x256xbf16, #tpu.memory_space<vmem>>, vector<4x16xbf16>,
      %c0_165 = arith.constant 0 : index
      %c0_166 = arith.constant 0 : index
      %c6_167 = arith.constant 6 : index
      %c0_168 = arith.constant 0 : index
      %c1_169 = arith.constant 1 : index
      %156 = vector.load %arg2[%c0_165, %c0_166, %c6_167, %c0_168, %c1_169] : memref<1x1x18x4x18xbf16, #tpu.memory_space<vmem>>, vector<1x1x1x4x16xbf16>
      %157 = vector.shape_cast %156 : vector<1x1x1x4x16xbf16> to vector<4x16xbf16>
      %c4_170 = arith.constant 4 : index
      %c96_171 = arith.constant 96 : index
      %158 = vector.load %arg8[%c4_170, %c96_171] : memref<36x256xbf16, #tpu.memory_space<vmem>>, vector<4x16xbf16>
      tpu.vector_store %arg8[%c4_170, %c96_171], %157 {strides = array<i32>} : memref<36x256xbf16, #tpu.memory_space<vmem>>, vector<4x16xbf16>,
      %c0_172 = arith.constant 0 : index
      %c0_173 = arith.constant 0 : index
      %c7_174 = arith.constant 7 : index
      %c0_175 = arith.constant 0 : index
      %c1_176 = arith.constant 1 : index
      %159 = vector.load %arg2[%c0_172, %c0_173, %c7_174, %c0_175, %c1_176] : memref<1x1x18x4x18xbf16, #tpu.memory_space<vmem>>, vector<1x1x1x4x16xbf16>
      %160 = vector.shape_cast %159 : vector<1x1x1x4x16xbf16> to vector<4x16xbf16>
      %c4_177 = arith.constant 4 : index
      %c112_178 = arith.constant 112 : index
      %161 = vector.load %arg8[%c4_177, %c112_178] : memref<36x256xbf16, #tpu.memory_space<vmem>>, vector<4x16xbf16>
      tpu.vector_store %arg8[%c4_177, %c112_178], %160 {strides = array<i32>} : memref<36x256xbf16, #tpu.memory_space<vmem>>, vector<4x16xbf16>,
      %c0_179 = arith.constant 0 : index
      %c0_180 = arith.constant 0 : index
      %c0_181 = arith.constant 0 : index
      %c0_182 = arith.constant 0 : index
      %c2_183 = arith.constant 2 : index
      %162 = vector.load %arg2[%c0_179, %c0_180, %c0_181, %c0_182, %c2_183] : memref<1x1x18x4x18xbf16, #tpu.memory_space<vmem>>, vector<1x1x1x4x16xbf16>
      %163 = vector.shape_cast %162 : vector<1x1x1x4x16xbf16> to vector<4x16xbf16>
      %c8 = arith.constant 8 : index
      %c0_184 = arith.constant 0 : index
      %164 = vector.load %arg8[%c8, %c0_184] : memref<36x256xbf16, #tpu.memory_space<vmem>>, vector<4x16xbf16>
      tpu.vector_store %arg8[%c8, %c0_184], %163 {strides = array<i32>} : memref<36x256xbf16, #tpu.memory_space<vmem>>, vector<4x16xbf16>,
      %c0_185 = arith.constant 0 : index
      %c0_186 = arith.constant 0 : index
      %c1_187 = arith.constant 1 : index
      %c0_188 = arith.constant 0 : index
      %c2_189 = arith.constant 2 : index
      %165 = vector.load %arg2[%c0_185, %c0_186, %c1_187, %c0_188, %c2_189] : memref<1x1x18x4x18xbf16, #tpu.memory_space<vmem>>, vector<1x1x1x4x16xbf16>
      %166 = vector.shape_cast %165 : vector<1x1x1x4x16xbf16> to vector<4x16xbf16>
      %c8_190 = arith.constant 8 : index
      %c16_191 = arith.constant 16 : index
      %167 = vector.load %arg8[%c8_190, %c16_191] : memref<36x256xbf16, #tpu.memory_space<vmem>>, vector<4x16xbf16>
      tpu.vector_store %arg8[%c8_190, %c16_191], %166 {strides = array<i32>} : memref<36x256xbf16, #tpu.memory_space<vmem>>, vector<4x16xbf16>,
      %c0_192 = arith.constant 0 : index
      %c0_193 = arith.constant 0 : index
      %c2_194 = arith.constant 2 : index
      %c0_195 = arith.constant 0 : index
      %c2_196 = arith.constant 2 : index
      %168 = vector.load %arg2[%c0_192, %c0_193, %c2_194, %c0_195, %c2_196] : memref<1x1x18x4x18xbf16, #tpu.memory_space<vmem>>, vector<1x1x1x4x16xbf16>
      %169 = vector.shape_cast %168 : vector<1x1x1x4x16xbf16> to vector<4x16xbf16>
      %c8_197 = arith.constant 8 : index
      %c32_198 = arith.constant 32 : index
      %170 = vector.load %arg8[%c8_197, %c32_198] : memref<36x256xbf16, #tpu.memory_space<vmem>>, vector<4x16xbf16>
      tpu.vector_store %arg8[%c8_197, %c32_198], %169 {strides = array<i32>} : memref<36x256xbf16, #tpu.memory_space<vmem>>, vector<4x16xbf16>,
      %c0_199 = arith.constant 0 : index
      %c0_200 = arith.constant 0 : index
      %c3_201 = arith.constant 3 : index
      %c0_202 = arith.constant 0 : index
      %c2_203 = arith.constant 2 : index
      %171 = vector.load %arg2[%c0_199, %c0_200, %c3_201, %c0_202, %c2_203] : memref<1x1x18x4x18xbf16, #tpu.memory_space<vmem>>, vector<1x1x1x4x16xbf16>
      %172 = vector.shape_cast %171 : vector<1x1x1x4x16xbf16> to vector<4x16xbf16>
      %c8_204 = arith.constant 8 : index
      %c48_205 = arith.constant 48 : index
      %173 = vector.load %arg8[%c8_204, %c48_205] : memref<36x256xbf16, #tpu.memory_space<vmem>>, vector<4x16xbf16>
      tpu.vector_store %arg8[%c8_204, %c48_205], %172 {strides = array<i32>} : memref<36x256xbf16, #tpu.memory_space<vmem>>, vector<4x16xbf16>,
      %c0_206 = arith.constant 0 : index
      %c0_207 = arith.constant 0 : index
      %c4_208 = arith.constant 4 : index
      %c0_209 = arith.constant 0 : index
      %c2_210 = arith.constant 2 : index
      %174 = vector.load %arg2[%c0_206, %c0_207, %c4_208, %c0_209, %c2_210] : memref<1x1x18x4x18xbf16, #tpu.memory_space<vmem>>, vector<1x1x1x4x16xbf16>
      %175 = vector.shape_cast %174 : vector<1x1x1x4x16xbf16> to vector<4x16xbf16>
      %c8_211 = arith.constant 8 : index
      %c64_212 = arith.constant 64 : index
      %176 = vector.load %arg8[%c8_211, %c64_212] : memref<36x256xbf16, #tpu.memory_space<vmem>>, vector<4x16xbf16>
      tpu.vector_store %arg8[%c8_211, %c64_212], %175 {strides = array<i32>} : memref<36x256xbf16, #tpu.memory_space<vmem>>, vector<4x16xbf16>,
      %c0_213 = arith.constant 0 : index
      %c0_214 = arith.constant 0 : index
      %c5_215 = arith.constant 5 : index
      %c0_216 = arith.constant 0 : index
      %c2_217 = arith.constant 2 : index
      %177 = vector.load %arg2[%c0_213, %c0_214, %c5_215, %c0_216, %c2_217] : memref<1x1x18x4x18xbf16, #tpu.memory_space<vmem>>, vector<1x1x1x4x16xbf16>
      %178 = vector.shape_cast %177 : vector<1x1x1x4x16xbf16> to vector<4x16xbf16>
      %c8_218 = arith.constant 8 : index
      %c80_219 = arith.constant 80 : index
      %179 = vector.load %arg8[%c8_218, %c80_219] : memref<36x256xbf16, #tpu.memory_space<vmem>>, vector<4x16xbf16>
      tpu.vector_store %arg8[%c8_218, %c80_219], %178 {strides = array<i32>} : memref<36x256xbf16, #tpu.memory_space<vmem>>, vector<4x16xbf16>,
      %c0_220 = arith.constant 0 : index
      %c0_221 = arith.constant 0 : index
      %c6_222 = arith.constant 6 : index
      %c0_223 = arith.constant 0 : index
      %c2_224 = arith.constant 2 : index
      %180 = vector.load %arg2[%c0_220, %c0_221, %c6_222, %c0_223, %c2_224] : memref<1x1x18x4x18xbf16, #tpu.memory_space<vmem>>, vector<1x1x1x4x16xbf16>
      %181 = vector.shape_cast %180 : vector<1x1x1x4x16xbf16> to vector<4x16xbf16>
      %c8_225 = arith.constant 8 : index
      %c96_226 = arith.constant 96 : index
      %182 = vector.load %arg8[%c8_225, %c96_226] : memref<36x256xbf16, #tpu.memory_space<vmem>>, vector<4x16xbf16>
      tpu.vector_store %arg8[%c8_225, %c96_226], %181 {strides = array<i32>} : memref<36x256xbf16, #tpu.memory_space<vmem>>, vector<4x16xbf16>,
      %c0_227 = arith.constant 0 : index
      %c0_228 = arith.constant 0 : index
      %c7_229 = arith.constant 7 : index
      %c0_230 = arith.constant 0 : index
      %c2_231 = arith.constant 2 : index
      %183 = vector.load %arg2[%c0_227, %c0_228, %c7_229, %c0_230, %c2_231] : memref<1x1x18x4x18xbf16, #tpu.memory_space<vmem>>, vector<1x1x1x4x16xbf16>
      %184 = vector.shape_cast %183 : vector<1x1x1x4x16xbf16> to vector<4x16xbf16>
      %c8_232 = arith.constant 8 : index
      %c112_233 = arith.constant 112 : index
      %185 = vector.load %arg8[%c8_232, %c112_233] : memref<36x256xbf16, #tpu.memory_space<vmem>>, vector<4x16xbf16>
      tpu.vector_store %arg8[%c8_232, %c112_233], %184 {strides = array<i32>} : memref<36x256xbf16, #tpu.memory_space<vmem>>, vector<4x16xbf16>,
    } else {
    }
    %true = arith.constant true
    %8 = arith.xori %5, %true : i1
    %9 = arith.extui %8 : i1 to i32
    %c0_i32_2 = arith.constant 0 : i32
    %10 = arith.cmpi ne, %9, %c0_i32_2 : i32
    scf.if %10 {
      %cst_57 = arith.constant 0.000000e+00 : bf16
      %82 = vector.broadcast %cst_57 : bf16 to vector<4x128xbf16>
      %c0_58 = arith.constant 0 : index
      %c0_59 = arith.constant 0 : index
      %83 = vector.load %arg8[%c0_58, %c0_59] : memref<36x256xbf16, #tpu.memory_space<vmem>>, vector<4x128xbf16>
      tpu.vector_store %arg8[%c0_58, %c0_59], %82 {strides = array<i32>} : memref<36x256xbf16, #tpu.memory_space<vmem>>, vector<4x128xbf16>,
      %cst_60 = arith.constant 0.000000e+00 : bf16
      %84 = vector.broadcast %cst_60 : bf16 to vector<4x128xbf16>
      %c4 = arith.constant 4 : index
      %c0_61 = arith.constant 0 : index
      %85 = vector.load %arg8[%c4, %c0_61] : memref<36x256xbf16, #tpu.memory_space<vmem>>, vector<4x128xbf16>
      tpu.vector_store %arg8[%c4, %c0_61], %84 {strides = array<i32>} : memref<36x256xbf16, #tpu.memory_space<vmem>>, vector<4x128xbf16>,
      %cst_62 = arith.constant 0.000000e+00 : bf16
      %86 = vector.broadcast %cst_62 : bf16 to vector<4x128xbf16>
      %c8 = arith.constant 8 : index
      %c0_63 = arith.constant 0 : index
      %87 = vector.load %arg8[%c8, %c0_63] : memref<36x256xbf16, #tpu.memory_space<vmem>>, vector<4x128xbf16>
      tpu.vector_store %arg8[%c8, %c0_63], %86 {strides = array<i32>} : memref<36x256xbf16, #tpu.memory_space<vmem>>, vector<4x128xbf16>,
    } else {
    }
    %c16_i32_3 = arith.constant 16 : i32
    %11 = arith.muli %arg1, %c16_i32_3 : i32
    %c8_i32 = arith.constant 8 : i32
    %12 = arith.addi %11, %c8_i32 : i32
    %c0_i32_4 = arith.constant 0 : i32
    %13 = arith.addi %12, %c0_i32_4 : i32
    %c1_i32_5 = arith.constant 1 : i32
    %14 = arith.cmpi sge, %13, %c1_i32_5 : i32
    %c17_i32_6 = arith.constant 17 : i32
    %15 = arith.cmpi slt, %13, %c17_i32_6 : i32
    %16 = arith.andi %14, %15 : i1
    %17 = arith.extui %16 : i1 to i32
    %c0_i32_7 = arith.constant 0 : i32
    %18 = arith.cmpi ne, %17, %c0_i32_7 : i32
    scf.if %18 {
      %c0_57 = arith.constant 0 : index
      %c0_58 = arith.constant 0 : index
      %c8 = arith.constant 8 : index
      %c0_59 = arith.constant 0 : index
      %c0_60 = arith.constant 0 : index
      %82 = vector.load %arg2[%c0_57, %c0_58, %c8, %c0_59, %c0_60] : memref<1x1x18x4x18xbf16, #tpu.memory_space<vmem>>, vector<1x1x1x4x16xbf16>
      %83 = vector.shape_cast %82 : vector<1x1x1x4x16xbf16> to vector<4x16xbf16>
      %c0_61 = arith.constant 0 : index
      %c0_62 = arith.constant 0 : index
      %c0_63 = arith.constant 0 : index
      %84 = vector.load %arg4[%c0_61, %c0_62, %c0_63] : memref<3x1x16xbf16, #tpu.memory_space<vmem>>, vector<1x1x16xbf16>
      %85 = vector.shape_cast %84 : vector<1x1x16xbf16> to vector<1x16xbf16>
      %86 = vector.broadcast %85 : vector<1x16xbf16> to vector<4x16xbf16>
      %87 = arith.mulf %83, %86 : vector<4x16xbf16>
      %c0_64 = arith.constant 0 : index
      %c128 = arith.constant 128 : index
      %88 = vector.load %arg8[%c0_64, %c128] : memref<36x256xbf16, #tpu.memory_space<vmem>>, vector<4x16xbf16>
      tpu.vector_store %arg8[%c0_64, %c128], %87 {strides = array<i32>} : memref<36x256xbf16, #tpu.memory_space<vmem>>, vector<4x16xbf16>,
      %c0_65 = arith.constant 0 : index
      %c0_66 = arith.constant 0 : index
      %c9 = arith.constant 9 : index
      %c0_67 = arith.constant 0 : index
      %c0_68 = arith.constant 0 : index
      %89 = vector.load %arg2[%c0_65, %c0_66, %c9, %c0_67, %c0_68] : memref<1x1x18x4x18xbf16, #tpu.memory_space<vmem>>, vector<1x1x1x4x16xbf16>
      %90 = vector.shape_cast %89 : vector<1x1x1x4x16xbf16> to vector<4x16xbf16>
      %c0_69 = arith.constant 0 : index
      %c0_70 = arith.constant 0 : index
      %c0_71 = arith.constant 0 : index
      %91 = vector.load %arg4[%c0_69, %c0_70, %c0_71] : memref<3x1x16xbf16, #tpu.memory_space<vmem>>, vector<1x1x16xbf16>
      %92 = vector.shape_cast %91 : vector<1x1x16xbf16> to vector<1x16xbf16>
      %93 = vector.broadcast %92 : vector<1x16xbf16> to vector<4x16xbf16>
      %94 = arith.mulf %90, %93 : vector<4x16xbf16>
      %c0_72 = arith.constant 0 : index
      %c144 = arith.constant 144 : index
      %95 = vector.load %arg8[%c0_72, %c144] : memref<36x256xbf16, #tpu.memory_space<vmem>>, vector<4x16xbf16>
      tpu.vector_store %arg8[%c0_72, %c144], %94 {strides = array<i32>} : memref<36x256xbf16, #tpu.memory_space<vmem>>, vector<4x16xbf16>,
      %c0_73 = arith.constant 0 : index
      %c0_74 = arith.constant 0 : index
      %c10 = arith.constant 10 : index
      %c0_75 = arith.constant 0 : index
      %c0_76 = arith.constant 0 : index
      %96 = vector.load %arg2[%c0_73, %c0_74, %c10, %c0_75, %c0_76] : memref<1x1x18x4x18xbf16, #tpu.memory_space<vmem>>, vector<1x1x1x4x16xbf16>
      %97 = vector.shape_cast %96 : vector<1x1x1x4x16xbf16> to vector<4x16xbf16>
      %c0_77 = arith.constant 0 : index
      %c0_78 = arith.constant 0 : index
      %c0_79 = arith.constant 0 : index
      %98 = vector.load %arg4[%c0_77, %c0_78, %c0_79] : memref<3x1x16xbf16, #tpu.memory_space<vmem>>, vector<1x1x16xbf16>
      %99 = vector.shape_cast %98 : vector<1x1x16xbf16> to vector<1x16xbf16>
      %100 = vector.broadcast %99 : vector<1x16xbf16> to vector<4x16xbf16>
      %101 = arith.mulf %97, %100 : vector<4x16xbf16>
      %c0_80 = arith.constant 0 : index
      %c160 = arith.constant 160 : index
      %102 = vector.load %arg8[%c0_80, %c160] : memref<36x256xbf16, #tpu.memory_space<vmem>>, vector<4x16xbf16>
      tpu.vector_store %arg8[%c0_80, %c160], %101 {strides = array<i32>} : memref<36x256xbf16, #tpu.memory_space<vmem>>, vector<4x16xbf16>,
      %c0_81 = arith.constant 0 : index
      %c0_82 = arith.constant 0 : index
      %c11 = arith.constant 11 : index
      %c0_83 = arith.constant 0 : index
      %c0_84 = arith.constant 0 : index
      %103 = vector.load %arg2[%c0_81, %c0_82, %c11, %c0_83, %c0_84] : memref<1x1x18x4x18xbf16, #tpu.memory_space<vmem>>, vector<1x1x1x4x16xbf16>
      %104 = vector.shape_cast %103 : vector<1x1x1x4x16xbf16> to vector<4x16xbf16>
      %c0_85 = arith.constant 0 : index
      %c0_86 = arith.constant 0 : index
      %c0_87 = arith.constant 0 : index
      %105 = vector.load %arg4[%c0_85, %c0_86, %c0_87] : memref<3x1x16xbf16, #tpu.memory_space<vmem>>, vector<1x1x16xbf16>
      %106 = vector.shape_cast %105 : vector<1x1x16xbf16> to vector<1x16xbf16>
      %107 = vector.broadcast %106 : vector<1x16xbf16> to vector<4x16xbf16>
      %108 = arith.mulf %104, %107 : vector<4x16xbf16>
      %c0_88 = arith.constant 0 : index
      %c176 = arith.constant 176 : index
      %109 = vector.load %arg8[%c0_88, %c176] : memref<36x256xbf16, #tpu.memory_space<vmem>>, vector<4x16xbf16>
      tpu.vector_store %arg8[%c0_88, %c176], %108 {strides = array<i32>} : memref<36x256xbf16, #tpu.memory_space<vmem>>, vector<4x16xbf16>,
      %c0_89 = arith.constant 0 : index
      %c0_90 = arith.constant 0 : index
      %c12 = arith.constant 12 : index
      %c0_91 = arith.constant 0 : index
      %c0_92 = arith.constant 0 : index
      %110 = vector.load %arg2[%c0_89, %c0_90, %c12, %c0_91, %c0_92] : memref<1x1x18x4x18xbf16, #tpu.memory_space<vmem>>, vector<1x1x1x4x16xbf16>
      %111 = vector.shape_cast %110 : vector<1x1x1x4x16xbf16> to vector<4x16xbf16>
      %c0_93 = arith.constant 0 : index
      %c0_94 = arith.constant 0 : index
      %c0_95 = arith.constant 0 : index
      %112 = vector.load %arg4[%c0_93, %c0_94, %c0_95] : memref<3x1x16xbf16, #tpu.memory_space<vmem>>, vector<1x1x16xbf16>
      %113 = vector.shape_cast %112 : vector<1x1x16xbf16> to vector<1x16xbf16>
      %114 = vector.broadcast %113 : vector<1x16xbf16> to vector<4x16xbf16>
      %115 = arith.mulf %111, %114 : vector<4x16xbf16>
      %c0_96 = arith.constant 0 : index
      %c192 = arith.constant 192 : index
      %116 = vector.load %arg8[%c0_96, %c192] : memref<36x256xbf16, #tpu.memory_space<vmem>>, vector<4x16xbf16>
      tpu.vector_store %arg8[%c0_96, %c192], %115 {strides = array<i32>} : memref<36x256xbf16, #tpu.memory_space<vmem>>, vector<4x16xbf16>,
      %c0_97 = arith.constant 0 : index
      %c0_98 = arith.constant 0 : index
      %c13 = arith.constant 13 : index
      %c0_99 = arith.constant 0 : index
      %c0_100 = arith.constant 0 : index
      %117 = vector.load %arg2[%c0_97, %c0_98, %c13, %c0_99, %c0_100] : memref<1x1x18x4x18xbf16, #tpu.memory_space<vmem>>, vector<1x1x1x4x16xbf16>
      %118 = vector.shape_cast %117 : vector<1x1x1x4x16xbf16> to vector<4x16xbf16>
      %c0_101 = arith.constant 0 : index
      %c0_102 = arith.constant 0 : index
      %c0_103 = arith.constant 0 : index
      %119 = vector.load %arg4[%c0_101, %c0_102, %c0_103] : memref<3x1x16xbf16, #tpu.memory_space<vmem>>, vector<1x1x16xbf16>
      %120 = vector.shape_cast %119 : vector<1x1x16xbf16> to vector<1x16xbf16>
      %121 = vector.broadcast %120 : vector<1x16xbf16> to vector<4x16xbf16>
      %122 = arith.mulf %118, %121 : vector<4x16xbf16>
      %c0_104 = arith.constant 0 : index
      %c208 = arith.constant 208 : index
      %123 = vector.load %arg8[%c0_104, %c208] : memref<36x256xbf16, #tpu.memory_space<vmem>>, vector<4x16xbf16>
      tpu.vector_store %arg8[%c0_104, %c208], %122 {strides = array<i32>} : memref<36x256xbf16, #tpu.memory_space<vmem>>, vector<4x16xbf16>,
      %c0_105 = arith.constant 0 : index
      %c0_106 = arith.constant 0 : index
      %c14 = arith.constant 14 : index
      %c0_107 = arith.constant 0 : index
      %c0_108 = arith.constant 0 : index
      %124 = vector.load %arg2[%c0_105, %c0_106, %c14, %c0_107, %c0_108] : memref<1x1x18x4x18xbf16, #tpu.memory_space<vmem>>, vector<1x1x1x4x16xbf16>
      %125 = vector.shape_cast %124 : vector<1x1x1x4x16xbf16> to vector<4x16xbf16>
      %c0_109 = arith.constant 0 : index
      %c0_110 = arith.constant 0 : index
      %c0_111 = arith.constant 0 : index
      %126 = vector.load %arg4[%c0_109, %c0_110, %c0_111] : memref<3x1x16xbf16, #tpu.memory_space<vmem>>, vector<1x1x16xbf16>
      %127 = vector.shape_cast %126 : vector<1x1x16xbf16> to vector<1x16xbf16>
      %128 = vector.broadcast %127 : vector<1x16xbf16> to vector<4x16xbf16>
      %129 = arith.mulf %125, %128 : vector<4x16xbf16>
      %c0_112 = arith.constant 0 : index
      %c224 = arith.constant 224 : index
      %130 = vector.load %arg8[%c0_112, %c224] : memref<36x256xbf16, #tpu.memory_space<vmem>>, vector<4x16xbf16>
      tpu.vector_store %arg8[%c0_112, %c224], %129 {strides = array<i32>} : memref<36x256xbf16, #tpu.memory_space<vmem>>, vector<4x16xbf16>,
      %c0_113 = arith.constant 0 : index
      %c0_114 = arith.constant 0 : index
      %c15 = arith.constant 15 : index
      %c0_115 = arith.constant 0 : index
      %c0_116 = arith.constant 0 : index
      %131 = vector.load %arg2[%c0_113, %c0_114, %c15, %c0_115, %c0_116] : memref<1x1x18x4x18xbf16, #tpu.memory_space<vmem>>, vector<1x1x1x4x16xbf16>
      %132 = vector.shape_cast %131 : vector<1x1x1x4x16xbf16> to vector<4x16xbf16>
      %c0_117 = arith.constant 0 : index
      %c0_118 = arith.constant 0 : index
      %c0_119 = arith.constant 0 : index
      %133 = vector.load %arg4[%c0_117, %c0_118, %c0_119] : memref<3x1x16xbf16, #tpu.memory_space<vmem>>, vector<1x1x16xbf16>
      %134 = vector.shape_cast %133 : vector<1x1x16xbf16> to vector<1x16xbf16>
      %135 = vector.broadcast %134 : vector<1x16xbf16> to vector<4x16xbf16>
      %136 = arith.mulf %132, %135 : vector<4x16xbf16>
      %c0_120 = arith.constant 0 : index
      %c240 = arith.constant 240 : index
      %137 = vector.load %arg8[%c0_120, %c240] : memref<36x256xbf16, #tpu.memory_space<vmem>>, vector<4x16xbf16>
      tpu.vector_store %arg8[%c0_120, %c240], %136 {strides = array<i32>} : memref<36x256xbf16, #tpu.memory_space<vmem>>, vector<4x16xbf16>,
      %c0_121 = arith.constant 0 : index
      %c0_122 = arith.constant 0 : index
      %c8_123 = arith.constant 8 : index
      %c0_124 = arith.constant 0 : index
      %c1 = arith.constant 1 : index
      %138 = vector.load %arg2[%c0_121, %c0_122, %c8_123, %c0_124, %c1] : memref<1x1x18x4x18xbf16, #tpu.memory_space<vmem>>, vector<1x1x1x4x16xbf16>
      %139 = vector.shape_cast %138 : vector<1x1x1x4x16xbf16> to vector<4x16xbf16>
      %c4 = arith.constant 4 : index
      %c128_125 = arith.constant 128 : index
      %140 = vector.load %arg8[%c4, %c128_125] : memref<36x256xbf16, #tpu.memory_space<vmem>>, vector<4x16xbf16>
      tpu.vector_store %arg8[%c4, %c128_125], %139 {strides = array<i32>} : memref<36x256xbf16, #tpu.memory_space<vmem>>, vector<4x16xbf16>,
      %c0_126 = arith.constant 0 : index
      %c0_127 = arith.constant 0 : index
      %c9_128 = arith.constant 9 : index
      %c0_129 = arith.constant 0 : index
      %c1_130 = arith.constant 1 : index
      %141 = vector.load %arg2[%c0_126, %c0_127, %c9_128, %c0_129, %c1_130] : memref<1x1x18x4x18xbf16, #tpu.memory_space<vmem>>, vector<1x1x1x4x16xbf16>
      %142 = vector.shape_cast %141 : vector<1x1x1x4x16xbf16> to vector<4x16xbf16>
      %c4_131 = arith.constant 4 : index
      %c144_132 = arith.constant 144 : index
      %143 = vector.load %arg8[%c4_131, %c144_132] : memref<36x256xbf16, #tpu.memory_space<vmem>>, vector<4x16xbf16>
      tpu.vector_store %arg8[%c4_131, %c144_132], %142 {strides = array<i32>} : memref<36x256xbf16, #tpu.memory_space<vmem>>, vector<4x16xbf16>,
      %c0_133 = arith.constant 0 : index
      %c0_134 = arith.constant 0 : index
      %c10_135 = arith.constant 10 : index
      %c0_136 = arith.constant 0 : index
      %c1_137 = arith.constant 1 : index
      %144 = vector.load %arg2[%c0_133, %c0_134, %c10_135, %c0_136, %c1_137] : memref<1x1x18x4x18xbf16, #tpu.memory_space<vmem>>, vector<1x1x1x4x16xbf16>
      %145 = vector.shape_cast %144 : vector<1x1x1x4x16xbf16> to vector<4x16xbf16>
      %c4_138 = arith.constant 4 : index
      %c160_139 = arith.constant 160 : index
      %146 = vector.load %arg8[%c4_138, %c160_139] : memref<36x256xbf16, #tpu.memory_space<vmem>>, vector<4x16xbf16>
      tpu.vector_store %arg8[%c4_138, %c160_139], %145 {strides = array<i32>} : memref<36x256xbf16, #tpu.memory_space<vmem>>, vector<4x16xbf16>,
      %c0_140 = arith.constant 0 : index
      %c0_141 = arith.constant 0 : index
      %c11_142 = arith.constant 11 : index
      %c0_143 = arith.constant 0 : index
      %c1_144 = arith.constant 1 : index
      %147 = vector.load %arg2[%c0_140, %c0_141, %c11_142, %c0_143, %c1_144] : memref<1x1x18x4x18xbf16, #tpu.memory_space<vmem>>, vector<1x1x1x4x16xbf16>
      %148 = vector.shape_cast %147 : vector<1x1x1x4x16xbf16> to vector<4x16xbf16>
      %c4_145 = arith.constant 4 : index
      %c176_146 = arith.constant 176 : index
      %149 = vector.load %arg8[%c4_145, %c176_146] : memref<36x256xbf16, #tpu.memory_space<vmem>>, vector<4x16xbf16>
      tpu.vector_store %arg8[%c4_145, %c176_146], %148 {strides = array<i32>} : memref<36x256xbf16, #tpu.memory_space<vmem>>, vector<4x16xbf16>,
      %c0_147 = arith.constant 0 : index
      %c0_148 = arith.constant 0 : index
      %c12_149 = arith.constant 12 : index
      %c0_150 = arith.constant 0 : index
      %c1_151 = arith.constant 1 : index
      %150 = vector.load %arg2[%c0_147, %c0_148, %c12_149, %c0_150, %c1_151] : memref<1x1x18x4x18xbf16, #tpu.memory_space<vmem>>, vector<1x1x1x4x16xbf16>
      %151 = vector.shape_cast %150 : vector<1x1x1x4x16xbf16> to vector<4x16xbf16>
      %c4_152 = arith.constant 4 : index
      %c192_153 = arith.constant 192 : index
      %152 = vector.load %arg8[%c4_152, %c192_153] : memref<36x256xbf16, #tpu.memory_space<vmem>>, vector<4x16xbf16>
      tpu.vector_store %arg8[%c4_152, %c192_153], %151 {strides = array<i32>} : memref<36x256xbf16, #tpu.memory_space<vmem>>, vector<4x16xbf16>,
      %c0_154 = arith.constant 0 : index
      %c0_155 = arith.constant 0 : index
      %c13_156 = arith.constant 13 : index
      %c0_157 = arith.constant 0 : index
      %c1_158 = arith.constant 1 : index
      %153 = vector.load %arg2[%c0_154, %c0_155, %c13_156, %c0_157, %c1_158] : memref<1x1x18x4x18xbf16, #tpu.memory_space<vmem>>, vector<1x1x1x4x16xbf16>
      %154 = vector.shape_cast %153 : vector<1x1x1x4x16xbf16> to vector<4x16xbf16>
      %c4_159 = arith.constant 4 : index
      %c208_160 = arith.constant 208 : index
      %155 = vector.load %arg8[%c4_159, %c208_160] : memref<36x256xbf16, #tpu.memory_space<vmem>>, vector<4x16xbf16>
      tpu.vector_store %arg8[%c4_159, %c208_160], %154 {strides = array<i32>} : memref<36x256xbf16, #tpu.memory_space<vmem>>, vector<4x16xbf16>,
      %c0_161 = arith.constant 0 : index
      %c0_162 = arith.constant 0 : index
      %c14_163 = arith.constant 14 : index
      %c0_164 = arith.constant 0 : index
      %c1_165 = arith.constant 1 : index
      %156 = vector.load %arg2[%c0_161, %c0_162, %c14_163, %c0_164, %c1_165] : memref<1x1x18x4x18xbf16, #tpu.memory_space<vmem>>, vector<1x1x1x4x16xbf16>
      %157 = vector.shape_cast %156 : vector<1x1x1x4x16xbf16> to vector<4x16xbf16>
      %c4_166 = arith.constant 4 : index
      %c224_167 = arith.constant 224 : index
      %158 = vector.load %arg8[%c4_166, %c224_167] : memref<36x256xbf16, #tpu.memory_space<vmem>>, vector<4x16xbf16>
      tpu.vector_store %arg8[%c4_166, %c224_167], %157 {strides = array<i32>} : memref<36x256xbf16, #tpu.memory_space<vmem>>, vector<4x16xbf16>,
      %c0_168 = arith.constant 0 : index
      %c0_169 = arith.constant 0 : index
      %c15_170 = arith.constant 15 : index
      %c0_171 = arith.constant 0 : index
      %c1_172 = arith.constant 1 : index
      %159 = vector.load %arg2[%c0_168, %c0_169, %c15_170, %c0_171, %c1_172] : memref<1x1x18x4x18xbf16, #tpu.memory_space<vmem>>, vector<1x1x1x4x16xbf16>
      %160 = vector.shape_cast %159 : vector<1x1x1x4x16xbf16> to vector<4x16xbf16>
      %c4_173 = arith.constant 4 : index
      %c240_174 = arith.constant 240 : index
      %161 = vector.load %arg8[%c4_173, %c240_174] : memref<36x256xbf16, #tpu.memory_space<vmem>>, vector<4x16xbf16>
      tpu.vector_store %arg8[%c4_173, %c240_174], %160 {strides = array<i32>} : memref<36x256xbf16, #tpu.memory_space<vmem>>, vector<4x16xbf16>,
      %c0_175 = arith.constant 0 : index
      %c0_176 = arith.constant 0 : index
      %c8_177 = arith.constant 8 : index
      %c0_178 = arith.constant 0 : index
      %c2 = arith.constant 2 : index
      %162 = vector.load %arg2[%c0_175, %c0_176, %c8_177, %c0_178, %c2] : memref<1x1x18x4x18xbf16, #tpu.memory_space<vmem>>, vector<1x1x1x4x16xbf16>
      %163 = vector.shape_cast %162 : vector<1x1x1x4x16xbf16> to vector<4x16xbf16>
      %c8_179 = arith.constant 8 : index
      %c128_180 = arith.constant 128 : index
      %164 = vector.load %arg8[%c8_179, %c128_180] : memref<36x256xbf16, #tpu.memory_space<vmem>>, vector<4x16xbf16>
      tpu.vector_store %arg8[%c8_179, %c128_180], %163 {strides = array<i32>} : memref<36x256xbf16, #tpu.memory_space<vmem>>, vector<4x16xbf16>,
      %c0_181 = arith.constant 0 : index
      %c0_182 = arith.constant 0 : index
      %c9_183 = arith.constant 9 : index
      %c0_184 = arith.constant 0 : index
      %c2_185 = arith.constant 2 : index
      %165 = vector.load %arg2[%c0_181, %c0_182, %c9_183, %c0_184, %c2_185] : memref<1x1x18x4x18xbf16, #tpu.memory_space<vmem>>, vector<1x1x1x4x16xbf16>
      %166 = vector.shape_cast %165 : vector<1x1x1x4x16xbf16> to vector<4x16xbf16>
      %c8_186 = arith.constant 8 : index
      %c144_187 = arith.constant 144 : index
      %167 = vector.load %arg8[%c8_186, %c144_187] : memref<36x256xbf16, #tpu.memory_space<vmem>>, vector<4x16xbf16>
      tpu.vector_store %arg8[%c8_186, %c144_187], %166 {strides = array<i32>} : memref<36x256xbf16, #tpu.memory_space<vmem>>, vector<4x16xbf16>,
      %c0_188 = arith.constant 0 : index
      %c0_189 = arith.constant 0 : index
      %c10_190 = arith.constant 10 : index
      %c0_191 = arith.constant 0 : index
      %c2_192 = arith.constant 2 : index
      %168 = vector.load %arg2[%c0_188, %c0_189, %c10_190, %c0_191, %c2_192] : memref<1x1x18x4x18xbf16, #tpu.memory_space<vmem>>, vector<1x1x1x4x16xbf16>
      %169 = vector.shape_cast %168 : vector<1x1x1x4x16xbf16> to vector<4x16xbf16>
      %c8_193 = arith.constant 8 : index
      %c160_194 = arith.constant 160 : index
      %170 = vector.load %arg8[%c8_193, %c160_194] : memref<36x256xbf16, #tpu.memory_space<vmem>>, vector<4x16xbf16>
      tpu.vector_store %arg8[%c8_193, %c160_194], %169 {strides = array<i32>} : memref<36x256xbf16, #tpu.memory_space<vmem>>, vector<4x16xbf16>,
      %c0_195 = arith.constant 0 : index
      %c0_196 = arith.constant 0 : index
      %c11_197 = arith.constant 11 : index
      %c0_198 = arith.constant 0 : index
      %c2_199 = arith.constant 2 : index
      %171 = vector.load %arg2[%c0_195, %c0_196, %c11_197, %c0_198, %c2_199] : memref<1x1x18x4x18xbf16, #tpu.memory_space<vmem>>, vector<1x1x1x4x16xbf16>
      %172 = vector.shape_cast %171 : vector<1x1x1x4x16xbf16> to vector<4x16xbf16>
      %c8_200 = arith.constant 8 : index
      %c176_201 = arith.constant 176 : index
      %173 = vector.load %arg8[%c8_200, %c176_201] : memref<36x256xbf16, #tpu.memory_space<vmem>>, vector<4x16xbf16>
      tpu.vector_store %arg8[%c8_200, %c176_201], %172 {strides = array<i32>} : memref<36x256xbf16, #tpu.memory_space<vmem>>, vector<4x16xbf16>,
      %c0_202 = arith.constant 0 : index
      %c0_203 = arith.constant 0 : index
      %c12_204 = arith.constant 12 : index
      %c0_205 = arith.constant 0 : index
      %c2_206 = arith.constant 2 : index
      %174 = vector.load %arg2[%c0_202, %c0_203, %c12_204, %c0_205, %c2_206] : memref<1x1x18x4x18xbf16, #tpu.memory_space<vmem>>, vector<1x1x1x4x16xbf16>
      %175 = vector.shape_cast %174 : vector<1x1x1x4x16xbf16> to vector<4x16xbf16>
      %c8_207 = arith.constant 8 : index
      %c192_208 = arith.constant 192 : index
      %176 = vector.load %arg8[%c8_207, %c192_208] : memref<36x256xbf16, #tpu.memory_space<vmem>>, vector<4x16xbf16>
      tpu.vector_store %arg8[%c8_207, %c192_208], %175 {strides = array<i32>} : memref<36x256xbf16, #tpu.memory_space<vmem>>, vector<4x16xbf16>,
      %c0_209 = arith.constant 0 : index
      %c0_210 = arith.constant 0 : index
      %c13_211 = arith.constant 13 : index
      %c0_212 = arith.constant 0 : index
      %c2_213 = arith.constant 2 : index
      %177 = vector.load %arg2[%c0_209, %c0_210, %c13_211, %c0_212, %c2_213] : memref<1x1x18x4x18xbf16, #tpu.memory_space<vmem>>, vector<1x1x1x4x16xbf16>
      %178 = vector.shape_cast %177 : vector<1x1x1x4x16xbf16> to vector<4x16xbf16>
      %c8_214 = arith.constant 8 : index
      %c208_215 = arith.constant 208 : index
      %179 = vector.load %arg8[%c8_214, %c208_215] : memref<36x256xbf16, #tpu.memory_space<vmem>>, vector<4x16xbf16>
      tpu.vector_store %arg8[%c8_214, %c208_215], %178 {strides = array<i32>} : memref<36x256xbf16, #tpu.memory_space<vmem>>, vector<4x16xbf16>,
      %c0_216 = arith.constant 0 : index
      %c0_217 = arith.constant 0 : index
      %c14_218 = arith.constant 14 : index
      %c0_219 = arith.constant 0 : index
      %c2_220 = arith.constant 2 : index
      %180 = vector.load %arg2[%c0_216, %c0_217, %c14_218, %c0_219, %c2_220] : memref<1x1x18x4x18xbf16, #tpu.memory_space<vmem>>, vector<1x1x1x4x16xbf16>
      %181 = vector.shape_cast %180 : vector<1x1x1x4x16xbf16> to vector<4x16xbf16>
      %c8_221 = arith.constant 8 : index
      %c224_222 = arith.constant 224 : index
      %182 = vector.load %arg8[%c8_221, %c224_222] : memref<36x256xbf16, #tpu.memory_space<vmem>>, vector<4x16xbf16>
      tpu.vector_store %arg8[%c8_221, %c224_222], %181 {strides = array<i32>} : memref<36x256xbf16, #tpu.memory_space<vmem>>, vector<4x16xbf16>,
      %c0_223 = arith.constant 0 : index
      %c0_224 = arith.constant 0 : index
      %c15_225 = arith.constant 15 : index
      %c0_226 = arith.constant 0 : index
      %c2_227 = arith.constant 2 : index
      %183 = vector.load %arg2[%c0_223, %c0_224, %c15_225, %c0_226, %c2_227] : memref<1x1x18x4x18xbf16, #tpu.memory_space<vmem>>, vector<1x1x1x4x16xbf16>
      %184 = vector.shape_cast %183 : vector<1x1x1x4x16xbf16> to vector<4x16xbf16>
      %c8_228 = arith.constant 8 : index
      %c240_229 = arith.constant 240 : index
      %185 = vector.load %arg8[%c8_228, %c240_229] : memref<36x256xbf16, #tpu.memory_space<vmem>>, vector<4x16xbf16>
      tpu.vector_store %arg8[%c8_228, %c240_229], %184 {strides = array<i32>} : memref<36x256xbf16, #tpu.memory_space<vmem>>, vector<4x16xbf16>,
    } else {
    }
    %true_8 = arith.constant true
    %19 = arith.xori %16, %true_8 : i1
    %20 = arith.extui %19 : i1 to i32
    %c0_i32_9 = arith.constant 0 : i32
    %21 = arith.cmpi ne, %20, %c0_i32_9 : i32
    scf.if %21 {
      %cst_57 = arith.constant 0.000000e+00 : bf16
      %82 = vector.broadcast %cst_57 : bf16 to vector<4x128xbf16>
      %c0_58 = arith.constant 0 : index
      %c128 = arith.constant 128 : index
      %83 = vector.load %arg8[%c0_58, %c128] : memref<36x256xbf16, #tpu.memory_space<vmem>>, vector<4x128xbf16>
      tpu.vector_store %arg8[%c0_58, %c128], %82 {strides = array<i32>} : memref<36x256xbf16, #tpu.memory_space<vmem>>, vector<4x128xbf16>,
      %cst_59 = arith.constant 0.000000e+00 : bf16
      %84 = vector.broadcast %cst_59 : bf16 to vector<4x128xbf16>
      %c4 = arith.constant 4 : index
      %c128_60 = arith.constant 128 : index
      %85 = vector.load %arg8[%c4, %c128_60] : memref<36x256xbf16, #tpu.memory_space<vmem>>, vector<4x128xbf16>
      tpu.vector_store %arg8[%c4, %c128_60], %84 {strides = array<i32>} : memref<36x256xbf16, #tpu.memory_space<vmem>>, vector<4x128xbf16>,
      %cst_61 = arith.constant 0.000000e+00 : bf16
      %86 = vector.broadcast %cst_61 : bf16 to vector<4x128xbf16>
      %c8 = arith.constant 8 : index
      %c128_62 = arith.constant 128 : index
      %87 = vector.load %arg8[%c8, %c128_62] : memref<36x256xbf16, #tpu.memory_space<vmem>>, vector<4x128xbf16>
      tpu.vector_store %arg8[%c8, %c128_62], %86 {strides = array<i32>} : memref<36x256xbf16, #tpu.memory_space<vmem>>, vector<4x128xbf16>,
    } else {
    }
    %c16_i32_10 = arith.constant 16 : i32
    %22 = arith.muli %arg1, %c16_i32_10 : i32
    %c0_i32_11 = arith.constant 0 : i32
    %23 = arith.addi %22, %c0_i32_11 : i32
    %c1_i32_12 = arith.constant 1 : i32
    %24 = arith.addi %23, %c1_i32_12 : i32
    %c1_i32_13 = arith.constant 1 : i32
    %25 = arith.cmpi sge, %24, %c1_i32_13 : i32
    %c17_i32_14 = arith.constant 17 : i32
    %26 = arith.cmpi slt, %24, %c17_i32_14 : i32
    %27 = arith.andi %25, %26 : i1
    %28 = arith.extui %27 : i1 to i32
    %c0_i32_15 = arith.constant 0 : i32
    %29 = arith.cmpi ne, %28, %c0_i32_15 : i32
    scf.if %29 {
      %c0_57 = arith.constant 0 : index
      %c0_58 = arith.constant 0 : index
      %c1 = arith.constant 1 : index
      %c0_59 = arith.constant 0 : index
      %c0_60 = arith.constant 0 : index
      %82 = vector.load %arg2[%c0_57, %c0_58, %c1, %c0_59, %c0_60] : memref<1x1x18x4x18xbf16, #tpu.memory_space<vmem>>, vector<1x1x1x4x16xbf16>
      %83 = vector.shape_cast %82 : vector<1x1x1x4x16xbf16> to vector<4x16xbf16>
      %c0_61 = arith.constant 0 : index
      %c0_62 = arith.constant 0 : index
      %c0_63 = arith.constant 0 : index
      %84 = vector.load %arg4[%c0_61, %c0_62, %c0_63] : memref<3x1x16xbf16, #tpu.memory_space<vmem>>, vector<1x1x16xbf16>
      %85 = vector.shape_cast %84 : vector<1x1x16xbf16> to vector<1x16xbf16>
      %86 = vector.broadcast %85 : vector<1x16xbf16> to vector<4x16xbf16>
      %87 = arith.mulf %83, %86 : vector<4x16xbf16>
      %c12 = arith.constant 12 : index
      %c0_64 = arith.constant 0 : index
      %88 = vector.load %arg8[%c12, %c0_64] : memref<36x256xbf16, #tpu.memory_space<vmem>>, vector<4x16xbf16>
      tpu.vector_store %arg8[%c12, %c0_64], %87 {strides = array<i32>} : memref<36x256xbf16, #tpu.memory_space<vmem>>, vector<4x16xbf16>,
      %c0_65 = arith.constant 0 : index
      %c0_66 = arith.constant 0 : index
      %c2 = arith.constant 2 : index
      %c0_67 = arith.constant 0 : index
      %c0_68 = arith.constant 0 : index
      %89 = vector.load %arg2[%c0_65, %c0_66, %c2, %c0_67, %c0_68] : memref<1x1x18x4x18xbf16, #tpu.memory_space<vmem>>, vector<1x1x1x4x16xbf16>
      %90 = vector.shape_cast %89 : vector<1x1x1x4x16xbf16> to vector<4x16xbf16>
      %c0_69 = arith.constant 0 : index
      %c0_70 = arith.constant 0 : index
      %c0_71 = arith.constant 0 : index
      %91 = vector.load %arg4[%c0_69, %c0_70, %c0_71] : memref<3x1x16xbf16, #tpu.memory_space<vmem>>, vector<1x1x16xbf16>
      %92 = vector.shape_cast %91 : vector<1x1x16xbf16> to vector<1x16xbf16>
      %93 = vector.broadcast %92 : vector<1x16xbf16> to vector<4x16xbf16>
      %94 = arith.mulf %90, %93 : vector<4x16xbf16>
      %c12_72 = arith.constant 12 : index
      %c16 = arith.constant 16 : index
      %95 = vector.load %arg8[%c12_72, %c16] : memref<36x256xbf16, #tpu.memory_space<vmem>>, vector<4x16xbf16>
      tpu.vector_store %arg8[%c12_72, %c16], %94 {strides = array<i32>} : memref<36x256xbf16, #tpu.memory_space<vmem>>, vector<4x16xbf16>,
      %c0_73 = arith.constant 0 : index
      %c0_74 = arith.constant 0 : index
      %c3 = arith.constant 3 : index
      %c0_75 = arith.constant 0 : index
      %c0_76 = arith.constant 0 : index
      %96 = vector.load %arg2[%c0_73, %c0_74, %c3, %c0_75, %c0_76] : memref<1x1x18x4x18xbf16, #tpu.memory_space<vmem>>, vector<1x1x1x4x16xbf16>
      %97 = vector.shape_cast %96 : vector<1x1x1x4x16xbf16> to vector<4x16xbf16>
      %c0_77 = arith.constant 0 : index
      %c0_78 = arith.constant 0 : index
      %c0_79 = arith.constant 0 : index
      %98 = vector.load %arg4[%c0_77, %c0_78, %c0_79] : memref<3x1x16xbf16, #tpu.memory_space<vmem>>, vector<1x1x16xbf16>
      %99 = vector.shape_cast %98 : vector<1x1x16xbf16> to vector<1x16xbf16>
      %100 = vector.broadcast %99 : vector<1x16xbf16> to vector<4x16xbf16>
      %101 = arith.mulf %97, %100 : vector<4x16xbf16>
      %c12_80 = arith.constant 12 : index
      %c32 = arith.constant 32 : index
      %102 = vector.load %arg8[%c12_80, %c32] : memref<36x256xbf16, #tpu.memory_space<vmem>>, vector<4x16xbf16>
      tpu.vector_store %arg8[%c12_80, %c32], %101 {strides = array<i32>} : memref<36x256xbf16, #tpu.memory_space<vmem>>, vector<4x16xbf16>,
      %c0_81 = arith.constant 0 : index
      %c0_82 = arith.constant 0 : index
      %c4 = arith.constant 4 : index
      %c0_83 = arith.constant 0 : index
      %c0_84 = arith.constant 0 : index
      %103 = vector.load %arg2[%c0_81, %c0_82, %c4, %c0_83, %c0_84] : memref<1x1x18x4x18xbf16, #tpu.memory_space<vmem>>, vector<1x1x1x4x16xbf16>
      %104 = vector.shape_cast %103 : vector<1x1x1x4x16xbf16> to vector<4x16xbf16>
      %c0_85 = arith.constant 0 : index
      %c0_86 = arith.constant 0 : index
      %c0_87 = arith.constant 0 : index
      %105 = vector.load %arg4[%c0_85, %c0_86, %c0_87] : memref<3x1x16xbf16, #tpu.memory_space<vmem>>, vector<1x1x16xbf16>
      %106 = vector.shape_cast %105 : vector<1x1x16xbf16> to vector<1x16xbf16>
      %107 = vector.broadcast %106 : vector<1x16xbf16> to vector<4x16xbf16>
      %108 = arith.mulf %104, %107 : vector<4x16xbf16>
      %c12_88 = arith.constant 12 : index
      %c48 = arith.constant 48 : index
      %109 = vector.load %arg8[%c12_88, %c48] : memref<36x256xbf16, #tpu.memory_space<vmem>>, vector<4x16xbf16>
      tpu.vector_store %arg8[%c12_88, %c48], %108 {strides = array<i32>} : memref<36x256xbf16, #tpu.memory_space<vmem>>, vector<4x16xbf16>,
      %c0_89 = arith.constant 0 : index
      %c0_90 = arith.constant 0 : index
      %c5 = arith.constant 5 : index
      %c0_91 = arith.constant 0 : index
      %c0_92 = arith.constant 0 : index
      %110 = vector.load %arg2[%c0_89, %c0_90, %c5, %c0_91, %c0_92] : memref<1x1x18x4x18xbf16, #tpu.memory_space<vmem>>, vector<1x1x1x4x16xbf16>
      %111 = vector.shape_cast %110 : vector<1x1x1x4x16xbf16> to vector<4x16xbf16>
      %c0_93 = arith.constant 0 : index
      %c0_94 = arith.constant 0 : index
      %c0_95 = arith.constant 0 : index
      %112 = vector.load %arg4[%c0_93, %c0_94, %c0_95] : memref<3x1x16xbf16, #tpu.memory_space<vmem>>, vector<1x1x16xbf16>
      %113 = vector.shape_cast %112 : vector<1x1x16xbf16> to vector<1x16xbf16>
      %114 = vector.broadcast %113 : vector<1x16xbf16> to vector<4x16xbf16>
      %115 = arith.mulf %111, %114 : vector<4x16xbf16>
      %c12_96 = arith.constant 12 : index
      %c64 = arith.constant 64 : index
      %116 = vector.load %arg8[%c12_96, %c64] : memref<36x256xbf16, #tpu.memory_space<vmem>>, vector<4x16xbf16>
      tpu.vector_store %arg8[%c12_96, %c64], %115 {strides = array<i32>} : memref<36x256xbf16, #tpu.memory_space<vmem>>, vector<4x16xbf16>,
      %c0_97 = arith.constant 0 : index
      %c0_98 = arith.constant 0 : index
      %c6 = arith.constant 6 : index
      %c0_99 = arith.constant 0 : index
      %c0_100 = arith.constant 0 : index
      %117 = vector.load %arg2[%c0_97, %c0_98, %c6, %c0_99, %c0_100] : memref<1x1x18x4x18xbf16, #tpu.memory_space<vmem>>, vector<1x1x1x4x16xbf16>
      %118 = vector.shape_cast %117 : vector<1x1x1x4x16xbf16> to vector<4x16xbf16>
      %c0_101 = arith.constant 0 : index
      %c0_102 = arith.constant 0 : index
      %c0_103 = arith.constant 0 : index
      %119 = vector.load %arg4[%c0_101, %c0_102, %c0_103] : memref<3x1x16xbf16, #tpu.memory_space<vmem>>, vector<1x1x16xbf16>
      %120 = vector.shape_cast %119 : vector<1x1x16xbf16> to vector<1x16xbf16>
      %121 = vector.broadcast %120 : vector<1x16xbf16> to vector<4x16xbf16>
      %122 = arith.mulf %118, %121 : vector<4x16xbf16>
      %c12_104 = arith.constant 12 : index
      %c80 = arith.constant 80 : index
      %123 = vector.load %arg8[%c12_104, %c80] : memref<36x256xbf16, #tpu.memory_space<vmem>>, vector<4x16xbf16>
      tpu.vector_store %arg8[%c12_104, %c80], %122 {strides = array<i32>} : memref<36x256xbf16, #tpu.memory_space<vmem>>, vector<4x16xbf16>,
      %c0_105 = arith.constant 0 : index
      %c0_106 = arith.constant 0 : index
      %c7 = arith.constant 7 : index
      %c0_107 = arith.constant 0 : index
      %c0_108 = arith.constant 0 : index
      %124 = vector.load %arg2[%c0_105, %c0_106, %c7, %c0_107, %c0_108] : memref<1x1x18x4x18xbf16, #tpu.memory_space<vmem>>, vector<1x1x1x4x16xbf16>
      %125 = vector.shape_cast %124 : vector<1x1x1x4x16xbf16> to vector<4x16xbf16>
      %c0_109 = arith.constant 0 : index
      %c0_110 = arith.constant 0 : index
      %c0_111 = arith.constant 0 : index
      %126 = vector.load %arg4[%c0_109, %c0_110, %c0_111] : memref<3x1x16xbf16, #tpu.memory_space<vmem>>, vector<1x1x16xbf16>
      %127 = vector.shape_cast %126 : vector<1x1x16xbf16> to vector<1x16xbf16>
      %128 = vector.broadcast %127 : vector<1x16xbf16> to vector<4x16xbf16>
      %129 = arith.mulf %125, %128 : vector<4x16xbf16>
      %c12_112 = arith.constant 12 : index
      %c96 = arith.constant 96 : index
      %130 = vector.load %arg8[%c12_112, %c96] : memref<36x256xbf16, #tpu.memory_space<vmem>>, vector<4x16xbf16>
      tpu.vector_store %arg8[%c12_112, %c96], %129 {strides = array<i32>} : memref<36x256xbf16, #tpu.memory_space<vmem>>, vector<4x16xbf16>,
      %c0_113 = arith.constant 0 : index
      %c0_114 = arith.constant 0 : index
      %c8 = arith.constant 8 : index
      %c0_115 = arith.constant 0 : index
      %c0_116 = arith.constant 0 : index
      %131 = vector.load %arg2[%c0_113, %c0_114, %c8, %c0_115, %c0_116] : memref<1x1x18x4x18xbf16, #tpu.memory_space<vmem>>, vector<1x1x1x4x16xbf16>
      %132 = vector.shape_cast %131 : vector<1x1x1x4x16xbf16> to vector<4x16xbf16>
      %c0_117 = arith.constant 0 : index
      %c0_118 = arith.constant 0 : index
      %c0_119 = arith.constant 0 : index
      %133 = vector.load %arg4[%c0_117, %c0_118, %c0_119] : memref<3x1x16xbf16, #tpu.memory_space<vmem>>, vector<1x1x16xbf16>
      %134 = vector.shape_cast %133 : vector<1x1x16xbf16> to vector<1x16xbf16>
      %135 = vector.broadcast %134 : vector<1x16xbf16> to vector<4x16xbf16>
      %136 = arith.mulf %132, %135 : vector<4x16xbf16>
      %c12_120 = arith.constant 12 : index
      %c112 = arith.constant 112 : index
      %137 = vector.load %arg8[%c12_120, %c112] : memref<36x256xbf16, #tpu.memory_space<vmem>>, vector<4x16xbf16>
      tpu.vector_store %arg8[%c12_120, %c112], %136 {strides = array<i32>} : memref<36x256xbf16, #tpu.memory_space<vmem>>, vector<4x16xbf16>,
      %c0_121 = arith.constant 0 : index
      %c0_122 = arith.constant 0 : index
      %c1_123 = arith.constant 1 : index
      %c0_124 = arith.constant 0 : index
      %c1_125 = arith.constant 1 : index
      %138 = vector.load %arg2[%c0_121, %c0_122, %c1_123, %c0_124, %c1_125] : memref<1x1x18x4x18xbf16, #tpu.memory_space<vmem>>, vector<1x1x1x4x16xbf16>
      %139 = vector.shape_cast %138 : vector<1x1x1x4x16xbf16> to vector<4x16xbf16>
      %c16_126 = arith.constant 16 : index
      %c0_127 = arith.constant 0 : index
      %140 = vector.load %arg8[%c16_126, %c0_127] : memref<36x256xbf16, #tpu.memory_space<vmem>>, vector<4x16xbf16>
      tpu.vector_store %arg8[%c16_126, %c0_127], %139 {strides = array<i32>} : memref<36x256xbf16, #tpu.memory_space<vmem>>, vector<4x16xbf16>,
      %c0_128 = arith.constant 0 : index
      %c0_129 = arith.constant 0 : index
      %c2_130 = arith.constant 2 : index
      %c0_131 = arith.constant 0 : index
      %c1_132 = arith.constant 1 : index
      %141 = vector.load %arg2[%c0_128, %c0_129, %c2_130, %c0_131, %c1_132] : memref<1x1x18x4x18xbf16, #tpu.memory_space<vmem>>, vector<1x1x1x4x16xbf16>
      %142 = vector.shape_cast %141 : vector<1x1x1x4x16xbf16> to vector<4x16xbf16>
      %c16_133 = arith.constant 16 : index
      %c16_134 = arith.constant 16 : index
      %143 = vector.load %arg8[%c16_133, %c16_134] : memref<36x256xbf16, #tpu.memory_space<vmem>>, vector<4x16xbf16>
      tpu.vector_store %arg8[%c16_133, %c16_134], %142 {strides = array<i32>} : memref<36x256xbf16, #tpu.memory_space<vmem>>, vector<4x16xbf16>,
      %c0_135 = arith.constant 0 : index
      %c0_136 = arith.constant 0 : index
      %c3_137 = arith.constant 3 : index
      %c0_138 = arith.constant 0 : index
      %c1_139 = arith.constant 1 : index
      %144 = vector.load %arg2[%c0_135, %c0_136, %c3_137, %c0_138, %c1_139] : memref<1x1x18x4x18xbf16, #tpu.memory_space<vmem>>, vector<1x1x1x4x16xbf16>
      %145 = vector.shape_cast %144 : vector<1x1x1x4x16xbf16> to vector<4x16xbf16>
      %c16_140 = arith.constant 16 : index
      %c32_141 = arith.constant 32 : index
      %146 = vector.load %arg8[%c16_140, %c32_141] : memref<36x256xbf16, #tpu.memory_space<vmem>>, vector<4x16xbf16>
      tpu.vector_store %arg8[%c16_140, %c32_141], %145 {strides = array<i32>} : memref<36x256xbf16, #tpu.memory_space<vmem>>, vector<4x16xbf16>,
      %c0_142 = arith.constant 0 : index
      %c0_143 = arith.constant 0 : index
      %c4_144 = arith.constant 4 : index
      %c0_145 = arith.constant 0 : index
      %c1_146 = arith.constant 1 : index
      %147 = vector.load %arg2[%c0_142, %c0_143, %c4_144, %c0_145, %c1_146] : memref<1x1x18x4x18xbf16, #tpu.memory_space<vmem>>, vector<1x1x1x4x16xbf16>
      %148 = vector.shape_cast %147 : vector<1x1x1x4x16xbf16> to vector<4x16xbf16>
      %c16_147 = arith.constant 16 : index
      %c48_148 = arith.constant 48 : index
      %149 = vector.load %arg8[%c16_147, %c48_148] : memref<36x256xbf16, #tpu.memory_space<vmem>>, vector<4x16xbf16>
      tpu.vector_store %arg8[%c16_147, %c48_148], %148 {strides = array<i32>} : memref<36x256xbf16, #tpu.memory_space<vmem>>, vector<4x16xbf16>,
      %c0_149 = arith.constant 0 : index
      %c0_150 = arith.constant 0 : index
      %c5_151 = arith.constant 5 : index
      %c0_152 = arith.constant 0 : index
      %c1_153 = arith.constant 1 : index
      %150 = vector.load %arg2[%c0_149, %c0_150, %c5_151, %c0_152, %c1_153] : memref<1x1x18x4x18xbf16, #tpu.memory_space<vmem>>, vector<1x1x1x4x16xbf16>
      %151 = vector.shape_cast %150 : vector<1x1x1x4x16xbf16> to vector<4x16xbf16>
      %c16_154 = arith.constant 16 : index
      %c64_155 = arith.constant 64 : index
      %152 = vector.load %arg8[%c16_154, %c64_155] : memref<36x256xbf16, #tpu.memory_space<vmem>>, vector<4x16xbf16>
      tpu.vector_store %arg8[%c16_154, %c64_155], %151 {strides = array<i32>} : memref<36x256xbf16, #tpu.memory_space<vmem>>, vector<4x16xbf16>,
      %c0_156 = arith.constant 0 : index
      %c0_157 = arith.constant 0 : index
      %c6_158 = arith.constant 6 : index
      %c0_159 = arith.constant 0 : index
      %c1_160 = arith.constant 1 : index
      %153 = vector.load %arg2[%c0_156, %c0_157, %c6_158, %c0_159, %c1_160] : memref<1x1x18x4x18xbf16, #tpu.memory_space<vmem>>, vector<1x1x1x4x16xbf16>
      %154 = vector.shape_cast %153 : vector<1x1x1x4x16xbf16> to vector<4x16xbf16>
      %c16_161 = arith.constant 16 : index
      %c80_162 = arith.constant 80 : index
      %155 = vector.load %arg8[%c16_161, %c80_162] : memref<36x256xbf16, #tpu.memory_space<vmem>>, vector<4x16xbf16>
      tpu.vector_store %arg8[%c16_161, %c80_162], %154 {strides = array<i32>} : memref<36x256xbf16, #tpu.memory_space<vmem>>, vector<4x16xbf16>,
      %c0_163 = arith.constant 0 : index
      %c0_164 = arith.constant 0 : index
      %c7_165 = arith.constant 7 : index
      %c0_166 = arith.constant 0 : index
      %c1_167 = arith.constant 1 : index
      %156 = vector.load %arg2[%c0_163, %c0_164, %c7_165, %c0_166, %c1_167] : memref<1x1x18x4x18xbf16, #tpu.memory_space<vmem>>, vector<1x1x1x4x16xbf16>
      %157 = vector.shape_cast %156 : vector<1x1x1x4x16xbf16> to vector<4x16xbf16>
      %c16_168 = arith.constant 16 : index
      %c96_169 = arith.constant 96 : index
      %158 = vector.load %arg8[%c16_168, %c96_169] : memref<36x256xbf16, #tpu.memory_space<vmem>>, vector<4x16xbf16>
      tpu.vector_store %arg8[%c16_168, %c96_169], %157 {strides = array<i32>} : memref<36x256xbf16, #tpu.memory_space<vmem>>, vector<4x16xbf16>,
      %c0_170 = arith.constant 0 : index
      %c0_171 = arith.constant 0 : index
      %c8_172 = arith.constant 8 : index
      %c0_173 = arith.constant 0 : index
      %c1_174 = arith.constant 1 : index
      %159 = vector.load %arg2[%c0_170, %c0_171, %c8_172, %c0_173, %c1_174] : memref<1x1x18x4x18xbf16, #tpu.memory_space<vmem>>, vector<1x1x1x4x16xbf16>
      %160 = vector.shape_cast %159 : vector<1x1x1x4x16xbf16> to vector<4x16xbf16>
      %c16_175 = arith.constant 16 : index
      %c112_176 = arith.constant 112 : index
      %161 = vector.load %arg8[%c16_175, %c112_176] : memref<36x256xbf16, #tpu.memory_space<vmem>>, vector<4x16xbf16>
      tpu.vector_store %arg8[%c16_175, %c112_176], %160 {strides = array<i32>} : memref<36x256xbf16, #tpu.memory_space<vmem>>, vector<4x16xbf16>,
      %c0_177 = arith.constant 0 : index
      %c0_178 = arith.constant 0 : index
      %c1_179 = arith.constant 1 : index
      %c0_180 = arith.constant 0 : index
      %c2_181 = arith.constant 2 : index
      %162 = vector.load %arg2[%c0_177, %c0_178, %c1_179, %c0_180, %c2_181] : memref<1x1x18x4x18xbf16, #tpu.memory_space<vmem>>, vector<1x1x1x4x16xbf16>
      %163 = vector.shape_cast %162 : vector<1x1x1x4x16xbf16> to vector<4x16xbf16>
      %c20 = arith.constant 20 : index
      %c0_182 = arith.constant 0 : index
      %164 = vector.load %arg8[%c20, %c0_182] : memref<36x256xbf16, #tpu.memory_space<vmem>>, vector<4x16xbf16>
      tpu.vector_store %arg8[%c20, %c0_182], %163 {strides = array<i32>} : memref<36x256xbf16, #tpu.memory_space<vmem>>, vector<4x16xbf16>,
      %c0_183 = arith.constant 0 : index
      %c0_184 = arith.constant 0 : index
      %c2_185 = arith.constant 2 : index
      %c0_186 = arith.constant 0 : index
      %c2_187 = arith.constant 2 : index
      %165 = vector.load %arg2[%c0_183, %c0_184, %c2_185, %c0_186, %c2_187] : memref<1x1x18x4x18xbf16, #tpu.memory_space<vmem>>, vector<1x1x1x4x16xbf16>
      %166 = vector.shape_cast %165 : vector<1x1x1x4x16xbf16> to vector<4x16xbf16>
      %c20_188 = arith.constant 20 : index
      %c16_189 = arith.constant 16 : index
      %167 = vector.load %arg8[%c20_188, %c16_189] : memref<36x256xbf16, #tpu.memory_space<vmem>>, vector<4x16xbf16>
      tpu.vector_store %arg8[%c20_188, %c16_189], %166 {strides = array<i32>} : memref<36x256xbf16, #tpu.memory_space<vmem>>, vector<4x16xbf16>,
      %c0_190 = arith.constant 0 : index
      %c0_191 = arith.constant 0 : index
      %c3_192 = arith.constant 3 : index
      %c0_193 = arith.constant 0 : index
      %c2_194 = arith.constant 2 : index
      %168 = vector.load %arg2[%c0_190, %c0_191, %c3_192, %c0_193, %c2_194] : memref<1x1x18x4x18xbf16, #tpu.memory_space<vmem>>, vector<1x1x1x4x16xbf16>
      %169 = vector.shape_cast %168 : vector<1x1x1x4x16xbf16> to vector<4x16xbf16>
      %c20_195 = arith.constant 20 : index
      %c32_196 = arith.constant 32 : index
      %170 = vector.load %arg8[%c20_195, %c32_196] : memref<36x256xbf16, #tpu.memory_space<vmem>>, vector<4x16xbf16>
      tpu.vector_store %arg8[%c20_195, %c32_196], %169 {strides = array<i32>} : memref<36x256xbf16, #tpu.memory_space<vmem>>, vector<4x16xbf16>,
      %c0_197 = arith.constant 0 : index
      %c0_198 = arith.constant 0 : index
      %c4_199 = arith.constant 4 : index
      %c0_200 = arith.constant 0 : index
      %c2_201 = arith.constant 2 : index
      %171 = vector.load %arg2[%c0_197, %c0_198, %c4_199, %c0_200, %c2_201] : memref<1x1x18x4x18xbf16, #tpu.memory_space<vmem>>, vector<1x1x1x4x16xbf16>
      %172 = vector.shape_cast %171 : vector<1x1x1x4x16xbf16> to vector<4x16xbf16>
      %c20_202 = arith.constant 20 : index
      %c48_203 = arith.constant 48 : index
      %173 = vector.load %arg8[%c20_202, %c48_203] : memref<36x256xbf16, #tpu.memory_space<vmem>>, vector<4x16xbf16>
      tpu.vector_store %arg8[%c20_202, %c48_203], %172 {strides = array<i32>} : memref<36x256xbf16, #tpu.memory_space<vmem>>, vector<4x16xbf16>,
      %c0_204 = arith.constant 0 : index
      %c0_205 = arith.constant 0 : index
      %c5_206 = arith.constant 5 : index
      %c0_207 = arith.constant 0 : index
      %c2_208 = arith.constant 2 : index
      %174 = vector.load %arg2[%c0_204, %c0_205, %c5_206, %c0_207, %c2_208] : memref<1x1x18x4x18xbf16, #tpu.memory_space<vmem>>, vector<1x1x1x4x16xbf16>
      %175 = vector.shape_cast %174 : vector<1x1x1x4x16xbf16> to vector<4x16xbf16>
      %c20_209 = arith.constant 20 : index
      %c64_210 = arith.constant 64 : index
      %176 = vector.load %arg8[%c20_209, %c64_210] : memref<36x256xbf16, #tpu.memory_space<vmem>>, vector<4x16xbf16>
      tpu.vector_store %arg8[%c20_209, %c64_210], %175 {strides = array<i32>} : memref<36x256xbf16, #tpu.memory_space<vmem>>, vector<4x16xbf16>,
      %c0_211 = arith.constant 0 : index
      %c0_212 = arith.constant 0 : index
      %c6_213 = arith.constant 6 : index
      %c0_214 = arith.constant 0 : index
      %c2_215 = arith.constant 2 : index
      %177 = vector.load %arg2[%c0_211, %c0_212, %c6_213, %c0_214, %c2_215] : memref<1x1x18x4x18xbf16, #tpu.memory_space<vmem>>, vector<1x1x1x4x16xbf16>
      %178 = vector.shape_cast %177 : vector<1x1x1x4x16xbf16> to vector<4x16xbf16>
      %c20_216 = arith.constant 20 : index
      %c80_217 = arith.constant 80 : index
      %179 = vector.load %arg8[%c20_216, %c80_217] : memref<36x256xbf16, #tpu.memory_space<vmem>>, vector<4x16xbf16>
      tpu.vector_store %arg8[%c20_216, %c80_217], %178 {strides = array<i32>} : memref<36x256xbf16, #tpu.memory_space<vmem>>, vector<4x16xbf16>,
      %c0_218 = arith.constant 0 : index
      %c0_219 = arith.constant 0 : index
      %c7_220 = arith.constant 7 : index
      %c0_221 = arith.constant 0 : index
      %c2_222 = arith.constant 2 : index
      %180 = vector.load %arg2[%c0_218, %c0_219, %c7_220, %c0_221, %c2_222] : memref<1x1x18x4x18xbf16, #tpu.memory_space<vmem>>, vector<1x1x1x4x16xbf16>
      %181 = vector.shape_cast %180 : vector<1x1x1x4x16xbf16> to vector<4x16xbf16>
      %c20_223 = arith.constant 20 : index
      %c96_224 = arith.constant 96 : index
      %182 = vector.load %arg8[%c20_223, %c96_224] : memref<36x256xbf16, #tpu.memory_space<vmem>>, vector<4x16xbf16>
      tpu.vector_store %arg8[%c20_223, %c96_224], %181 {strides = array<i32>} : memref<36x256xbf16, #tpu.memory_space<vmem>>, vector<4x16xbf16>,
      %c0_225 = arith.constant 0 : index
      %c0_226 = arith.constant 0 : index
      %c8_227 = arith.constant 8 : index
      %c0_228 = arith.constant 0 : index
      %c2_229 = arith.constant 2 : index
      %183 = vector.load %arg2[%c0_225, %c0_226, %c8_227, %c0_228, %c2_229] : memref<1x1x18x4x18xbf16, #tpu.memory_space<vmem>>, vector<1x1x1x4x16xbf16>
      %184 = vector.shape_cast %183 : vector<1x1x1x4x16xbf16> to vector<4x16xbf16>
      %c20_230 = arith.constant 20 : index
      %c112_231 = arith.constant 112 : index
      %185 = vector.load %arg8[%c20_230, %c112_231] : memref<36x256xbf16, #tpu.memory_space<vmem>>, vector<4x16xbf16>
      tpu.vector_store %arg8[%c20_230, %c112_231], %184 {strides = array<i32>} : memref<36x256xbf16, #tpu.memory_space<vmem>>, vector<4x16xbf16>,
    } else {
    }
    %true_16 = arith.constant true
    %30 = arith.xori %27, %true_16 : i1
    %31 = arith.extui %30 : i1 to i32
    %c0_i32_17 = arith.constant 0 : i32
    %32 = arith.cmpi ne, %31, %c0_i32_17 : i32
    scf.if %32 {
      %cst_57 = arith.constant 0.000000e+00 : bf16
      %82 = vector.broadcast %cst_57 : bf16 to vector<4x128xbf16>
      %c12 = arith.constant 12 : index
      %c0_58 = arith.constant 0 : index
      %83 = vector.load %arg8[%c12, %c0_58] : memref<36x256xbf16, #tpu.memory_space<vmem>>, vector<4x128xbf16>
      tpu.vector_store %arg8[%c12, %c0_58], %82 {strides = array<i32>} : memref<36x256xbf16, #tpu.memory_space<vmem>>, vector<4x128xbf16>,
      %cst_59 = arith.constant 0.000000e+00 : bf16
      %84 = vector.broadcast %cst_59 : bf16 to vector<4x128xbf16>
      %c16 = arith.constant 16 : index
      %c0_60 = arith.constant 0 : index
      %85 = vector.load %arg8[%c16, %c0_60] : memref<36x256xbf16, #tpu.memory_space<vmem>>, vector<4x128xbf16>
      tpu.vector_store %arg8[%c16, %c0_60], %84 {strides = array<i32>} : memref<36x256xbf16, #tpu.memory_space<vmem>>, vector<4x128xbf16>,
      %cst_61 = arith.constant 0.000000e+00 : bf16
      %86 = vector.broadcast %cst_61 : bf16 to vector<4x128xbf16>
      %c20 = arith.constant 20 : index
      %c0_62 = arith.constant 0 : index
      %87 = vector.load %arg8[%c20, %c0_62] : memref<36x256xbf16, #tpu.memory_space<vmem>>, vector<4x128xbf16>
      tpu.vector_store %arg8[%c20, %c0_62], %86 {strides = array<i32>} : memref<36x256xbf16, #tpu.memory_space<vmem>>, vector<4x128xbf16>,
    } else {
    }
    %c16_i32_18 = arith.constant 16 : i32
    %33 = arith.muli %arg1, %c16_i32_18 : i32
    %c8_i32_19 = arith.constant 8 : i32
    %34 = arith.addi %33, %c8_i32_19 : i32
    %c1_i32_20 = arith.constant 1 : i32
    %35 = arith.addi %34, %c1_i32_20 : i32
    %c1_i32_21 = arith.constant 1 : i32
    %36 = arith.cmpi sge, %35, %c1_i32_21 : i32
    %c17_i32_22 = arith.constant 17 : i32
    %37 = arith.cmpi slt, %35, %c17_i32_22 : i32
    %38 = arith.andi %36, %37 : i1
    %39 = arith.extui %38 : i1 to i32
    %c0_i32_23 = arith.constant 0 : i32
    %40 = arith.cmpi ne, %39, %c0_i32_23 : i32
    scf.if %40 {
      %c0_57 = arith.constant 0 : index
      %c0_58 = arith.constant 0 : index
      %c9 = arith.constant 9 : index
      %c0_59 = arith.constant 0 : index
      %c0_60 = arith.constant 0 : index
      %82 = vector.load %arg2[%c0_57, %c0_58, %c9, %c0_59, %c0_60] : memref<1x1x18x4x18xbf16, #tpu.memory_space<vmem>>, vector<1x1x1x4x16xbf16>
      %83 = vector.shape_cast %82 : vector<1x1x1x4x16xbf16> to vector<4x16xbf16>
      %c0_61 = arith.constant 0 : index
      %c0_62 = arith.constant 0 : index
      %c0_63 = arith.constant 0 : index
      %84 = vector.load %arg4[%c0_61, %c0_62, %c0_63] : memref<3x1x16xbf16, #tpu.memory_space<vmem>>, vector<1x1x16xbf16>
      %85 = vector.shape_cast %84 : vector<1x1x16xbf16> to vector<1x16xbf16>
      %86 = vector.broadcast %85 : vector<1x16xbf16> to vector<4x16xbf16>
      %87 = arith.mulf %83, %86 : vector<4x16xbf16>
      %c12 = arith.constant 12 : index
      %c128 = arith.constant 128 : index
      %88 = vector.load %arg8[%c12, %c128] : memref<36x256xbf16, #tpu.memory_space<vmem>>, vector<4x16xbf16>
      tpu.vector_store %arg8[%c12, %c128], %87 {strides = array<i32>} : memref<36x256xbf16, #tpu.memory_space<vmem>>, vector<4x16xbf16>,
      %c0_64 = arith.constant 0 : index
      %c0_65 = arith.constant 0 : index
      %c10 = arith.constant 10 : index
      %c0_66 = arith.constant 0 : index
      %c0_67 = arith.constant 0 : index
      %89 = vector.load %arg2[%c0_64, %c0_65, %c10, %c0_66, %c0_67] : memref<1x1x18x4x18xbf16, #tpu.memory_space<vmem>>, vector<1x1x1x4x16xbf16>
      %90 = vector.shape_cast %89 : vector<1x1x1x4x16xbf16> to vector<4x16xbf16>
      %c0_68 = arith.constant 0 : index
      %c0_69 = arith.constant 0 : index
      %c0_70 = arith.constant 0 : index
      %91 = vector.load %arg4[%c0_68, %c0_69, %c0_70] : memref<3x1x16xbf16, #tpu.memory_space<vmem>>, vector<1x1x16xbf16>
      %92 = vector.shape_cast %91 : vector<1x1x16xbf16> to vector<1x16xbf16>
      %93 = vector.broadcast %92 : vector<1x16xbf16> to vector<4x16xbf16>
      %94 = arith.mulf %90, %93 : vector<4x16xbf16>
      %c12_71 = arith.constant 12 : index
      %c144 = arith.constant 144 : index
      %95 = vector.load %arg8[%c12_71, %c144] : memref<36x256xbf16, #tpu.memory_space<vmem>>, vector<4x16xbf16>
      tpu.vector_store %arg8[%c12_71, %c144], %94 {strides = array<i32>} : memref<36x256xbf16, #tpu.memory_space<vmem>>, vector<4x16xbf16>,
      %c0_72 = arith.constant 0 : index
      %c0_73 = arith.constant 0 : index
      %c11 = arith.constant 11 : index
      %c0_74 = arith.constant 0 : index
      %c0_75 = arith.constant 0 : index
      %96 = vector.load %arg2[%c0_72, %c0_73, %c11, %c0_74, %c0_75] : memref<1x1x18x4x18xbf16, #tpu.memory_space<vmem>>, vector<1x1x1x4x16xbf16>
      %97 = vector.shape_cast %96 : vector<1x1x1x4x16xbf16> to vector<4x16xbf16>
      %c0_76 = arith.constant 0 : index
      %c0_77 = arith.constant 0 : index
      %c0_78 = arith.constant 0 : index
      %98 = vector.load %arg4[%c0_76, %c0_77, %c0_78] : memref<3x1x16xbf16, #tpu.memory_space<vmem>>, vector<1x1x16xbf16>
      %99 = vector.shape_cast %98 : vector<1x1x16xbf16> to vector<1x16xbf16>
      %100 = vector.broadcast %99 : vector<1x16xbf16> to vector<4x16xbf16>
      %101 = arith.mulf %97, %100 : vector<4x16xbf16>
      %c12_79 = arith.constant 12 : index
      %c160 = arith.constant 160 : index
      %102 = vector.load %arg8[%c12_79, %c160] : memref<36x256xbf16, #tpu.memory_space<vmem>>, vector<4x16xbf16>
      tpu.vector_store %arg8[%c12_79, %c160], %101 {strides = array<i32>} : memref<36x256xbf16, #tpu.memory_space<vmem>>, vector<4x16xbf16>,
      %c0_80 = arith.constant 0 : index
      %c0_81 = arith.constant 0 : index
      %c12_82 = arith.constant 12 : index
      %c0_83 = arith.constant 0 : index
      %c0_84 = arith.constant 0 : index
      %103 = vector.load %arg2[%c0_80, %c0_81, %c12_82, %c0_83, %c0_84] : memref<1x1x18x4x18xbf16, #tpu.memory_space<vmem>>, vector<1x1x1x4x16xbf16>
      %104 = vector.shape_cast %103 : vector<1x1x1x4x16xbf16> to vector<4x16xbf16>
      %c0_85 = arith.constant 0 : index
      %c0_86 = arith.constant 0 : index
      %c0_87 = arith.constant 0 : index
      %105 = vector.load %arg4[%c0_85, %c0_86, %c0_87] : memref<3x1x16xbf16, #tpu.memory_space<vmem>>, vector<1x1x16xbf16>
      %106 = vector.shape_cast %105 : vector<1x1x16xbf16> to vector<1x16xbf16>
      %107 = vector.broadcast %106 : vector<1x16xbf16> to vector<4x16xbf16>
      %108 = arith.mulf %104, %107 : vector<4x16xbf16>
      %c12_88 = arith.constant 12 : index
      %c176 = arith.constant 176 : index
      %109 = vector.load %arg8[%c12_88, %c176] : memref<36x256xbf16, #tpu.memory_space<vmem>>, vector<4x16xbf16>
      tpu.vector_store %arg8[%c12_88, %c176], %108 {strides = array<i32>} : memref<36x256xbf16, #tpu.memory_space<vmem>>, vector<4x16xbf16>,
      %c0_89 = arith.constant 0 : index
      %c0_90 = arith.constant 0 : index
      %c13 = arith.constant 13 : index
      %c0_91 = arith.constant 0 : index
      %c0_92 = arith.constant 0 : index
      %110 = vector.load %arg2[%c0_89, %c0_90, %c13, %c0_91, %c0_92] : memref<1x1x18x4x18xbf16, #tpu.memory_space<vmem>>, vector<1x1x1x4x16xbf16>
      %111 = vector.shape_cast %110 : vector<1x1x1x4x16xbf16> to vector<4x16xbf16>
      %c0_93 = arith.constant 0 : index
      %c0_94 = arith.constant 0 : index
      %c0_95 = arith.constant 0 : index
      %112 = vector.load %arg4[%c0_93, %c0_94, %c0_95] : memref<3x1x16xbf16, #tpu.memory_space<vmem>>, vector<1x1x16xbf16>
      %113 = vector.shape_cast %112 : vector<1x1x16xbf16> to vector<1x16xbf16>
      %114 = vector.broadcast %113 : vector<1x16xbf16> to vector<4x16xbf16>
      %115 = arith.mulf %111, %114 : vector<4x16xbf16>
      %c12_96 = arith.constant 12 : index
      %c192 = arith.constant 192 : index
      %116 = vector.load %arg8[%c12_96, %c192] : memref<36x256xbf16, #tpu.memory_space<vmem>>, vector<4x16xbf16>
      tpu.vector_store %arg8[%c12_96, %c192], %115 {strides = array<i32>} : memref<36x256xbf16, #tpu.memory_space<vmem>>, vector<4x16xbf16>,
      %c0_97 = arith.constant 0 : index
      %c0_98 = arith.constant 0 : index
      %c14 = arith.constant 14 : index
      %c0_99 = arith.constant 0 : index
      %c0_100 = arith.constant 0 : index
      %117 = vector.load %arg2[%c0_97, %c0_98, %c14, %c0_99, %c0_100] : memref<1x1x18x4x18xbf16, #tpu.memory_space<vmem>>, vector<1x1x1x4x16xbf16>
      %118 = vector.shape_cast %117 : vector<1x1x1x4x16xbf16> to vector<4x16xbf16>
      %c0_101 = arith.constant 0 : index
      %c0_102 = arith.constant 0 : index
      %c0_103 = arith.constant 0 : index
      %119 = vector.load %arg4[%c0_101, %c0_102, %c0_103] : memref<3x1x16xbf16, #tpu.memory_space<vmem>>, vector<1x1x16xbf16>
      %120 = vector.shape_cast %119 : vector<1x1x16xbf16> to vector<1x16xbf16>
      %121 = vector.broadcast %120 : vector<1x16xbf16> to vector<4x16xbf16>
      %122 = arith.mulf %118, %121 : vector<4x16xbf16>
      %c12_104 = arith.constant 12 : index
      %c208 = arith.constant 208 : index
      %123 = vector.load %arg8[%c12_104, %c208] : memref<36x256xbf16, #tpu.memory_space<vmem>>, vector<4x16xbf16>
      tpu.vector_store %arg8[%c12_104, %c208], %122 {strides = array<i32>} : memref<36x256xbf16, #tpu.memory_space<vmem>>, vector<4x16xbf16>,
      %c0_105 = arith.constant 0 : index
      %c0_106 = arith.constant 0 : index
      %c15 = arith.constant 15 : index
      %c0_107 = arith.constant 0 : index
      %c0_108 = arith.constant 0 : index
      %124 = vector.load %arg2[%c0_105, %c0_106, %c15, %c0_107, %c0_108] : memref<1x1x18x4x18xbf16, #tpu.memory_space<vmem>>, vector<1x1x1x4x16xbf16>
      %125 = vector.shape_cast %124 : vector<1x1x1x4x16xbf16> to vector<4x16xbf16>
      %c0_109 = arith.constant 0 : index
      %c0_110 = arith.constant 0 : index
      %c0_111 = arith.constant 0 : index
      %126 = vector.load %arg4[%c0_109, %c0_110, %c0_111] : memref<3x1x16xbf16, #tpu.memory_space<vmem>>, vector<1x1x16xbf16>
      %127 = vector.shape_cast %126 : vector<1x1x16xbf16> to vector<1x16xbf16>
      %128 = vector.broadcast %127 : vector<1x16xbf16> to vector<4x16xbf16>
      %129 = arith.mulf %125, %128 : vector<4x16xbf16>
      %c12_112 = arith.constant 12 : index
      %c224 = arith.constant 224 : index
      %130 = vector.load %arg8[%c12_112, %c224] : memref<36x256xbf16, #tpu.memory_space<vmem>>, vector<4x16xbf16>
      tpu.vector_store %arg8[%c12_112, %c224], %129 {strides = array<i32>} : memref<36x256xbf16, #tpu.memory_space<vmem>>, vector<4x16xbf16>,
      %c0_113 = arith.constant 0 : index
      %c0_114 = arith.constant 0 : index
      %c16 = arith.constant 16 : index
      %c0_115 = arith.constant 0 : index
      %c0_116 = arith.constant 0 : index
      %131 = vector.load %arg2[%c0_113, %c0_114, %c16, %c0_115, %c0_116] : memref<1x1x18x4x18xbf16, #tpu.memory_space<vmem>>, vector<1x1x1x4x16xbf16>
      %132 = vector.shape_cast %131 : vector<1x1x1x4x16xbf16> to vector<4x16xbf16>
      %c0_117 = arith.constant 0 : index
      %c0_118 = arith.constant 0 : index
      %c0_119 = arith.constant 0 : index
      %133 = vector.load %arg4[%c0_117, %c0_118, %c0_119] : memref<3x1x16xbf16, #tpu.memory_space<vmem>>, vector<1x1x16xbf16>
      %134 = vector.shape_cast %133 : vector<1x1x16xbf16> to vector<1x16xbf16>
      %135 = vector.broadcast %134 : vector<1x16xbf16> to vector<4x16xbf16>
      %136 = arith.mulf %132, %135 : vector<4x16xbf16>
      %c12_120 = arith.constant 12 : index
      %c240 = arith.constant 240 : index
      %137 = vector.load %arg8[%c12_120, %c240] : memref<36x256xbf16, #tpu.memory_space<vmem>>, vector<4x16xbf16>
      tpu.vector_store %arg8[%c12_120, %c240], %136 {strides = array<i32>} : memref<36x256xbf16, #tpu.memory_space<vmem>>, vector<4x16xbf16>,
      %c0_121 = arith.constant 0 : index
      %c0_122 = arith.constant 0 : index
      %c9_123 = arith.constant 9 : index
      %c0_124 = arith.constant 0 : index
      %c1 = arith.constant 1 : index
      %138 = vector.load %arg2[%c0_121, %c0_122, %c9_123, %c0_124, %c1] : memref<1x1x18x4x18xbf16, #tpu.memory_space<vmem>>, vector<1x1x1x4x16xbf16>
      %139 = vector.shape_cast %138 : vector<1x1x1x4x16xbf16> to vector<4x16xbf16>
      %c16_125 = arith.constant 16 : index
      %c128_126 = arith.constant 128 : index
      %140 = vector.load %arg8[%c16_125, %c128_126] : memref<36x256xbf16, #tpu.memory_space<vmem>>, vector<4x16xbf16>
      tpu.vector_store %arg8[%c16_125, %c128_126], %139 {strides = array<i32>} : memref<36x256xbf16, #tpu.memory_space<vmem>>, vector<4x16xbf16>,
      %c0_127 = arith.constant 0 : index
      %c0_128 = arith.constant 0 : index
      %c10_129 = arith.constant 10 : index
      %c0_130 = arith.constant 0 : index
      %c1_131 = arith.constant 1 : index
      %141 = vector.load %arg2[%c0_127, %c0_128, %c10_129, %c0_130, %c1_131] : memref<1x1x18x4x18xbf16, #tpu.memory_space<vmem>>, vector<1x1x1x4x16xbf16>
      %142 = vector.shape_cast %141 : vector<1x1x1x4x16xbf16> to vector<4x16xbf16>
      %c16_132 = arith.constant 16 : index
      %c144_133 = arith.constant 144 : index
      %143 = vector.load %arg8[%c16_132, %c144_133] : memref<36x256xbf16, #tpu.memory_space<vmem>>, vector<4x16xbf16>
      tpu.vector_store %arg8[%c16_132, %c144_133], %142 {strides = array<i32>} : memref<36x256xbf16, #tpu.memory_space<vmem>>, vector<4x16xbf16>,
      %c0_134 = arith.constant 0 : index
      %c0_135 = arith.constant 0 : index
      %c11_136 = arith.constant 11 : index
      %c0_137 = arith.constant 0 : index
      %c1_138 = arith.constant 1 : index
      %144 = vector.load %arg2[%c0_134, %c0_135, %c11_136, %c0_137, %c1_138] : memref<1x1x18x4x18xbf16, #tpu.memory_space<vmem>>, vector<1x1x1x4x16xbf16>
      %145 = vector.shape_cast %144 : vector<1x1x1x4x16xbf16> to vector<4x16xbf16>
      %c16_139 = arith.constant 16 : index
      %c160_140 = arith.constant 160 : index
      %146 = vector.load %arg8[%c16_139, %c160_140] : memref<36x256xbf16, #tpu.memory_space<vmem>>, vector<4x16xbf16>
      tpu.vector_store %arg8[%c16_139, %c160_140], %145 {strides = array<i32>} : memref<36x256xbf16, #tpu.memory_space<vmem>>, vector<4x16xbf16>,
      %c0_141 = arith.constant 0 : index
      %c0_142 = arith.constant 0 : index
      %c12_143 = arith.constant 12 : index
      %c0_144 = arith.constant 0 : index
      %c1_145 = arith.constant 1 : index
      %147 = vector.load %arg2[%c0_141, %c0_142, %c12_143, %c0_144, %c1_145] : memref<1x1x18x4x18xbf16, #tpu.memory_space<vmem>>, vector<1x1x1x4x16xbf16>
      %148 = vector.shape_cast %147 : vector<1x1x1x4x16xbf16> to vector<4x16xbf16>
      %c16_146 = arith.constant 16 : index
      %c176_147 = arith.constant 176 : index
      %149 = vector.load %arg8[%c16_146, %c176_147] : memref<36x256xbf16, #tpu.memory_space<vmem>>, vector<4x16xbf16>
      tpu.vector_store %arg8[%c16_146, %c176_147], %148 {strides = array<i32>} : memref<36x256xbf16, #tpu.memory_space<vmem>>, vector<4x16xbf16>,
      %c0_148 = arith.constant 0 : index
      %c0_149 = arith.constant 0 : index
      %c13_150 = arith.constant 13 : index
      %c0_151 = arith.constant 0 : index
      %c1_152 = arith.constant 1 : index
      %150 = vector.load %arg2[%c0_148, %c0_149, %c13_150, %c0_151, %c1_152] : memref<1x1x18x4x18xbf16, #tpu.memory_space<vmem>>, vector<1x1x1x4x16xbf16>
      %151 = vector.shape_cast %150 : vector<1x1x1x4x16xbf16> to vector<4x16xbf16>
      %c16_153 = arith.constant 16 : index
      %c192_154 = arith.constant 192 : index
      %152 = vector.load %arg8[%c16_153, %c192_154] : memref<36x256xbf16, #tpu.memory_space<vmem>>, vector<4x16xbf16>
      tpu.vector_store %arg8[%c16_153, %c192_154], %151 {strides = array<i32>} : memref<36x256xbf16, #tpu.memory_space<vmem>>, vector<4x16xbf16>,
      %c0_155 = arith.constant 0 : index
      %c0_156 = arith.constant 0 : index
      %c14_157 = arith.constant 14 : index
      %c0_158 = arith.constant 0 : index
      %c1_159 = arith.constant 1 : index
      %153 = vector.load %arg2[%c0_155, %c0_156, %c14_157, %c0_158, %c1_159] : memref<1x1x18x4x18xbf16, #tpu.memory_space<vmem>>, vector<1x1x1x4x16xbf16>
      %154 = vector.shape_cast %153 : vector<1x1x1x4x16xbf16> to vector<4x16xbf16>
      %c16_160 = arith.constant 16 : index
      %c208_161 = arith.constant 208 : index
      %155 = vector.load %arg8[%c16_160, %c208_161] : memref<36x256xbf16, #tpu.memory_space<vmem>>, vector<4x16xbf16>
      tpu.vector_store %arg8[%c16_160, %c208_161], %154 {strides = array<i32>} : memref<36x256xbf16, #tpu.memory_space<vmem>>, vector<4x16xbf16>,
      %c0_162 = arith.constant 0 : index
      %c0_163 = arith.constant 0 : index
      %c15_164 = arith.constant 15 : index
      %c0_165 = arith.constant 0 : index
      %c1_166 = arith.constant 1 : index
      %156 = vector.load %arg2[%c0_162, %c0_163, %c15_164, %c0_165, %c1_166] : memref<1x1x18x4x18xbf16, #tpu.memory_space<vmem>>, vector<1x1x1x4x16xbf16>
      %157 = vector.shape_cast %156 : vector<1x1x1x4x16xbf16> to vector<4x16xbf16>
      %c16_167 = arith.constant 16 : index
      %c224_168 = arith.constant 224 : index
      %158 = vector.load %arg8[%c16_167, %c224_168] : memref<36x256xbf16, #tpu.memory_space<vmem>>, vector<4x16xbf16>
      tpu.vector_store %arg8[%c16_167, %c224_168], %157 {strides = array<i32>} : memref<36x256xbf16, #tpu.memory_space<vmem>>, vector<4x16xbf16>,
      %c0_169 = arith.constant 0 : index
      %c0_170 = arith.constant 0 : index
      %c16_171 = arith.constant 16 : index
      %c0_172 = arith.constant 0 : index
      %c1_173 = arith.constant 1 : index
      %159 = vector.load %arg2[%c0_169, %c0_170, %c16_171, %c0_172, %c1_173] : memref<1x1x18x4x18xbf16, #tpu.memory_space<vmem>>, vector<1x1x1x4x16xbf16>
      %160 = vector.shape_cast %159 : vector<1x1x1x4x16xbf16> to vector<4x16xbf16>
      %c16_174 = arith.constant 16 : index
      %c240_175 = arith.constant 240 : index
      %161 = vector.load %arg8[%c16_174, %c240_175] : memref<36x256xbf16, #tpu.memory_space<vmem>>, vector<4x16xbf16>
      tpu.vector_store %arg8[%c16_174, %c240_175], %160 {strides = array<i32>} : memref<36x256xbf16, #tpu.memory_space<vmem>>, vector<4x16xbf16>,
      %c0_176 = arith.constant 0 : index
      %c0_177 = arith.constant 0 : index
      %c9_178 = arith.constant 9 : index
      %c0_179 = arith.constant 0 : index
      %c2 = arith.constant 2 : index
      %162 = vector.load %arg2[%c0_176, %c0_177, %c9_178, %c0_179, %c2] : memref<1x1x18x4x18xbf16, #tpu.memory_space<vmem>>, vector<1x1x1x4x16xbf16>
      %163 = vector.shape_cast %162 : vector<1x1x1x4x16xbf16> to vector<4x16xbf16>
      %c20 = arith.constant 20 : index
      %c128_180 = arith.constant 128 : index
      %164 = vector.load %arg8[%c20, %c128_180] : memref<36x256xbf16, #tpu.memory_space<vmem>>, vector<4x16xbf16>
      tpu.vector_store %arg8[%c20, %c128_180], %163 {strides = array<i32>} : memref<36x256xbf16, #tpu.memory_space<vmem>>, vector<4x16xbf16>,
      %c0_181 = arith.constant 0 : index
      %c0_182 = arith.constant 0 : index
      %c10_183 = arith.constant 10 : index
      %c0_184 = arith.constant 0 : index
      %c2_185 = arith.constant 2 : index
      %165 = vector.load %arg2[%c0_181, %c0_182, %c10_183, %c0_184, %c2_185] : memref<1x1x18x4x18xbf16, #tpu.memory_space<vmem>>, vector<1x1x1x4x16xbf16>
      %166 = vector.shape_cast %165 : vector<1x1x1x4x16xbf16> to vector<4x16xbf16>
      %c20_186 = arith.constant 20 : index
      %c144_187 = arith.constant 144 : index
      %167 = vector.load %arg8[%c20_186, %c144_187] : memref<36x256xbf16, #tpu.memory_space<vmem>>, vector<4x16xbf16>
      tpu.vector_store %arg8[%c20_186, %c144_187], %166 {strides = array<i32>} : memref<36x256xbf16, #tpu.memory_space<vmem>>, vector<4x16xbf16>,
      %c0_188 = arith.constant 0 : index
      %c0_189 = arith.constant 0 : index
      %c11_190 = arith.constant 11 : index
      %c0_191 = arith.constant 0 : index
      %c2_192 = arith.constant 2 : index
      %168 = vector.load %arg2[%c0_188, %c0_189, %c11_190, %c0_191, %c2_192] : memref<1x1x18x4x18xbf16, #tpu.memory_space<vmem>>, vector<1x1x1x4x16xbf16>
      %169 = vector.shape_cast %168 : vector<1x1x1x4x16xbf16> to vector<4x16xbf16>
      %c20_193 = arith.constant 20 : index
      %c160_194 = arith.constant 160 : index
      %170 = vector.load %arg8[%c20_193, %c160_194] : memref<36x256xbf16, #tpu.memory_space<vmem>>, vector<4x16xbf16>
      tpu.vector_store %arg8[%c20_193, %c160_194], %169 {strides = array<i32>} : memref<36x256xbf16, #tpu.memory_space<vmem>>, vector<4x16xbf16>,
      %c0_195 = arith.constant 0 : index
      %c0_196 = arith.constant 0 : index
      %c12_197 = arith.constant 12 : index
      %c0_198 = arith.constant 0 : index
      %c2_199 = arith.constant 2 : index
      %171 = vector.load %arg2[%c0_195, %c0_196, %c12_197, %c0_198, %c2_199] : memref<1x1x18x4x18xbf16, #tpu.memory_space<vmem>>, vector<1x1x1x4x16xbf16>
      %172 = vector.shape_cast %171 : vector<1x1x1x4x16xbf16> to vector<4x16xbf16>
      %c20_200 = arith.constant 20 : index
      %c176_201 = arith.constant 176 : index
      %173 = vector.load %arg8[%c20_200, %c176_201] : memref<36x256xbf16, #tpu.memory_space<vmem>>, vector<4x16xbf16>
      tpu.vector_store %arg8[%c20_200, %c176_201], %172 {strides = array<i32>} : memref<36x256xbf16, #tpu.memory_space<vmem>>, vector<4x16xbf16>,
      %c0_202 = arith.constant 0 : index
      %c0_203 = arith.constant 0 : index
      %c13_204 = arith.constant 13 : index
      %c0_205 = arith.constant 0 : index
      %c2_206 = arith.constant 2 : index
      %174 = vector.load %arg2[%c0_202, %c0_203, %c13_204, %c0_205, %c2_206] : memref<1x1x18x4x18xbf16, #tpu.memory_space<vmem>>, vector<1x1x1x4x16xbf16>
      %175 = vector.shape_cast %174 : vector<1x1x1x4x16xbf16> to vector<4x16xbf16>
      %c20_207 = arith.constant 20 : index
      %c192_208 = arith.constant 192 : index
      %176 = vector.load %arg8[%c20_207, %c192_208] : memref<36x256xbf16, #tpu.memory_space<vmem>>, vector<4x16xbf16>
      tpu.vector_store %arg8[%c20_207, %c192_208], %175 {strides = array<i32>} : memref<36x256xbf16, #tpu.memory_space<vmem>>, vector<4x16xbf16>,
      %c0_209 = arith.constant 0 : index
      %c0_210 = arith.constant 0 : index
      %c14_211 = arith.constant 14 : index
      %c0_212 = arith.constant 0 : index
      %c2_213 = arith.constant 2 : index
      %177 = vector.load %arg2[%c0_209, %c0_210, %c14_211, %c0_212, %c2_213] : memref<1x1x18x4x18xbf16, #tpu.memory_space<vmem>>, vector<1x1x1x4x16xbf16>
      %178 = vector.shape_cast %177 : vector<1x1x1x4x16xbf16> to vector<4x16xbf16>
      %c20_214 = arith.constant 20 : index
      %c208_215 = arith.constant 208 : index
      %179 = vector.load %arg8[%c20_214, %c208_215] : memref<36x256xbf16, #tpu.memory_space<vmem>>, vector<4x16xbf16>
      tpu.vector_store %arg8[%c20_214, %c208_215], %178 {strides = array<i32>} : memref<36x256xbf16, #tpu.memory_space<vmem>>, vector<4x16xbf16>,
      %c0_216 = arith.constant 0 : index
      %c0_217 = arith.constant 0 : index
      %c15_218 = arith.constant 15 : index
      %c0_219 = arith.constant 0 : index
      %c2_220 = arith.constant 2 : index
      %180 = vector.load %arg2[%c0_216, %c0_217, %c15_218, %c0_219, %c2_220] : memref<1x1x18x4x18xbf16, #tpu.memory_space<vmem>>, vector<1x1x1x4x16xbf16>
      %181 = vector.shape_cast %180 : vector<1x1x1x4x16xbf16> to vector<4x16xbf16>
      %c20_221 = arith.constant 20 : index
      %c224_222 = arith.constant 224 : index
      %182 = vector.load %arg8[%c20_221, %c224_222] : memref<36x256xbf16, #tpu.memory_space<vmem>>, vector<4x16xbf16>
      tpu.vector_store %arg8[%c20_221, %c224_222], %181 {strides = array<i32>} : memref<36x256xbf16, #tpu.memory_space<vmem>>, vector<4x16xbf16>,
      %c0_223 = arith.constant 0 : index
      %c0_224 = arith.constant 0 : index
      %c16_225 = arith.constant 16 : index
      %c0_226 = arith.constant 0 : index
      %c2_227 = arith.constant 2 : index
      %183 = vector.load %arg2[%c0_223, %c0_224, %c16_225, %c0_226, %c2_227] : memref<1x1x18x4x18xbf16, #tpu.memory_space<vmem>>, vector<1x1x1x4x16xbf16>
      %184 = vector.shape_cast %183 : vector<1x1x1x4x16xbf16> to vector<4x16xbf16>
      %c20_228 = arith.constant 20 : index
      %c240_229 = arith.constant 240 : index
      %185 = vector.load %arg8[%c20_228, %c240_229] : memref<36x256xbf16, #tpu.memory_space<vmem>>, vector<4x16xbf16>
      tpu.vector_store %arg8[%c20_228, %c240_229], %184 {strides = array<i32>} : memref<36x256xbf16, #tpu.memory_space<vmem>>, vector<4x16xbf16>,
    } else {
    }
    %true_24 = arith.constant true
    %41 = arith.xori %38, %true_24 : i1
    %42 = arith.extui %41 : i1 to i32
    %c0_i32_25 = arith.constant 0 : i32
    %43 = arith.cmpi ne, %42, %c0_i32_25 : i32
    scf.if %43 {
      %cst_57 = arith.constant 0.000000e+00 : bf16
      %82 = vector.broadcast %cst_57 : bf16 to vector<4x128xbf16>
      %c12 = arith.constant 12 : index
      %c128 = arith.constant 128 : index
      %83 = vector.load %arg8[%c12, %c128] : memref<36x256xbf16, #tpu.memory_space<vmem>>, vector<4x128xbf16>
      tpu.vector_store %arg8[%c12, %c128], %82 {strides = array<i32>} : memref<36x256xbf16, #tpu.memory_space<vmem>>, vector<4x128xbf16>,
      %cst_58 = arith.constant 0.000000e+00 : bf16
      %84 = vector.broadcast %cst_58 : bf16 to vector<4x128xbf16>
      %c16 = arith.constant 16 : index
      %c128_59 = arith.constant 128 : index
      %85 = vector.load %arg8[%c16, %c128_59] : memref<36x256xbf16, #tpu.memory_space<vmem>>, vector<4x128xbf16>
      tpu.vector_store %arg8[%c16, %c128_59], %84 {strides = array<i32>} : memref<36x256xbf16, #tpu.memory_space<vmem>>, vector<4x128xbf16>,
      %cst_60 = arith.constant 0.000000e+00 : bf16
      %86 = vector.broadcast %cst_60 : bf16 to vector<4x128xbf16>
      %c20 = arith.constant 20 : index
      %c128_61 = arith.constant 128 : index
      %87 = vector.load %arg8[%c20, %c128_61] : memref<36x256xbf16, #tpu.memory_space<vmem>>, vector<4x128xbf16>
      tpu.vector_store %arg8[%c20, %c128_61], %86 {strides = array<i32>} : memref<36x256xbf16, #tpu.memory_space<vmem>>, vector<4x128xbf16>,
    } else {
    }
    %c16_i32_26 = arith.constant 16 : i32
    %44 = arith.muli %arg1, %c16_i32_26 : i32
    %c0_i32_27 = arith.constant 0 : i32
    %45 = arith.addi %44, %c0_i32_27 : i32
    %c2_i32 = arith.constant 2 : i32
    %46 = arith.addi %45, %c2_i32 : i32
    %c1_i32_28 = arith.constant 1 : i32
    %47 = arith.cmpi sge, %46, %c1_i32_28 : i32
    %c17_i32_29 = arith.constant 17 : i32
    %48 = arith.cmpi slt, %46, %c17_i32_29 : i32
    %49 = arith.andi %47, %48 : i1
    %50 = arith.extui %49 : i1 to i32
    %c0_i32_30 = arith.constant 0 : i32
    %51 = arith.cmpi ne, %50, %c0_i32_30 : i32
    scf.if %51 {
      %c0_57 = arith.constant 0 : index
      %c0_58 = arith.constant 0 : index
      %c2 = arith.constant 2 : index
      %c0_59 = arith.constant 0 : index
      %c0_60 = arith.constant 0 : index
      %82 = vector.load %arg2[%c0_57, %c0_58, %c2, %c0_59, %c0_60] : memref<1x1x18x4x18xbf16, #tpu.memory_space<vmem>>, vector<1x1x1x4x16xbf16>
      %83 = vector.shape_cast %82 : vector<1x1x1x4x16xbf16> to vector<4x16xbf16>
      %c0_61 = arith.constant 0 : index
      %c0_62 = arith.constant 0 : index
      %c0_63 = arith.constant 0 : index
      %84 = vector.load %arg4[%c0_61, %c0_62, %c0_63] : memref<3x1x16xbf16, #tpu.memory_space<vmem>>, vector<1x1x16xbf16>
      %85 = vector.shape_cast %84 : vector<1x1x16xbf16> to vector<1x16xbf16>
      %86 = vector.broadcast %85 : vector<1x16xbf16> to vector<4x16xbf16>
      %87 = arith.mulf %83, %86 : vector<4x16xbf16>
      %c24 = arith.constant 24 : index
      %c0_64 = arith.constant 0 : index
      %88 = vector.load %arg8[%c24, %c0_64] : memref<36x256xbf16, #tpu.memory_space<vmem>>, vector<4x16xbf16>
      tpu.vector_store %arg8[%c24, %c0_64], %87 {strides = array<i32>} : memref<36x256xbf16, #tpu.memory_space<vmem>>, vector<4x16xbf16>,
      %c0_65 = arith.constant 0 : index
      %c0_66 = arith.constant 0 : index
      %c3 = arith.constant 3 : index
      %c0_67 = arith.constant 0 : index
      %c0_68 = arith.constant 0 : index
      %89 = vector.load %arg2[%c0_65, %c0_66, %c3, %c0_67, %c0_68] : memref<1x1x18x4x18xbf16, #tpu.memory_space<vmem>>, vector<1x1x1x4x16xbf16>
      %90 = vector.shape_cast %89 : vector<1x1x1x4x16xbf16> to vector<4x16xbf16>
      %c0_69 = arith.constant 0 : index
      %c0_70 = arith.constant 0 : index
      %c0_71 = arith.constant 0 : index
      %91 = vector.load %arg4[%c0_69, %c0_70, %c0_71] : memref<3x1x16xbf16, #tpu.memory_space<vmem>>, vector<1x1x16xbf16>
      %92 = vector.shape_cast %91 : vector<1x1x16xbf16> to vector<1x16xbf16>
      %93 = vector.broadcast %92 : vector<1x16xbf16> to vector<4x16xbf16>
      %94 = arith.mulf %90, %93 : vector<4x16xbf16>
      %c24_72 = arith.constant 24 : index
      %c16 = arith.constant 16 : index
      %95 = vector.load %arg8[%c24_72, %c16] : memref<36x256xbf16, #tpu.memory_space<vmem>>, vector<4x16xbf16>
      tpu.vector_store %arg8[%c24_72, %c16], %94 {strides = array<i32>} : memref<36x256xbf16, #tpu.memory_space<vmem>>, vector<4x16xbf16>,
      %c0_73 = arith.constant 0 : index
      %c0_74 = arith.constant 0 : index
      %c4 = arith.constant 4 : index
      %c0_75 = arith.constant 0 : index
      %c0_76 = arith.constant 0 : index
      %96 = vector.load %arg2[%c0_73, %c0_74, %c4, %c0_75, %c0_76] : memref<1x1x18x4x18xbf16, #tpu.memory_space<vmem>>, vector<1x1x1x4x16xbf16>
      %97 = vector.shape_cast %96 : vector<1x1x1x4x16xbf16> to vector<4x16xbf16>
      %c0_77 = arith.constant 0 : index
      %c0_78 = arith.constant 0 : index
      %c0_79 = arith.constant 0 : index
      %98 = vector.load %arg4[%c0_77, %c0_78, %c0_79] : memref<3x1x16xbf16, #tpu.memory_space<vmem>>, vector<1x1x16xbf16>
      %99 = vector.shape_cast %98 : vector<1x1x16xbf16> to vector<1x16xbf16>
      %100 = vector.broadcast %99 : vector<1x16xbf16> to vector<4x16xbf16>
      %101 = arith.mulf %97, %100 : vector<4x16xbf16>
      %c24_80 = arith.constant 24 : index
      %c32 = arith.constant 32 : index
      %102 = vector.load %arg8[%c24_80, %c32] : memref<36x256xbf16, #tpu.memory_space<vmem>>, vector<4x16xbf16>
      tpu.vector_store %arg8[%c24_80, %c32], %101 {strides = array<i32>} : memref<36x256xbf16, #tpu.memory_space<vmem>>, vector<4x16xbf16>,
      %c0_81 = arith.constant 0 : index
      %c0_82 = arith.constant 0 : index
      %c5 = arith.constant 5 : index
      %c0_83 = arith.constant 0 : index
      %c0_84 = arith.constant 0 : index
      %103 = vector.load %arg2[%c0_81, %c0_82, %c5, %c0_83, %c0_84] : memref<1x1x18x4x18xbf16, #tpu.memory_space<vmem>>, vector<1x1x1x4x16xbf16>
      %104 = vector.shape_cast %103 : vector<1x1x1x4x16xbf16> to vector<4x16xbf16>
      %c0_85 = arith.constant 0 : index
      %c0_86 = arith.constant 0 : index
      %c0_87 = arith.constant 0 : index
      %105 = vector.load %arg4[%c0_85, %c0_86, %c0_87] : memref<3x1x16xbf16, #tpu.memory_space<vmem>>, vector<1x1x16xbf16>
      %106 = vector.shape_cast %105 : vector<1x1x16xbf16> to vector<1x16xbf16>
      %107 = vector.broadcast %106 : vector<1x16xbf16> to vector<4x16xbf16>
      %108 = arith.mulf %104, %107 : vector<4x16xbf16>
      %c24_88 = arith.constant 24 : index
      %c48 = arith.constant 48 : index
      %109 = vector.load %arg8[%c24_88, %c48] : memref<36x256xbf16, #tpu.memory_space<vmem>>, vector<4x16xbf16>
      tpu.vector_store %arg8[%c24_88, %c48], %108 {strides = array<i32>} : memref<36x256xbf16, #tpu.memory_space<vmem>>, vector<4x16xbf16>,
      %c0_89 = arith.constant 0 : index
      %c0_90 = arith.constant 0 : index
      %c6 = arith.constant 6 : index
      %c0_91 = arith.constant 0 : index
      %c0_92 = arith.constant 0 : index
      %110 = vector.load %arg2[%c0_89, %c0_90, %c6, %c0_91, %c0_92] : memref<1x1x18x4x18xbf16, #tpu.memory_space<vmem>>, vector<1x1x1x4x16xbf16>
      %111 = vector.shape_cast %110 : vector<1x1x1x4x16xbf16> to vector<4x16xbf16>
      %c0_93 = arith.constant 0 : index
      %c0_94 = arith.constant 0 : index
      %c0_95 = arith.constant 0 : index
      %112 = vector.load %arg4[%c0_93, %c0_94, %c0_95] : memref<3x1x16xbf16, #tpu.memory_space<vmem>>, vector<1x1x16xbf16>
      %113 = vector.shape_cast %112 : vector<1x1x16xbf16> to vector<1x16xbf16>
      %114 = vector.broadcast %113 : vector<1x16xbf16> to vector<4x16xbf16>
      %115 = arith.mulf %111, %114 : vector<4x16xbf16>
      %c24_96 = arith.constant 24 : index
      %c64 = arith.constant 64 : index
      %116 = vector.load %arg8[%c24_96, %c64] : memref<36x256xbf16, #tpu.memory_space<vmem>>, vector<4x16xbf16>
      tpu.vector_store %arg8[%c24_96, %c64], %115 {strides = array<i32>} : memref<36x256xbf16, #tpu.memory_space<vmem>>, vector<4x16xbf16>,
      %c0_97 = arith.constant 0 : index
      %c0_98 = arith.constant 0 : index
      %c7 = arith.constant 7 : index
      %c0_99 = arith.constant 0 : index
      %c0_100 = arith.constant 0 : index
      %117 = vector.load %arg2[%c0_97, %c0_98, %c7, %c0_99, %c0_100] : memref<1x1x18x4x18xbf16, #tpu.memory_space<vmem>>, vector<1x1x1x4x16xbf16>
      %118 = vector.shape_cast %117 : vector<1x1x1x4x16xbf16> to vector<4x16xbf16>
      %c0_101 = arith.constant 0 : index
      %c0_102 = arith.constant 0 : index
      %c0_103 = arith.constant 0 : index
      %119 = vector.load %arg4[%c0_101, %c0_102, %c0_103] : memref<3x1x16xbf16, #tpu.memory_space<vmem>>, vector<1x1x16xbf16>
      %120 = vector.shape_cast %119 : vector<1x1x16xbf16> to vector<1x16xbf16>
      %121 = vector.broadcast %120 : vector<1x16xbf16> to vector<4x16xbf16>
      %122 = arith.mulf %118, %121 : vector<4x16xbf16>
      %c24_104 = arith.constant 24 : index
      %c80 = arith.constant 80 : index
      %123 = vector.load %arg8[%c24_104, %c80] : memref<36x256xbf16, #tpu.memory_space<vmem>>, vector<4x16xbf16>
      tpu.vector_store %arg8[%c24_104, %c80], %122 {strides = array<i32>} : memref<36x256xbf16, #tpu.memory_space<vmem>>, vector<4x16xbf16>,
      %c0_105 = arith.constant 0 : index
      %c0_106 = arith.constant 0 : index
      %c8 = arith.constant 8 : index
      %c0_107 = arith.constant 0 : index
      %c0_108 = arith.constant 0 : index
      %124 = vector.load %arg2[%c0_105, %c0_106, %c8, %c0_107, %c0_108] : memref<1x1x18x4x18xbf16, #tpu.memory_space<vmem>>, vector<1x1x1x4x16xbf16>
      %125 = vector.shape_cast %124 : vector<1x1x1x4x16xbf16> to vector<4x16xbf16>
      %c0_109 = arith.constant 0 : index
      %c0_110 = arith.constant 0 : index
      %c0_111 = arith.constant 0 : index
      %126 = vector.load %arg4[%c0_109, %c0_110, %c0_111] : memref<3x1x16xbf16, #tpu.memory_space<vmem>>, vector<1x1x16xbf16>
      %127 = vector.shape_cast %126 : vector<1x1x16xbf16> to vector<1x16xbf16>
      %128 = vector.broadcast %127 : vector<1x16xbf16> to vector<4x16xbf16>
      %129 = arith.mulf %125, %128 : vector<4x16xbf16>
      %c24_112 = arith.constant 24 : index
      %c96 = arith.constant 96 : index
      %130 = vector.load %arg8[%c24_112, %c96] : memref<36x256xbf16, #tpu.memory_space<vmem>>, vector<4x16xbf16>
      tpu.vector_store %arg8[%c24_112, %c96], %129 {strides = array<i32>} : memref<36x256xbf16, #tpu.memory_space<vmem>>, vector<4x16xbf16>,
      %c0_113 = arith.constant 0 : index
      %c0_114 = arith.constant 0 : index
      %c9 = arith.constant 9 : index
      %c0_115 = arith.constant 0 : index
      %c0_116 = arith.constant 0 : index
      %131 = vector.load %arg2[%c0_113, %c0_114, %c9, %c0_115, %c0_116] : memref<1x1x18x4x18xbf16, #tpu.memory_space<vmem>>, vector<1x1x1x4x16xbf16>
      %132 = vector.shape_cast %131 : vector<1x1x1x4x16xbf16> to vector<4x16xbf16>
      %c0_117 = arith.constant 0 : index
      %c0_118 = arith.constant 0 : index
      %c0_119 = arith.constant 0 : index
      %133 = vector.load %arg4[%c0_117, %c0_118, %c0_119] : memref<3x1x16xbf16, #tpu.memory_space<vmem>>, vector<1x1x16xbf16>
      %134 = vector.shape_cast %133 : vector<1x1x16xbf16> to vector<1x16xbf16>
      %135 = vector.broadcast %134 : vector<1x16xbf16> to vector<4x16xbf16>
      %136 = arith.mulf %132, %135 : vector<4x16xbf16>
      %c24_120 = arith.constant 24 : index
      %c112 = arith.constant 112 : index
      %137 = vector.load %arg8[%c24_120, %c112] : memref<36x256xbf16, #tpu.memory_space<vmem>>, vector<4x16xbf16>
      tpu.vector_store %arg8[%c24_120, %c112], %136 {strides = array<i32>} : memref<36x256xbf16, #tpu.memory_space<vmem>>, vector<4x16xbf16>,
      %c0_121 = arith.constant 0 : index
      %c0_122 = arith.constant 0 : index
      %c2_123 = arith.constant 2 : index
      %c0_124 = arith.constant 0 : index
      %c1 = arith.constant 1 : index
      %138 = vector.load %arg2[%c0_121, %c0_122, %c2_123, %c0_124, %c1] : memref<1x1x18x4x18xbf16, #tpu.memory_space<vmem>>, vector<1x1x1x4x16xbf16>
      %139 = vector.shape_cast %138 : vector<1x1x1x4x16xbf16> to vector<4x16xbf16>
      %c28 = arith.constant 28 : index
      %c0_125 = arith.constant 0 : index
      %140 = vector.load %arg8[%c28, %c0_125] : memref<36x256xbf16, #tpu.memory_space<vmem>>, vector<4x16xbf16>
      tpu.vector_store %arg8[%c28, %c0_125], %139 {strides = array<i32>} : memref<36x256xbf16, #tpu.memory_space<vmem>>, vector<4x16xbf16>,
      %c0_126 = arith.constant 0 : index
      %c0_127 = arith.constant 0 : index
      %c3_128 = arith.constant 3 : index
      %c0_129 = arith.constant 0 : index
      %c1_130 = arith.constant 1 : index
      %141 = vector.load %arg2[%c0_126, %c0_127, %c3_128, %c0_129, %c1_130] : memref<1x1x18x4x18xbf16, #tpu.memory_space<vmem>>, vector<1x1x1x4x16xbf16>
      %142 = vector.shape_cast %141 : vector<1x1x1x4x16xbf16> to vector<4x16xbf16>
      %c28_131 = arith.constant 28 : index
      %c16_132 = arith.constant 16 : index
      %143 = vector.load %arg8[%c28_131, %c16_132] : memref<36x256xbf16, #tpu.memory_space<vmem>>, vector<4x16xbf16>
      tpu.vector_store %arg8[%c28_131, %c16_132], %142 {strides = array<i32>} : memref<36x256xbf16, #tpu.memory_space<vmem>>, vector<4x16xbf16>,
      %c0_133 = arith.constant 0 : index
      %c0_134 = arith.constant 0 : index
      %c4_135 = arith.constant 4 : index
      %c0_136 = arith.constant 0 : index
      %c1_137 = arith.constant 1 : index
      %144 = vector.load %arg2[%c0_133, %c0_134, %c4_135, %c0_136, %c1_137] : memref<1x1x18x4x18xbf16, #tpu.memory_space<vmem>>, vector<1x1x1x4x16xbf16>
      %145 = vector.shape_cast %144 : vector<1x1x1x4x16xbf16> to vector<4x16xbf16>
      %c28_138 = arith.constant 28 : index
      %c32_139 = arith.constant 32 : index
      %146 = vector.load %arg8[%c28_138, %c32_139] : memref<36x256xbf16, #tpu.memory_space<vmem>>, vector<4x16xbf16>
      tpu.vector_store %arg8[%c28_138, %c32_139], %145 {strides = array<i32>} : memref<36x256xbf16, #tpu.memory_space<vmem>>, vector<4x16xbf16>,
      %c0_140 = arith.constant 0 : index
      %c0_141 = arith.constant 0 : index
      %c5_142 = arith.constant 5 : index
      %c0_143 = arith.constant 0 : index
      %c1_144 = arith.constant 1 : index
      %147 = vector.load %arg2[%c0_140, %c0_141, %c5_142, %c0_143, %c1_144] : memref<1x1x18x4x18xbf16, #tpu.memory_space<vmem>>, vector<1x1x1x4x16xbf16>
      %148 = vector.shape_cast %147 : vector<1x1x1x4x16xbf16> to vector<4x16xbf16>
      %c28_145 = arith.constant 28 : index
      %c48_146 = arith.constant 48 : index
      %149 = vector.load %arg8[%c28_145, %c48_146] : memref<36x256xbf16, #tpu.memory_space<vmem>>, vector<4x16xbf16>
      tpu.vector_store %arg8[%c28_145, %c48_146], %148 {strides = array<i32>} : memref<36x256xbf16, #tpu.memory_space<vmem>>, vector<4x16xbf16>,
      %c0_147 = arith.constant 0 : index
      %c0_148 = arith.constant 0 : index
      %c6_149 = arith.constant 6 : index
      %c0_150 = arith.constant 0 : index
      %c1_151 = arith.constant 1 : index
      %150 = vector.load %arg2[%c0_147, %c0_148, %c6_149, %c0_150, %c1_151] : memref<1x1x18x4x18xbf16, #tpu.memory_space<vmem>>, vector<1x1x1x4x16xbf16>
      %151 = vector.shape_cast %150 : vector<1x1x1x4x16xbf16> to vector<4x16xbf16>
      %c28_152 = arith.constant 28 : index
      %c64_153 = arith.constant 64 : index
      %152 = vector.load %arg8[%c28_152, %c64_153] : memref<36x256xbf16, #tpu.memory_space<vmem>>, vector<4x16xbf16>
      tpu.vector_store %arg8[%c28_152, %c64_153], %151 {strides = array<i32>} : memref<36x256xbf16, #tpu.memory_space<vmem>>, vector<4x16xbf16>,
      %c0_154 = arith.constant 0 : index
      %c0_155 = arith.constant 0 : index
      %c7_156 = arith.constant 7 : index
      %c0_157 = arith.constant 0 : index
      %c1_158 = arith.constant 1 : index
      %153 = vector.load %arg2[%c0_154, %c0_155, %c7_156, %c0_157, %c1_158] : memref<1x1x18x4x18xbf16, #tpu.memory_space<vmem>>, vector<1x1x1x4x16xbf16>
      %154 = vector.shape_cast %153 : vector<1x1x1x4x16xbf16> to vector<4x16xbf16>
      %c28_159 = arith.constant 28 : index
      %c80_160 = arith.constant 80 : index
      %155 = vector.load %arg8[%c28_159, %c80_160] : memref<36x256xbf16, #tpu.memory_space<vmem>>, vector<4x16xbf16>
      tpu.vector_store %arg8[%c28_159, %c80_160], %154 {strides = array<i32>} : memref<36x256xbf16, #tpu.memory_space<vmem>>, vector<4x16xbf16>,
      %c0_161 = arith.constant 0 : index
      %c0_162 = arith.constant 0 : index
      %c8_163 = arith.constant 8 : index
      %c0_164 = arith.constant 0 : index
      %c1_165 = arith.constant 1 : index
      %156 = vector.load %arg2[%c0_161, %c0_162, %c8_163, %c0_164, %c1_165] : memref<1x1x18x4x18xbf16, #tpu.memory_space<vmem>>, vector<1x1x1x4x16xbf16>
      %157 = vector.shape_cast %156 : vector<1x1x1x4x16xbf16> to vector<4x16xbf16>
      %c28_166 = arith.constant 28 : index
      %c96_167 = arith.constant 96 : index
      %158 = vector.load %arg8[%c28_166, %c96_167] : memref<36x256xbf16, #tpu.memory_space<vmem>>, vector<4x16xbf16>
      tpu.vector_store %arg8[%c28_166, %c96_167], %157 {strides = array<i32>} : memref<36x256xbf16, #tpu.memory_space<vmem>>, vector<4x16xbf16>,
      %c0_168 = arith.constant 0 : index
      %c0_169 = arith.constant 0 : index
      %c9_170 = arith.constant 9 : index
      %c0_171 = arith.constant 0 : index
      %c1_172 = arith.constant 1 : index
      %159 = vector.load %arg2[%c0_168, %c0_169, %c9_170, %c0_171, %c1_172] : memref<1x1x18x4x18xbf16, #tpu.memory_space<vmem>>, vector<1x1x1x4x16xbf16>
      %160 = vector.shape_cast %159 : vector<1x1x1x4x16xbf16> to vector<4x16xbf16>
      %c28_173 = arith.constant 28 : index
      %c112_174 = arith.constant 112 : index
      %161 = vector.load %arg8[%c28_173, %c112_174] : memref<36x256xbf16, #tpu.memory_space<vmem>>, vector<4x16xbf16>
      tpu.vector_store %arg8[%c28_173, %c112_174], %160 {strides = array<i32>} : memref<36x256xbf16, #tpu.memory_space<vmem>>, vector<4x16xbf16>,
      %c0_175 = arith.constant 0 : index
      %c0_176 = arith.constant 0 : index
      %c2_177 = arith.constant 2 : index
      %c0_178 = arith.constant 0 : index
      %c2_179 = arith.constant 2 : index
      %162 = vector.load %arg2[%c0_175, %c0_176, %c2_177, %c0_178, %c2_179] : memref<1x1x18x4x18xbf16, #tpu.memory_space<vmem>>, vector<1x1x1x4x16xbf16>
      %163 = vector.shape_cast %162 : vector<1x1x1x4x16xbf16> to vector<4x16xbf16>
      %c32_180 = arith.constant 32 : index
      %c0_181 = arith.constant 0 : index
      %164 = vector.load %arg8[%c32_180, %c0_181] : memref<36x256xbf16, #tpu.memory_space<vmem>>, vector<4x16xbf16>
      tpu.vector_store %arg8[%c32_180, %c0_181], %163 {strides = array<i32>} : memref<36x256xbf16, #tpu.memory_space<vmem>>, vector<4x16xbf16>,
      %c0_182 = arith.constant 0 : index
      %c0_183 = arith.constant 0 : index
      %c3_184 = arith.constant 3 : index
      %c0_185 = arith.constant 0 : index
      %c2_186 = arith.constant 2 : index
      %165 = vector.load %arg2[%c0_182, %c0_183, %c3_184, %c0_185, %c2_186] : memref<1x1x18x4x18xbf16, #tpu.memory_space<vmem>>, vector<1x1x1x4x16xbf16>
      %166 = vector.shape_cast %165 : vector<1x1x1x4x16xbf16> to vector<4x16xbf16>
      %c32_187 = arith.constant 32 : index
      %c16_188 = arith.constant 16 : index
      %167 = vector.load %arg8[%c32_187, %c16_188] : memref<36x256xbf16, #tpu.memory_space<vmem>>, vector<4x16xbf16>
      tpu.vector_store %arg8[%c32_187, %c16_188], %166 {strides = array<i32>} : memref<36x256xbf16, #tpu.memory_space<vmem>>, vector<4x16xbf16>,
      %c0_189 = arith.constant 0 : index
      %c0_190 = arith.constant 0 : index
      %c4_191 = arith.constant 4 : index
      %c0_192 = arith.constant 0 : index
      %c2_193 = arith.constant 2 : index
      %168 = vector.load %arg2[%c0_189, %c0_190, %c4_191, %c0_192, %c2_193] : memref<1x1x18x4x18xbf16, #tpu.memory_space<vmem>>, vector<1x1x1x4x16xbf16>
      %169 = vector.shape_cast %168 : vector<1x1x1x4x16xbf16> to vector<4x16xbf16>
      %c32_194 = arith.constant 32 : index
      %c32_195 = arith.constant 32 : index
      %170 = vector.load %arg8[%c32_194, %c32_195] : memref<36x256xbf16, #tpu.memory_space<vmem>>, vector<4x16xbf16>
      tpu.vector_store %arg8[%c32_194, %c32_195], %169 {strides = array<i32>} : memref<36x256xbf16, #tpu.memory_space<vmem>>, vector<4x16xbf16>,
      %c0_196 = arith.constant 0 : index
      %c0_197 = arith.constant 0 : index
      %c5_198 = arith.constant 5 : index
      %c0_199 = arith.constant 0 : index
      %c2_200 = arith.constant 2 : index
      %171 = vector.load %arg2[%c0_196, %c0_197, %c5_198, %c0_199, %c2_200] : memref<1x1x18x4x18xbf16, #tpu.memory_space<vmem>>, vector<1x1x1x4x16xbf16>
      %172 = vector.shape_cast %171 : vector<1x1x1x4x16xbf16> to vector<4x16xbf16>
      %c32_201 = arith.constant 32 : index
      %c48_202 = arith.constant 48 : index
      %173 = vector.load %arg8[%c32_201, %c48_202] : memref<36x256xbf16, #tpu.memory_space<vmem>>, vector<4x16xbf16>
      tpu.vector_store %arg8[%c32_201, %c48_202], %172 {strides = array<i32>} : memref<36x256xbf16, #tpu.memory_space<vmem>>, vector<4x16xbf16>,
      %c0_203 = arith.constant 0 : index
      %c0_204 = arith.constant 0 : index
      %c6_205 = arith.constant 6 : index
      %c0_206 = arith.constant 0 : index
      %c2_207 = arith.constant 2 : index
      %174 = vector.load %arg2[%c0_203, %c0_204, %c6_205, %c0_206, %c2_207] : memref<1x1x18x4x18xbf16, #tpu.memory_space<vmem>>, vector<1x1x1x4x16xbf16>
      %175 = vector.shape_cast %174 : vector<1x1x1x4x16xbf16> to vector<4x16xbf16>
      %c32_208 = arith.constant 32 : index
      %c64_209 = arith.constant 64 : index
      %176 = vector.load %arg8[%c32_208, %c64_209] : memref<36x256xbf16, #tpu.memory_space<vmem>>, vector<4x16xbf16>
      tpu.vector_store %arg8[%c32_208, %c64_209], %175 {strides = array<i32>} : memref<36x256xbf16, #tpu.memory_space<vmem>>, vector<4x16xbf16>,
      %c0_210 = arith.constant 0 : index
      %c0_211 = arith.constant 0 : index
      %c7_212 = arith.constant 7 : index
      %c0_213 = arith.constant 0 : index
      %c2_214 = arith.constant 2 : index
      %177 = vector.load %arg2[%c0_210, %c0_211, %c7_212, %c0_213, %c2_214] : memref<1x1x18x4x18xbf16, #tpu.memory_space<vmem>>, vector<1x1x1x4x16xbf16>
      %178 = vector.shape_cast %177 : vector<1x1x1x4x16xbf16> to vector<4x16xbf16>
      %c32_215 = arith.constant 32 : index
      %c80_216 = arith.constant 80 : index
      %179 = vector.load %arg8[%c32_215, %c80_216] : memref<36x256xbf16, #tpu.memory_space<vmem>>, vector<4x16xbf16>
      tpu.vector_store %arg8[%c32_215, %c80_216], %178 {strides = array<i32>} : memref<36x256xbf16, #tpu.memory_space<vmem>>, vector<4x16xbf16>,
      %c0_217 = arith.constant 0 : index
      %c0_218 = arith.constant 0 : index
      %c8_219 = arith.constant 8 : index
      %c0_220 = arith.constant 0 : index
      %c2_221 = arith.constant 2 : index
      %180 = vector.load %arg2[%c0_217, %c0_218, %c8_219, %c0_220, %c2_221] : memref<1x1x18x4x18xbf16, #tpu.memory_space<vmem>>, vector<1x1x1x4x16xbf16>
      %181 = vector.shape_cast %180 : vector<1x1x1x4x16xbf16> to vector<4x16xbf16>
      %c32_222 = arith.constant 32 : index
      %c96_223 = arith.constant 96 : index
      %182 = vector.load %arg8[%c32_222, %c96_223] : memref<36x256xbf16, #tpu.memory_space<vmem>>, vector<4x16xbf16>
      tpu.vector_store %arg8[%c32_222, %c96_223], %181 {strides = array<i32>} : memref<36x256xbf16, #tpu.memory_space<vmem>>, vector<4x16xbf16>,
      %c0_224 = arith.constant 0 : index
      %c0_225 = arith.constant 0 : index
      %c9_226 = arith.constant 9 : index
      %c0_227 = arith.constant 0 : index
      %c2_228 = arith.constant 2 : index
      %183 = vector.load %arg2[%c0_224, %c0_225, %c9_226, %c0_227, %c2_228] : memref<1x1x18x4x18xbf16, #tpu.memory_space<vmem>>, vector<1x1x1x4x16xbf16>
      %184 = vector.shape_cast %183 : vector<1x1x1x4x16xbf16> to vector<4x16xbf16>
      %c32_229 = arith.constant 32 : index
      %c112_230 = arith.constant 112 : index
      %185 = vector.load %arg8[%c32_229, %c112_230] : memref<36x256xbf16, #tpu.memory_space<vmem>>, vector<4x16xbf16>
      tpu.vector_store %arg8[%c32_229, %c112_230], %184 {strides = array<i32>} : memref<36x256xbf16, #tpu.memory_space<vmem>>, vector<4x16xbf16>,
    } else {
    }
    %true_31 = arith.constant true
    %52 = arith.xori %49, %true_31 : i1
    %53 = arith.extui %52 : i1 to i32
    %c0_i32_32 = arith.constant 0 : i32
    %54 = arith.cmpi ne, %53, %c0_i32_32 : i32
    scf.if %54 {
      %cst_57 = arith.constant 0.000000e+00 : bf16
      %82 = vector.broadcast %cst_57 : bf16 to vector<4x128xbf16>
      %c24 = arith.constant 24 : index
      %c0_58 = arith.constant 0 : index
      %83 = vector.load %arg8[%c24, %c0_58] : memref<36x256xbf16, #tpu.memory_space<vmem>>, vector<4x128xbf16>
      tpu.vector_store %arg8[%c24, %c0_58], %82 {strides = array<i32>} : memref<36x256xbf16, #tpu.memory_space<vmem>>, vector<4x128xbf16>,
      %cst_59 = arith.constant 0.000000e+00 : bf16
      %84 = vector.broadcast %cst_59 : bf16 to vector<4x128xbf16>
      %c28 = arith.constant 28 : index
      %c0_60 = arith.constant 0 : index
      %85 = vector.load %arg8[%c28, %c0_60] : memref<36x256xbf16, #tpu.memory_space<vmem>>, vector<4x128xbf16>
      tpu.vector_store %arg8[%c28, %c0_60], %84 {strides = array<i32>} : memref<36x256xbf16, #tpu.memory_space<vmem>>, vector<4x128xbf16>,
      %cst_61 = arith.constant 0.000000e+00 : bf16
      %86 = vector.broadcast %cst_61 : bf16 to vector<4x128xbf16>
      %c32 = arith.constant 32 : index
      %c0_62 = arith.constant 0 : index
      %87 = vector.load %arg8[%c32, %c0_62] : memref<36x256xbf16, #tpu.memory_space<vmem>>, vector<4x128xbf16>
      tpu.vector_store %arg8[%c32, %c0_62], %86 {strides = array<i32>} : memref<36x256xbf16, #tpu.memory_space<vmem>>, vector<4x128xbf16>,
    } else {
    }
    %c16_i32_33 = arith.constant 16 : i32
    %55 = arith.muli %arg1, %c16_i32_33 : i32
    %c8_i32_34 = arith.constant 8 : i32
    %56 = arith.addi %55, %c8_i32_34 : i32
    %c2_i32_35 = arith.constant 2 : i32
    %57 = arith.addi %56, %c2_i32_35 : i32
    %c1_i32_36 = arith.constant 1 : i32
    %58 = arith.cmpi sge, %57, %c1_i32_36 : i32
    %c17_i32_37 = arith.constant 17 : i32
    %59 = arith.cmpi slt, %57, %c17_i32_37 : i32
    %60 = arith.andi %58, %59 : i1
    %61 = arith.extui %60 : i1 to i32
    %c0_i32_38 = arith.constant 0 : i32
    %62 = arith.cmpi ne, %61, %c0_i32_38 : i32
    scf.if %62 {
      %c0_57 = arith.constant 0 : index
      %c0_58 = arith.constant 0 : index
      %c10 = arith.constant 10 : index
      %c0_59 = arith.constant 0 : index
      %c0_60 = arith.constant 0 : index
      %82 = vector.load %arg2[%c0_57, %c0_58, %c10, %c0_59, %c0_60] : memref<1x1x18x4x18xbf16, #tpu.memory_space<vmem>>, vector<1x1x1x4x16xbf16>
      %83 = vector.shape_cast %82 : vector<1x1x1x4x16xbf16> to vector<4x16xbf16>
      %c0_61 = arith.constant 0 : index
      %c0_62 = arith.constant 0 : index
      %c0_63 = arith.constant 0 : index
      %84 = vector.load %arg4[%c0_61, %c0_62, %c0_63] : memref<3x1x16xbf16, #tpu.memory_space<vmem>>, vector<1x1x16xbf16>
      %85 = vector.shape_cast %84 : vector<1x1x16xbf16> to vector<1x16xbf16>
      %86 = vector.broadcast %85 : vector<1x16xbf16> to vector<4x16xbf16>
      %87 = arith.mulf %83, %86 : vector<4x16xbf16>
      %c24 = arith.constant 24 : index
      %c128 = arith.constant 128 : index
      %88 = vector.load %arg8[%c24, %c128] : memref<36x256xbf16, #tpu.memory_space<vmem>>, vector<4x16xbf16>
      tpu.vector_store %arg8[%c24, %c128], %87 {strides = array<i32>} : memref<36x256xbf16, #tpu.memory_space<vmem>>, vector<4x16xbf16>,
      %c0_64 = arith.constant 0 : index
      %c0_65 = arith.constant 0 : index
      %c11 = arith.constant 11 : index
      %c0_66 = arith.constant 0 : index
      %c0_67 = arith.constant 0 : index
      %89 = vector.load %arg2[%c0_64, %c0_65, %c11, %c0_66, %c0_67] : memref<1x1x18x4x18xbf16, #tpu.memory_space<vmem>>, vector<1x1x1x4x16xbf16>
      %90 = vector.shape_cast %89 : vector<1x1x1x4x16xbf16> to vector<4x16xbf16>
      %c0_68 = arith.constant 0 : index
      %c0_69 = arith.constant 0 : index
      %c0_70 = arith.constant 0 : index
      %91 = vector.load %arg4[%c0_68, %c0_69, %c0_70] : memref<3x1x16xbf16, #tpu.memory_space<vmem>>, vector<1x1x16xbf16>
      %92 = vector.shape_cast %91 : vector<1x1x16xbf16> to vector<1x16xbf16>
      %93 = vector.broadcast %92 : vector<1x16xbf16> to vector<4x16xbf16>
      %94 = arith.mulf %90, %93 : vector<4x16xbf16>
      %c24_71 = arith.constant 24 : index
      %c144 = arith.constant 144 : index
      %95 = vector.load %arg8[%c24_71, %c144] : memref<36x256xbf16, #tpu.memory_space<vmem>>, vector<4x16xbf16>
      tpu.vector_store %arg8[%c24_71, %c144], %94 {strides = array<i32>} : memref<36x256xbf16, #tpu.memory_space<vmem>>, vector<4x16xbf16>,
      %c0_72 = arith.constant 0 : index
      %c0_73 = arith.constant 0 : index
      %c12 = arith.constant 12 : index
      %c0_74 = arith.constant 0 : index
      %c0_75 = arith.constant 0 : index
      %96 = vector.load %arg2[%c0_72, %c0_73, %c12, %c0_74, %c0_75] : memref<1x1x18x4x18xbf16, #tpu.memory_space<vmem>>, vector<1x1x1x4x16xbf16>
      %97 = vector.shape_cast %96 : vector<1x1x1x4x16xbf16> to vector<4x16xbf16>
      %c0_76 = arith.constant 0 : index
      %c0_77 = arith.constant 0 : index
      %c0_78 = arith.constant 0 : index
      %98 = vector.load %arg4[%c0_76, %c0_77, %c0_78] : memref<3x1x16xbf16, #tpu.memory_space<vmem>>, vector<1x1x16xbf16>
      %99 = vector.shape_cast %98 : vector<1x1x16xbf16> to vector<1x16xbf16>
      %100 = vector.broadcast %99 : vector<1x16xbf16> to vector<4x16xbf16>
      %101 = arith.mulf %97, %100 : vector<4x16xbf16>
      %c24_79 = arith.constant 24 : index
      %c160 = arith.constant 160 : index
      %102 = vector.load %arg8[%c24_79, %c160] : memref<36x256xbf16, #tpu.memory_space<vmem>>, vector<4x16xbf16>
      tpu.vector_store %arg8[%c24_79, %c160], %101 {strides = array<i32>} : memref<36x256xbf16, #tpu.memory_space<vmem>>, vector<4x16xbf16>,
      %c0_80 = arith.constant 0 : index
      %c0_81 = arith.constant 0 : index
      %c13 = arith.constant 13 : index
      %c0_82 = arith.constant 0 : index
      %c0_83 = arith.constant 0 : index
      %103 = vector.load %arg2[%c0_80, %c0_81, %c13, %c0_82, %c0_83] : memref<1x1x18x4x18xbf16, #tpu.memory_space<vmem>>, vector<1x1x1x4x16xbf16>
      %104 = vector.shape_cast %103 : vector<1x1x1x4x16xbf16> to vector<4x16xbf16>
      %c0_84 = arith.constant 0 : index
      %c0_85 = arith.constant 0 : index
      %c0_86 = arith.constant 0 : index
      %105 = vector.load %arg4[%c0_84, %c0_85, %c0_86] : memref<3x1x16xbf16, #tpu.memory_space<vmem>>, vector<1x1x16xbf16>
      %106 = vector.shape_cast %105 : vector<1x1x16xbf16> to vector<1x16xbf16>
      %107 = vector.broadcast %106 : vector<1x16xbf16> to vector<4x16xbf16>
      %108 = arith.mulf %104, %107 : vector<4x16xbf16>
      %c24_87 = arith.constant 24 : index
      %c176 = arith.constant 176 : index
      %109 = vector.load %arg8[%c24_87, %c176] : memref<36x256xbf16, #tpu.memory_space<vmem>>, vector<4x16xbf16>
      tpu.vector_store %arg8[%c24_87, %c176], %108 {strides = array<i32>} : memref<36x256xbf16, #tpu.memory_space<vmem>>, vector<4x16xbf16>,
      %c0_88 = arith.constant 0 : index
      %c0_89 = arith.constant 0 : index
      %c14 = arith.constant 14 : index
      %c0_90 = arith.constant 0 : index
      %c0_91 = arith.constant 0 : index
      %110 = vector.load %arg2[%c0_88, %c0_89, %c14, %c0_90, %c0_91] : memref<1x1x18x4x18xbf16, #tpu.memory_space<vmem>>, vector<1x1x1x4x16xbf16>
      %111 = vector.shape_cast %110 : vector<1x1x1x4x16xbf16> to vector<4x16xbf16>
      %c0_92 = arith.constant 0 : index
      %c0_93 = arith.constant 0 : index
      %c0_94 = arith.constant 0 : index
      %112 = vector.load %arg4[%c0_92, %c0_93, %c0_94] : memref<3x1x16xbf16, #tpu.memory_space<vmem>>, vector<1x1x16xbf16>
      %113 = vector.shape_cast %112 : vector<1x1x16xbf16> to vector<1x16xbf16>
      %114 = vector.broadcast %113 : vector<1x16xbf16> to vector<4x16xbf16>
      %115 = arith.mulf %111, %114 : vector<4x16xbf16>
      %c24_95 = arith.constant 24 : index
      %c192 = arith.constant 192 : index
      %116 = vector.load %arg8[%c24_95, %c192] : memref<36x256xbf16, #tpu.memory_space<vmem>>, vector<4x16xbf16>
      tpu.vector_store %arg8[%c24_95, %c192], %115 {strides = array<i32>} : memref<36x256xbf16, #tpu.memory_space<vmem>>, vector<4x16xbf16>,
      %c0_96 = arith.constant 0 : index
      %c0_97 = arith.constant 0 : index
      %c15 = arith.constant 15 : index
      %c0_98 = arith.constant 0 : index
      %c0_99 = arith.constant 0 : index
      %117 = vector.load %arg2[%c0_96, %c0_97, %c15, %c0_98, %c0_99] : memref<1x1x18x4x18xbf16, #tpu.memory_space<vmem>>, vector<1x1x1x4x16xbf16>
      %118 = vector.shape_cast %117 : vector<1x1x1x4x16xbf16> to vector<4x16xbf16>
      %c0_100 = arith.constant 0 : index
      %c0_101 = arith.constant 0 : index
      %c0_102 = arith.constant 0 : index
      %119 = vector.load %arg4[%c0_100, %c0_101, %c0_102] : memref<3x1x16xbf16, #tpu.memory_space<vmem>>, vector<1x1x16xbf16>
      %120 = vector.shape_cast %119 : vector<1x1x16xbf16> to vector<1x16xbf16>
      %121 = vector.broadcast %120 : vector<1x16xbf16> to vector<4x16xbf16>
      %122 = arith.mulf %118, %121 : vector<4x16xbf16>
      %c24_103 = arith.constant 24 : index
      %c208 = arith.constant 208 : index
      %123 = vector.load %arg8[%c24_103, %c208] : memref<36x256xbf16, #tpu.memory_space<vmem>>, vector<4x16xbf16>
      tpu.vector_store %arg8[%c24_103, %c208], %122 {strides = array<i32>} : memref<36x256xbf16, #tpu.memory_space<vmem>>, vector<4x16xbf16>,
      %c0_104 = arith.constant 0 : index
      %c0_105 = arith.constant 0 : index
      %c16 = arith.constant 16 : index
      %c0_106 = arith.constant 0 : index
      %c0_107 = arith.constant 0 : index
      %124 = vector.load %arg2[%c0_104, %c0_105, %c16, %c0_106, %c0_107] : memref<1x1x18x4x18xbf16, #tpu.memory_space<vmem>>, vector<1x1x1x4x16xbf16>
      %125 = vector.shape_cast %124 : vector<1x1x1x4x16xbf16> to vector<4x16xbf16>
      %c0_108 = arith.constant 0 : index
      %c0_109 = arith.constant 0 : index
      %c0_110 = arith.constant 0 : index
      %126 = vector.load %arg4[%c0_108, %c0_109, %c0_110] : memref<3x1x16xbf16, #tpu.memory_space<vmem>>, vector<1x1x16xbf16>
      %127 = vector.shape_cast %126 : vector<1x1x16xbf16> to vector<1x16xbf16>
      %128 = vector.broadcast %127 : vector<1x16xbf16> to vector<4x16xbf16>
      %129 = arith.mulf %125, %128 : vector<4x16xbf16>
      %c24_111 = arith.constant 24 : index
      %c224 = arith.constant 224 : index
      %130 = vector.load %arg8[%c24_111, %c224] : memref<36x256xbf16, #tpu.memory_space<vmem>>, vector<4x16xbf16>
      tpu.vector_store %arg8[%c24_111, %c224], %129 {strides = array<i32>} : memref<36x256xbf16, #tpu.memory_space<vmem>>, vector<4x16xbf16>,
      %c0_112 = arith.constant 0 : index
      %c0_113 = arith.constant 0 : index
      %c17 = arith.constant 17 : index
      %c0_114 = arith.constant 0 : index
      %c0_115 = arith.constant 0 : index
      %131 = vector.load %arg2[%c0_112, %c0_113, %c17, %c0_114, %c0_115] : memref<1x1x18x4x18xbf16, #tpu.memory_space<vmem>>, vector<1x1x1x4x16xbf16>
      %132 = vector.shape_cast %131 : vector<1x1x1x4x16xbf16> to vector<4x16xbf16>
      %c0_116 = arith.constant 0 : index
      %c0_117 = arith.constant 0 : index
      %c0_118 = arith.constant 0 : index
      %133 = vector.load %arg4[%c0_116, %c0_117, %c0_118] : memref<3x1x16xbf16, #tpu.memory_space<vmem>>, vector<1x1x16xbf16>
      %134 = vector.shape_cast %133 : vector<1x1x16xbf16> to vector<1x16xbf16>
      %135 = vector.broadcast %134 : vector<1x16xbf16> to vector<4x16xbf16>
      %136 = arith.mulf %132, %135 : vector<4x16xbf16>
      %c24_119 = arith.constant 24 : index
      %c240 = arith.constant 240 : index
      %137 = vector.load %arg8[%c24_119, %c240] : memref<36x256xbf16, #tpu.memory_space<vmem>>, vector<4x16xbf16>
      tpu.vector_store %arg8[%c24_119, %c240], %136 {strides = array<i32>} : memref<36x256xbf16, #tpu.memory_space<vmem>>, vector<4x16xbf16>,
      %c0_120 = arith.constant 0 : index
      %c0_121 = arith.constant 0 : index
      %c10_122 = arith.constant 10 : index
      %c0_123 = arith.constant 0 : index
      %c1 = arith.constant 1 : index
      %138 = vector.load %arg2[%c0_120, %c0_121, %c10_122, %c0_123, %c1] : memref<1x1x18x4x18xbf16, #tpu.memory_space<vmem>>, vector<1x1x1x4x16xbf16>
      %139 = vector.shape_cast %138 : vector<1x1x1x4x16xbf16> to vector<4x16xbf16>
      %c28 = arith.constant 28 : index
      %c128_124 = arith.constant 128 : index
      %140 = vector.load %arg8[%c28, %c128_124] : memref<36x256xbf16, #tpu.memory_space<vmem>>, vector<4x16xbf16>
      tpu.vector_store %arg8[%c28, %c128_124], %139 {strides = array<i32>} : memref<36x256xbf16, #tpu.memory_space<vmem>>, vector<4x16xbf16>,
      %c0_125 = arith.constant 0 : index
      %c0_126 = arith.constant 0 : index
      %c11_127 = arith.constant 11 : index
      %c0_128 = arith.constant 0 : index
      %c1_129 = arith.constant 1 : index
      %141 = vector.load %arg2[%c0_125, %c0_126, %c11_127, %c0_128, %c1_129] : memref<1x1x18x4x18xbf16, #tpu.memory_space<vmem>>, vector<1x1x1x4x16xbf16>
      %142 = vector.shape_cast %141 : vector<1x1x1x4x16xbf16> to vector<4x16xbf16>
      %c28_130 = arith.constant 28 : index
      %c144_131 = arith.constant 144 : index
      %143 = vector.load %arg8[%c28_130, %c144_131] : memref<36x256xbf16, #tpu.memory_space<vmem>>, vector<4x16xbf16>
      tpu.vector_store %arg8[%c28_130, %c144_131], %142 {strides = array<i32>} : memref<36x256xbf16, #tpu.memory_space<vmem>>, vector<4x16xbf16>,
      %c0_132 = arith.constant 0 : index
      %c0_133 = arith.constant 0 : index
      %c12_134 = arith.constant 12 : index
      %c0_135 = arith.constant 0 : index
      %c1_136 = arith.constant 1 : index
      %144 = vector.load %arg2[%c0_132, %c0_133, %c12_134, %c0_135, %c1_136] : memref<1x1x18x4x18xbf16, #tpu.memory_space<vmem>>, vector<1x1x1x4x16xbf16>
      %145 = vector.shape_cast %144 : vector<1x1x1x4x16xbf16> to vector<4x16xbf16>
      %c28_137 = arith.constant 28 : index
      %c160_138 = arith.constant 160 : index
      %146 = vector.load %arg8[%c28_137, %c160_138] : memref<36x256xbf16, #tpu.memory_space<vmem>>, vector<4x16xbf16>
      tpu.vector_store %arg8[%c28_137, %c160_138], %145 {strides = array<i32>} : memref<36x256xbf16, #tpu.memory_space<vmem>>, vector<4x16xbf16>,
      %c0_139 = arith.constant 0 : index
      %c0_140 = arith.constant 0 : index
      %c13_141 = arith.constant 13 : index
      %c0_142 = arith.constant 0 : index
      %c1_143 = arith.constant 1 : index
      %147 = vector.load %arg2[%c0_139, %c0_140, %c13_141, %c0_142, %c1_143] : memref<1x1x18x4x18xbf16, #tpu.memory_space<vmem>>, vector<1x1x1x4x16xbf16>
      %148 = vector.shape_cast %147 : vector<1x1x1x4x16xbf16> to vector<4x16xbf16>
      %c28_144 = arith.constant 28 : index
      %c176_145 = arith.constant 176 : index
      %149 = vector.load %arg8[%c28_144, %c176_145] : memref<36x256xbf16, #tpu.memory_space<vmem>>, vector<4x16xbf16>
      tpu.vector_store %arg8[%c28_144, %c176_145], %148 {strides = array<i32>} : memref<36x256xbf16, #tpu.memory_space<vmem>>, vector<4x16xbf16>,
      %c0_146 = arith.constant 0 : index
      %c0_147 = arith.constant 0 : index
      %c14_148 = arith.constant 14 : index
      %c0_149 = arith.constant 0 : index
      %c1_150 = arith.constant 1 : index
      %150 = vector.load %arg2[%c0_146, %c0_147, %c14_148, %c0_149, %c1_150] : memref<1x1x18x4x18xbf16, #tpu.memory_space<vmem>>, vector<1x1x1x4x16xbf16>
      %151 = vector.shape_cast %150 : vector<1x1x1x4x16xbf16> to vector<4x16xbf16>
      %c28_151 = arith.constant 28 : index
      %c192_152 = arith.constant 192 : index
      %152 = vector.load %arg8[%c28_151, %c192_152] : memref<36x256xbf16, #tpu.memory_space<vmem>>, vector<4x16xbf16>
      tpu.vector_store %arg8[%c28_151, %c192_152], %151 {strides = array<i32>} : memref<36x256xbf16, #tpu.memory_space<vmem>>, vector<4x16xbf16>,
      %c0_153 = arith.constant 0 : index
      %c0_154 = arith.constant 0 : index
      %c15_155 = arith.constant 15 : index
      %c0_156 = arith.constant 0 : index
      %c1_157 = arith.constant 1 : index
      %153 = vector.load %arg2[%c0_153, %c0_154, %c15_155, %c0_156, %c1_157] : memref<1x1x18x4x18xbf16, #tpu.memory_space<vmem>>, vector<1x1x1x4x16xbf16>
      %154 = vector.shape_cast %153 : vector<1x1x1x4x16xbf16> to vector<4x16xbf16>
      %c28_158 = arith.constant 28 : index
      %c208_159 = arith.constant 208 : index
      %155 = vector.load %arg8[%c28_158, %c208_159] : memref<36x256xbf16, #tpu.memory_space<vmem>>, vector<4x16xbf16>
      tpu.vector_store %arg8[%c28_158, %c208_159], %154 {strides = array<i32>} : memref<36x256xbf16, #tpu.memory_space<vmem>>, vector<4x16xbf16>,
      %c0_160 = arith.constant 0 : index
      %c0_161 = arith.constant 0 : index
      %c16_162 = arith.constant 16 : index
      %c0_163 = arith.constant 0 : index
      %c1_164 = arith.constant 1 : index
      %156 = vector.load %arg2[%c0_160, %c0_161, %c16_162, %c0_163, %c1_164] : memref<1x1x18x4x18xbf16, #tpu.memory_space<vmem>>, vector<1x1x1x4x16xbf16>
      %157 = vector.shape_cast %156 : vector<1x1x1x4x16xbf16> to vector<4x16xbf16>
      %c28_165 = arith.constant 28 : index
      %c224_166 = arith.constant 224 : index
      %158 = vector.load %arg8[%c28_165, %c224_166] : memref<36x256xbf16, #tpu.memory_space<vmem>>, vector<4x16xbf16>
      tpu.vector_store %arg8[%c28_165, %c224_166], %157 {strides = array<i32>} : memref<36x256xbf16, #tpu.memory_space<vmem>>, vector<4x16xbf16>,
      %c0_167 = arith.constant 0 : index
      %c0_168 = arith.constant 0 : index
      %c17_169 = arith.constant 17 : index
      %c0_170 = arith.constant 0 : index
      %c1_171 = arith.constant 1 : index
      %159 = vector.load %arg2[%c0_167, %c0_168, %c17_169, %c0_170, %c1_171] : memref<1x1x18x4x18xbf16, #tpu.memory_space<vmem>>, vector<1x1x1x4x16xbf16>
      %160 = vector.shape_cast %159 : vector<1x1x1x4x16xbf16> to vector<4x16xbf16>
      %c28_172 = arith.constant 28 : index
      %c240_173 = arith.constant 240 : index
      %161 = vector.load %arg8[%c28_172, %c240_173] : memref<36x256xbf16, #tpu.memory_space<vmem>>, vector<4x16xbf16>
      tpu.vector_store %arg8[%c28_172, %c240_173], %160 {strides = array<i32>} : memref<36x256xbf16, #tpu.memory_space<vmem>>, vector<4x16xbf16>,
      %c0_174 = arith.constant 0 : index
      %c0_175 = arith.constant 0 : index
      %c10_176 = arith.constant 10 : index
      %c0_177 = arith.constant 0 : index
      %c2 = arith.constant 2 : index
      %162 = vector.load %arg2[%c0_174, %c0_175, %c10_176, %c0_177, %c2] : memref<1x1x18x4x18xbf16, #tpu.memory_space<vmem>>, vector<1x1x1x4x16xbf16>
      %163 = vector.shape_cast %162 : vector<1x1x1x4x16xbf16> to vector<4x16xbf16>
      %c32 = arith.constant 32 : index
      %c128_178 = arith.constant 128 : index
      %164 = vector.load %arg8[%c32, %c128_178] : memref<36x256xbf16, #tpu.memory_space<vmem>>, vector<4x16xbf16>
      tpu.vector_store %arg8[%c32, %c128_178], %163 {strides = array<i32>} : memref<36x256xbf16, #tpu.memory_space<vmem>>, vector<4x16xbf16>,
      %c0_179 = arith.constant 0 : index
      %c0_180 = arith.constant 0 : index
      %c11_181 = arith.constant 11 : index
      %c0_182 = arith.constant 0 : index
      %c2_183 = arith.constant 2 : index
      %165 = vector.load %arg2[%c0_179, %c0_180, %c11_181, %c0_182, %c2_183] : memref<1x1x18x4x18xbf16, #tpu.memory_space<vmem>>, vector<1x1x1x4x16xbf16>
      %166 = vector.shape_cast %165 : vector<1x1x1x4x16xbf16> to vector<4x16xbf16>
      %c32_184 = arith.constant 32 : index
      %c144_185 = arith.constant 144 : index
      %167 = vector.load %arg8[%c32_184, %c144_185] : memref<36x256xbf16, #tpu.memory_space<vmem>>, vector<4x16xbf16>
      tpu.vector_store %arg8[%c32_184, %c144_185], %166 {strides = array<i32>} : memref<36x256xbf16, #tpu.memory_space<vmem>>, vector<4x16xbf16>,
      %c0_186 = arith.constant 0 : index
      %c0_187 = arith.constant 0 : index
      %c12_188 = arith.constant 12 : index
      %c0_189 = arith.constant 0 : index
      %c2_190 = arith.constant 2 : index
      %168 = vector.load %arg2[%c0_186, %c0_187, %c12_188, %c0_189, %c2_190] : memref<1x1x18x4x18xbf16, #tpu.memory_space<vmem>>, vector<1x1x1x4x16xbf16>
      %169 = vector.shape_cast %168 : vector<1x1x1x4x16xbf16> to vector<4x16xbf16>
      %c32_191 = arith.constant 32 : index
      %c160_192 = arith.constant 160 : index
      %170 = vector.load %arg8[%c32_191, %c160_192] : memref<36x256xbf16, #tpu.memory_space<vmem>>, vector<4x16xbf16>
      tpu.vector_store %arg8[%c32_191, %c160_192], %169 {strides = array<i32>} : memref<36x256xbf16, #tpu.memory_space<vmem>>, vector<4x16xbf16>,
      %c0_193 = arith.constant 0 : index
      %c0_194 = arith.constant 0 : index
      %c13_195 = arith.constant 13 : index
      %c0_196 = arith.constant 0 : index
      %c2_197 = arith.constant 2 : index
      %171 = vector.load %arg2[%c0_193, %c0_194, %c13_195, %c0_196, %c2_197] : memref<1x1x18x4x18xbf16, #tpu.memory_space<vmem>>, vector<1x1x1x4x16xbf16>
      %172 = vector.shape_cast %171 : vector<1x1x1x4x16xbf16> to vector<4x16xbf16>
      %c32_198 = arith.constant 32 : index
      %c176_199 = arith.constant 176 : index
      %173 = vector.load %arg8[%c32_198, %c176_199] : memref<36x256xbf16, #tpu.memory_space<vmem>>, vector<4x16xbf16>
      tpu.vector_store %arg8[%c32_198, %c176_199], %172 {strides = array<i32>} : memref<36x256xbf16, #tpu.memory_space<vmem>>, vector<4x16xbf16>,
      %c0_200 = arith.constant 0 : index
      %c0_201 = arith.constant 0 : index
      %c14_202 = arith.constant 14 : index
      %c0_203 = arith.constant 0 : index
      %c2_204 = arith.constant 2 : index
      %174 = vector.load %arg2[%c0_200, %c0_201, %c14_202, %c0_203, %c2_204] : memref<1x1x18x4x18xbf16, #tpu.memory_space<vmem>>, vector<1x1x1x4x16xbf16>
      %175 = vector.shape_cast %174 : vector<1x1x1x4x16xbf16> to vector<4x16xbf16>
      %c32_205 = arith.constant 32 : index
      %c192_206 = arith.constant 192 : index
      %176 = vector.load %arg8[%c32_205, %c192_206] : memref<36x256xbf16, #tpu.memory_space<vmem>>, vector<4x16xbf16>
      tpu.vector_store %arg8[%c32_205, %c192_206], %175 {strides = array<i32>} : memref<36x256xbf16, #tpu.memory_space<vmem>>, vector<4x16xbf16>,
      %c0_207 = arith.constant 0 : index
      %c0_208 = arith.constant 0 : index
      %c15_209 = arith.constant 15 : index
      %c0_210 = arith.constant 0 : index
      %c2_211 = arith.constant 2 : index
      %177 = vector.load %arg2[%c0_207, %c0_208, %c15_209, %c0_210, %c2_211] : memref<1x1x18x4x18xbf16, #tpu.memory_space<vmem>>, vector<1x1x1x4x16xbf16>
      %178 = vector.shape_cast %177 : vector<1x1x1x4x16xbf16> to vector<4x16xbf16>
      %c32_212 = arith.constant 32 : index
      %c208_213 = arith.constant 208 : index
      %179 = vector.load %arg8[%c32_212, %c208_213] : memref<36x256xbf16, #tpu.memory_space<vmem>>, vector<4x16xbf16>
      tpu.vector_store %arg8[%c32_212, %c208_213], %178 {strides = array<i32>} : memref<36x256xbf16, #tpu.memory_space<vmem>>, vector<4x16xbf16>,
      %c0_214 = arith.constant 0 : index
      %c0_215 = arith.constant 0 : index
      %c16_216 = arith.constant 16 : index
      %c0_217 = arith.constant 0 : index
      %c2_218 = arith.constant 2 : index
      %180 = vector.load %arg2[%c0_214, %c0_215, %c16_216, %c0_217, %c2_218] : memref<1x1x18x4x18xbf16, #tpu.memory_space<vmem>>, vector<1x1x1x4x16xbf16>
      %181 = vector.shape_cast %180 : vector<1x1x1x4x16xbf16> to vector<4x16xbf16>
      %c32_219 = arith.constant 32 : index
      %c224_220 = arith.constant 224 : index
      %182 = vector.load %arg8[%c32_219, %c224_220] : memref<36x256xbf16, #tpu.memory_space<vmem>>, vector<4x16xbf16>
      tpu.vector_store %arg8[%c32_219, %c224_220], %181 {strides = array<i32>} : memref<36x256xbf16, #tpu.memory_space<vmem>>, vector<4x16xbf16>,
      %c0_221 = arith.constant 0 : index
      %c0_222 = arith.constant 0 : index
      %c17_223 = arith.constant 17 : index
      %c0_224 = arith.constant 0 : index
      %c2_225 = arith.constant 2 : index
      %183 = vector.load %arg2[%c0_221, %c0_222, %c17_223, %c0_224, %c2_225] : memref<1x1x18x4x18xbf16, #tpu.memory_space<vmem>>, vector<1x1x1x4x16xbf16>
      %184 = vector.shape_cast %183 : vector<1x1x1x4x16xbf16> to vector<4x16xbf16>
      %c32_226 = arith.constant 32 : index
      %c240_227 = arith.constant 240 : index
      %185 = vector.load %arg8[%c32_226, %c240_227] : memref<36x256xbf16, #tpu.memory_space<vmem>>, vector<4x16xbf16>
      tpu.vector_store %arg8[%c32_226, %c240_227], %184 {strides = array<i32>} : memref<36x256xbf16, #tpu.memory_space<vmem>>, vector<4x16xbf16>,
    } else {
    }
    %true_39 = arith.constant true
    %63 = arith.xori %60, %true_39 : i1
    %64 = arith.extui %63 : i1 to i32
    %c0_i32_40 = arith.constant 0 : i32
    %65 = arith.cmpi ne, %64, %c0_i32_40 : i32
    scf.if %65 {
      %cst_57 = arith.constant 0.000000e+00 : bf16
      %82 = vector.broadcast %cst_57 : bf16 to vector<4x128xbf16>
      %c24 = arith.constant 24 : index
      %c128 = arith.constant 128 : index
      %83 = vector.load %arg8[%c24, %c128] : memref<36x256xbf16, #tpu.memory_space<vmem>>, vector<4x128xbf16>
      tpu.vector_store %arg8[%c24, %c128], %82 {strides = array<i32>} : memref<36x256xbf16, #tpu.memory_space<vmem>>, vector<4x128xbf16>,
      %cst_58 = arith.constant 0.000000e+00 : bf16
      %84 = vector.broadcast %cst_58 : bf16 to vector<4x128xbf16>
      %c28 = arith.constant 28 : index
      %c128_59 = arith.constant 128 : index
      %85 = vector.load %arg8[%c28, %c128_59] : memref<36x256xbf16, #tpu.memory_space<vmem>>, vector<4x128xbf16>
      tpu.vector_store %arg8[%c28, %c128_59], %84 {strides = array<i32>} : memref<36x256xbf16, #tpu.memory_space<vmem>>, vector<4x128xbf16>,
      %cst_60 = arith.constant 0.000000e+00 : bf16
      %86 = vector.broadcast %cst_60 : bf16 to vector<4x128xbf16>
      %c32 = arith.constant 32 : index
      %c128_61 = arith.constant 128 : index
      %87 = vector.load %arg8[%c32, %c128_61] : memref<36x256xbf16, #tpu.memory_space<vmem>>, vector<4x128xbf16>
      tpu.vector_store %arg8[%c32, %c128_61], %86 {strides = array<i32>} : memref<36x256xbf16, #tpu.memory_space<vmem>>, vector<4x128xbf16>,
    } else {
    }
    %c0 = arith.constant 0 : index
    %c0_41 = arith.constant 0 : index
    %66 = vector.load %arg3[%c0, %c0_41] : memref<8x36xbf16, #tpu.memory_space<vmem>>, vector<8x36xbf16>
    %c0_42 = arith.constant 0 : index
    %c0_43 = arith.constant 0 : index
    %67 = vector.load %arg8[%c0_42, %c0_43] : memref<36x256xbf16, #tpu.memory_space<vmem>>, vector<36x256xbf16>
    %cst = arith.constant dense<0.000000e+00> : vector<8x256xf32>
    %68 = tpu.matmul %66, %67, %cst {dimension_numbers = #tpu.dot_dimension_numbers<[1], [0], [0], [1], [0, 0, 1, 1], [], []>} : vector<8x36xbf16>, vector<36x256xbf16>, vector<8x256xf32> -> vector<8x256xf32>
    %c0_44 = arith.constant 0 : index
    %c0_45 = arith.constant 0 : index
    %69 = vector.load %arg9[%c0_44, %c0_45] : memref<8x256xf32, #tpu.memory_space<vmem>>, vector<8x256xf32>
    tpu.vector_store %arg9[%c0_44, %c0_45], %68 {strides = array<i32>} : memref<8x256xf32, #tpu.memory_space<vmem>>, vector<8x256xf32>,
    %c0_46 = arith.constant 0 : index
    %c0_47 = arith.constant 0 : index
    %70 = vector.load %arg9[%c0_46, %c0_47] : memref<8x256xf32, #tpu.memory_space<vmem>>, vector<8x256xf32>
    %c0_48 = arith.constant 0 : index
    %c0_49 = arith.constant 0 : index
    %71 = vector.load %arg5[%c0_48, %c0_49] : memref<8x1xf32, #tpu.memory_space<vmem>>, vector<8x1xf32>
    %72 = vector.broadcast %71 : vector<8x1xf32> to vector<8x256xf32>
    %73 = arith.mulf %70, %72 : vector<8x256xf32>
    %c0_50 = arith.constant 0 : index
    %c0_51 = arith.constant 0 : index
    %74 = vector.load %arg6[%c0_50, %c0_51] : memref<8x1xf32, #tpu.memory_space<vmem>>, vector<8x1xf32>
    %75 = vector.broadcast %74 : vector<8x1xf32> to vector<8x256xf32>
    %76 = arith.addf %73, %75 : vector<8x256xf32>
    %cst_52 = arith.constant 0.000000e+00 : f32
    %77 = vector.broadcast %cst_52 : f32 to vector<8x256xf32>
    %78 = arith.maximumf %76, %77 : vector<8x256xf32>
    %c0_53 = arith.constant 0 : index
    %c0_54 = arith.constant 0 : index
    %c0_55 = arith.constant 0 : index
    %c0_56 = arith.constant 0 : index
    %79 = vector.load %arg7[%c0_53, %c0_54, %c0_55, %c0_56] : memref<1x1x8x256xf32, #tpu.memory_space<vmem>>, vector<1x1x8x256xf32>
    %80 = vector.shape_cast %79 : vector<1x1x8x256xf32> to vector<8x256xf32>
    %81 = vector.shape_cast %78 : vector<8x256xf32> to vector<1x1x8x256xf32>
    tpu.vector_store %arg7[%c0_53, %c0_54, %c0_55, %c0_56], %81 {strides = array<i32>} : memref<1x1x8x256xf32, #tpu.memory_space<vmem>>, vector<1x1x8x256xf32>,
    return
  }
  func.func @transform_0(%arg0: i32, %arg1: i32) -> (i32, i32, i32, i32, i32) {
    %c0_i32 = arith.constant 0 : i32
    %c0_i32_0 = arith.constant 0 : i32
    %c0_i32_1 = arith.constant 0 : i32
    %c0_i32_2 = arith.constant 0 : i32
    return %arg0, %arg1, %c0_i32, %c0_i32_0, %c0_i32_1 : i32, i32, i32, i32, i32
  }
  func.func @transform_1(%arg0: i32, %arg1: i32) -> (i32, i32) {
    %c0_i32 = arith.constant 0 : i32
    %c0_i32_0 = arith.constant 0 : i32
    %c0_i32_1 = arith.constant 0 : i32
    return %c0_i32, %c0_i32_0 : i32, i32
  }
  func.func @transform_2(%arg0: i32, %arg1: i32) -> (i32, i32, i32) {
    %c0_i32 = arith.constant 0 : i32
    %c0_i32_0 = arith.constant 0 : i32
    %c0_i32_1 = arith.constant 0 : i32
    %c0_i32_2 = arith.constant 0 : i32
    return %c0_i32, %c0_i32_0, %c0_i32_1 : i32, i32, i32
  }
  func.func @transform_3(%arg0: i32, %arg1: i32) -> (i32, i32) {
    %c0_i32 = arith.constant 0 : i32
    %c0_i32_0 = arith.constant 0 : i32
    %c0_i32_1 = arith.constant 0 : i32
    return %c0_i32, %c0_i32_0 : i32, i32
  }
  func.func @transform_4(%arg0: i32, %arg1: i32) -> (i32, i32) {
    %c0_i32 = arith.constant 0 : i32
    %c0_i32_0 = arith.constant 0 : i32
    %c0_i32_1 = arith.constant 0 : i32
    return %c0_i32, %c0_i32_0 : i32, i32
  }
  func.func @transform_5(%arg0: i32, %arg1: i32) -> (i32, i32, i32, i32) {
    %c0_i32 = arith.constant 0 : i32
    %c0_i32_0 = arith.constant 0 : i32
    %c0_i32_1 = arith.constant 0 : i32
    return %arg0, %arg1, %c0_i32, %c0_i32_0 : i32, i32, i32, i32
  }
}

</mosaic_0001>

<bundles_post_ra>
// kernel: tl_conv_forward.1
= control target key start
LH: loop header
LB: loop body
LE: loop exit
PB: predicated region body
PF: predicated region fallthrough
CT: control target
= control target key end

     0   :  { %s3387_s18 = smov 0   ;;  %s3389_s19 = smov 0   ;;  %s4072_s0 = inlined_call_operand.vmem [shape: bf16[2,1,18,4,18], index: 0, kind: input, shape index: {}]   ;;  %s4073_s1 = inlined_call_operand.vmem [shape: bf16[8,36], index: 1, kind: input, shape index: {}]   ;;  %s4074_s2 = inlined_call_operand.vmem [shape: bf16[3,1,16], index: 2, kind: input, shape index: {}]   ;;  %s4075_s3 = inlined_call_operand.vmem [shape: f32[8,1], index: 3, kind: input, shape index: {}]   ;;  %s4076_s4 = inlined_call_operand.vmem [shape: f32[8,1], index: 4, kind: input, shape index: {}]   ;;  %s4077_s5 = inlined_call_operand.vmem [shape: f32[2,1,8,256], index: 5, kind: output, shape index: {}]  }
   0x1   :  { %s3391_s20 = smov 0  }
   0x2 LB: > { %s27_s21 = sadd.s32 1, %s3326_s19  ;;  %p3006_p0 = scmp.ge.s32.totalorder %s3330_s20, 1  ;;  %s3330_s20 = sphi %s3391_s20, %s15_s20   ;;  %s3326_s19 = sphi %s3389_s19, %s4085_s19   ;;  %s3322_s18 = sphi %s3387_s18, %s4084_s18  }
   0x3   : > { %p29_p1 = scmp.ge.s32.totalorder %s27_s21, 2  ;;  %p207_p2 = scmp.lt.s32.totalorder %s3330_s20, 3 }
   0x5   : > { %s4087_s21 = smov (%p29_p1, %s27_s21), 0  ;;  %p208_p3 = pnand %p3006_p0, %p207_p2 }
   0x6   : > { %p243_p4 = scmp.lt.s32.totalorder (!%p208_p3), %s3322_s18, 1  ;;  %v692_v0 = vlaneseq (!%p208_p3)  ;;  %v701_v1 = vld [vmem:[%s4074_s2] sm:$0x1] (!%p208_p3)  ;;  %v3332_v2 = vmov (!%p208_p3), 1983009808   ;;  %s3333_s13 = smov (!%p208_p3), 126  }
   0x7   : > { %211 = sbr.rel (%p208_p3) target bundleno = 596 (0x254), region = 40  ;;  %v712_v3 = vunpack.c.l.s4 (!%p208_p3), %v3332_v2  ;;  %v1564_v4 = vld [vmem:[%s4074_s2] sm:$0x1] (!%p208_p3)  ;;  %v703_v7 = vpack.i.b16 (!%p208_p3), %v701_v1, %v701_v1  ;;  %s3334_s14 = smov (!%p208_p3), 14   ;;  %vm697_vm0 = vcmask (!%p208_p3), 123904   ;;  %vm880_vm1 = vcmask (!%p208_p3), 125954  }
   0x8   : > { %v725_v5 = vld [vmem:[%s4074_s2] sm:$0x1] (!%p208_p3)  ;;  %v693_v6 = vshrl.u32 (!%p208_p3), %v692_v0, 7  ;;  %v1566_v10 = vpack.i.b16 (!%p208_p3), %v1564_v4, %v1564_v4  ;;  %s3335_s15 = smov (!%p208_p3), 16   ;;  %s3336_s22 = smov (!%p208_p3), 127   ;;  %vm721_vm2 = vcmask (!%p208_p3), 255104  }
   0x9   : > { %v1129_v8 = vld [vmem:[%s4074_s2] sm:$0x1] (!%p208_p3)  ;;  %v713_v9 = vunpack.c.0.s8 (!%p208_p3), %v712_v3  ;;  %v727_v12 = vpack.i.b16 (!%p208_p3), %v725_v5, %v725_v5  ;;  %s3337_s23 = smov (!%p208_p3), 15   ;;  %s3338_s28 = smov (!%p208_p3), 32   ;;  %vm895_vm3 = vcmask (!%p208_p3), 257154   ;;  %vm745_vm4 = vcmask (!%p208_p3), 386304  }
   0xa   : > { %v3420_v11 = vsub.s32 (!%p208_p3), 0, %v693_v6  ;;  %v1131_v13 = vpack.i.b16 (!%p208_p3), %v1129_v8, %v1129_v8  ;;  %v1154_v14 = vld [vmem:[%s4074_s2] sm:$0x1] (!%p208_p3)  ;;  %s3339_s8 = smov (!%p208_p3), 31   ;;  %s3340_s9 = smov (!%p208_p3), 30   ;;  %vm910_vm5 = vcmask (!%p208_p3), 388354  }
   0xb   : > { %v3431_v16 = vsub.s32 (!%p208_p3), %v713_v9, %v693_v6  ;;  %v1589_v17 = vld [vmem:[%s4074_s2] sm:$0x1] (!%p208_p3)  ;;  %v1156_v21 = vpack.i.b16 (!%p208_p3), %v1154_v14, %v1154_v14  ;;  %s3341_s16 = smov (!%p208_p3), 48   ;;  %s3342_s17 = smov (!%p208_p3), 46   ;;  %vm769_vm6 = vcmask (!%p208_p3), 517504   ;;  %vm925_vm7 = vcmask (!%p208_p3), 519554  }
   0xc   : > { %v708_v15 = vrot.slane (!%p208_p3), %v703_v7, %v3420_v11  ;;  %v1571_v20 = vrot.slane (!%p208_p3), %v1566_v10, %v3420_v11  ;;  %v732_v24 = vrot.slane (!%p208_p3), %v727_v12, %v3420_v11  ;;  %v1136_v25 = vrot.slane (!%p208_p3), %v1131_v13, %v3420_v11  ;;  %v749_v40 = vld [vmem:[%s4074_s2] sm:$0x1] (!%p208_p3)  ;;  %s3343_s24 = smov (!%p208_p3), 47   ;;  %s3344_s25 = smov (!%p208_p3), 63  }
   0xd   : > { %v1161_v34 = vrot.slane (!%p208_p3), %v1156_v21, %v3420_v11  ;;  %v1591_v35 = vpack.i.b16 (!%p208_p3), %v1589_v17, %v1589_v17  ;;  %v751_v44 = vpack.i.b16 (!%p208_p3), %v749_v40, %v749_v40  ;;  %v1614_v49 = vld [vmem:[%s4074_s2] sm:$0x1] (!%p208_p3)  ;;  %s3345_s26 = smov (!%p208_p3), 64   ;;  %s3347_s27 = smov (!%p208_p3), 80   ;;  %vm940_vm8 = vcmask (!%p208_p3), 650754  }
   0xe   : > { %s4089_s18 = smov (!%p243_p4, %s3322_s18), 1  ;;  %v1179_v50 = vld [vmem:[%s4074_s2] sm:$0x1]  ;;  %v1616_v54 = vpack.i.b16 %v1614_v49, %v1614_v49  ;;  %s4080_s7 = smov 78   ;;  %vm793_vm9 = vcmask 648704   ;;  %vm817_vm10 = vcmask 779904  }
   0xf   : > { %s3210_s30 = smul.u32 36, %s4089_s18  ;;  %v1596_v45 = vrot.slane %v1591_v35, %v3420_v11  ;;  %v756_v53 = vrot.slane %v751_v44, %v3420_v11  ;;  %v1181_v55 = vpack.i.b16 %v1179_v50, %v1179_v50  ;;  %v773_v62 = vld [vmem:[%s4074_s2] sm:$0x1]  ;;  %s3350_s29 = smov 95   ;;  %vm955_vm11 = vcmask 781954  }
  0x10   : > { %v1621_v61 = vrot.slane %v1616_v54, %v3420_v11  ;;  %v1204_v63 = vld [vmem:[%s4074_s2] sm:$0x1]  ;;  %v775_v7 = vpack.i.b16 %v773_v62, %v773_v62  ;;  %s3354_s11 = smov 112   ;;  %vm970_vm12 = vcmask 913154   ;;  %vm841_vm13 = vcmask 911104  }
  0x11   : > { %s3428_s10 = scalar_lea.vmem %s4072_s0, %s3210_s30  ;;  %v1186_v3 = vrot.slane %v1181_v55, %v3420_v11  ;;  %v1206_v8 = vpack.i.b16 %v1204_v63, %v1204_v63  ;;  %v1639_v17 = vld [vmem:[%s4074_s2] sm:$0x1]  ;;  %s3346_s30 = smov 62   ;;  %vm865_vm14 = vcmask 1042304   ;;  %vm985_vm15 = vcmask 1044354  }
  0x12   : > { %v3056_v18 = vld.sshfl [vmem:[%s3428_s10 + $0x10] sm:$0x3 pattern:$0x76325410]  ;;  %v3040_v19 = vld [vmem:[%s3428_s10 + $0x12] sm:$0x3]  ;;  %v780_v14 = vrot.slane %v775_v7, %v3420_v11 }
  0x13   : > { %996 = vrot.lane.b32.xlu0 %v3056_v18, %s3333_s13  ;;  %v3441_v22 = vld.sshfl [vmem:[%s3428_s10 + $0x12] sm:$0x3 pattern:$0x76325410]  ;;  %v709_v23 = vmul.bf16 %v3040_v19, %v708_v15  ;;  %v3104_v29 = vld [vmem:[%s3428_s10 + $0x14] sm:$0x3]  ;;  %v1211_v15 = vrot.slane %v1206_v8, %v3420_v11 }
  0x14   : > { %v3262_v26 = vld [vmem:[%s3428_s10 + $0x10] ss:$0 sps:$4 sm:$0x33]   ;;  %v3263_v28 = vld [vmem:[%s3428_s10 + $0x12] ss:$0 sps:$4 sm:$0x33]   ;;  %v1572_v31 = vmul.bf16 %v3104_v29, %v1571_v20 }
  0x15   : > { %v717_v27 = vrot.slane %v709_v23, %v3431_v16  ;;  %v876_v30 = vrot.slane %v3262_v26, %v3431_v16  ;;  %v3041_v32 = vld [vmem:[%s3428_s10 + $0x14] sm:$0x3]  ;;  %v3072_v33 = vld [vmem:[%s3428_s10 + $0x4] sm:$0x3]  ;;  %v891_v36 = vrot.slane %v3263_v28, %v3431_v16  ;;  %v3073_v39 = vld [vmem:[%s3428_s10 + $0x6] sm:$0x3]  ;;  %v1641_v26 = vpack.i.b16 %v1639_v17, %v1639_v17 }
  0x16   : > { %v733_v37 = vmul.bf16 %v3041_v32, %v732_v24  ;;  %v1137_v38 = vmul.bf16 %v3072_v33, %v1136_v25  ;;  %v1574_v41 = vcombine.low %v1572_v31, %v1572_v31  ;;  %v3264_v42 = vld [vmem:[%s3428_s10 + $0x14] ss:$0 sps:$4 sm:$0x33]   ;;  %v1162_v43 = vmul.bf16 %v3073_v39, %v1161_v34  ;;  %v3105_v51 = vld [vmem:[%s3428_s10 + $0x16] sm:$0x3] }
  0x17   : > { %1009 = vrot.lane.b32.xlu0 %v3441_v22, %s3334_s14  ;;  %718 = vrot.lane.b32.xlu1 %v717_v27, %s3335_s15  ;;  %v906_v52 = vrot.slane %v3264_v42, %v3431_v16  ;;  %v3042_v58 = vld [vmem:[%s3428_s10 + $0x16] sm:$0x3]  ;;  %v1597_v59 = vmul.bf16 %v3105_v51, %v1596_v45  ;;  %v3491_v1 = vld.sshfl [vmem:[%s3428_s10 + $0x14] sm:$0x3 pattern:$0x76325410]  ;;  %v1646_v31 = vrot.slane %v1641_v26, %v3420_v11 }
  0x18   : > { %v1581_v46 = vrot.slane %v1574_v41, %v3431_v16  ;;  %v741_v47 = vrot.slane %v733_v37, %v3431_v16  ;;  %v1139_v48 = vcombine.low %v1137_v38, %v1137_v38  ;;  %v1164_v57 = vcombine.low %v1162_v43, %v1162_v43  ;;  %v3106_v4 = vld [vmem:[%s3428_s10 + $0x18] sm:$0x3]  ;;  %v3074_v5 = vld [vmem:[%s3428_s10 + $0x8] sm:$0x3]  ;;  %v3075_v24 = vld [vmem:[%s3428_s10 + $0xa] sm:$0x3] }
  0x19   : > { %v757_v60 = vmul.bf16 %v3042_v58, %v756_v53  ;;  %v1599_v2 = vcombine.low %v1597_v59, %v1597_v59  ;;  %v3265_v10 = vld [vmem:[%s3428_s10 + $0x16] ss:$0 sps:$4 sm:$0x33]   ;;  %v1622_v12 = vmul.bf16 %v3106_v4, %v1621_v61  ;;  %v1187_v13 = vmul.bf16 %v3074_v5, %v1186_v3  ;;  %v3043_v21 = vld [vmem:[%s3428_s10 + $0x18] sm:$0x3] }
  0x1a   : > { %v1146_v56 = vrot.slane %v1139_v48, %v3431_v16  ;;  %v1171_v0 = vrot.slane %v1164_v57, %v3431_v16  ;;  %v921_v18 = vrot.slane %v3265_v10, %v3431_v16  ;;  %v3512_v23 = vld.sshfl [vmem:[%s3428_s10 + $0x16] sm:$0x3 pattern:$0x76325410]  ;;  %v781_v25 = vmul.bf16 %v3043_v21, %v780_v14  ;;  %v3107_v35 = vld [vmem:[%s3428_s10 + $0x1a] sm:$0x3] }
  0x1b   : > { %877 = vrot.lane.b32.xlu0 %v876_v30, %s3336_s22  ;;  %892 = vrot.lane.b32.xlu1 %v891_v36, %s3337_s23  ;;  %v765_v6 = vrot.slane %v757_v60, %v3431_v16  ;;  %v1606_v9 = vrot.slane %v1599_v2, %v3431_v16  ;;  %v1624_v19 = vcombine.low %v1622_v12, %v1622_v12  ;;  %v3266_v29 = vld [vmem:[%s3428_s10 + $0x18] ss:$0 sps:$4 sm:$0x33]   ;;  %v3267_v36 = vld [vmem:[%s3428_s10 + $0x2] ss:$0 sps:$4 sm:$0x33]  }
  0x1c   : > { %v1189_v20 = vcombine.low %v1187_v13, %v1187_v13  ;;  %v1212_v30 = vmul.bf16 %v3075_v24, %v1211_v15  ;;  %v936_v32 = vrot.slane %v3266_v29, %v3431_v16  ;;  %v789_v33 = vrot.slane %v781_v25, %v3431_v16  ;;  %v797_v39 = vld [vmem:[%s4074_s2] sm:$0x1]  ;;  %v3535_v40 = vld.sshfl [vmem:[%s3428_s10 + $0x18] sm:$0x3 pattern:$0x76325410] }
  0x1d   : > { %v1631_v27 = vrot.slane %v1624_v19, %v3431_v16  ;;  %v1647_v38 = vmul.bf16 %v3107_v35, %v1646_v31  ;;  %v799_v41 = vpack.i.b16 %v797_v39, %v797_v39  ;;  %v1423_v42 = vrot.slane %v3267_v36, %v3431_v16  ;;  %v3080_v43 = vld.sshfl [vmem:[%s3428_s10 + $0x2] sm:$0x3 pattern:$0x76325410]  ;;  %v688_v45 = vld [vmem:[%s4074_s2] sm:$0x1] }
  0x1e   : > { %v1196_v28 = vrot.slane %v1189_v20, %v3431_v16  ;;  %v1214_v34 = vcombine.low %v1212_v30, %v1212_v30  ;;  %v690_v48 = vpack.i.b16 %v688_v45, %v688_v45  ;;  %v3039_v49 = vld [vmem:[%s3428_s10 + $0x10] sm:$0x3]  ;;  %v3269_v50 = vld [vmem:[%s3428_s10 + $0x12] ss:$0 sps:$4 sm:$0x33]  }
  0x1f   : > { %1582 = vrot.lane.b32.xlu0 %v1581_v46, %s3335_s15  ;;  %742 = vrot.lane.b32.xlu1 %v741_v47, %s3338_s28  ;;  %v1649_v44 = vcombine.low %v1647_v38, %v1647_v38  ;;  %v3268_v46 = vld [vmem:[%s3428_s10 + $0x4] ss:$0 sps:$4 sm:$0x33]   ;;  %v1229_v47 = vld [vmem:[%s4074_s2] sm:$0x1]  ;;  %v804_v51 = vrot.slane %v799_v41, %v3420_v11  ;;  %v1858_v63 = vrot.slane %v3269_v50, %v3431_v16 }
  0x20   : > { %v1221_v37 = vrot.slane %v1214_v34, %v3431_v16  ;;  %v3044_v54 = vld [vmem:[%s3428_s10 + $0x1a] sm:$0x3]  ;;  %v1231_v55 = vpack.i.b16 %v1229_v47, %v1229_v47  ;;  %v1664_v57 = vld [vmem:[%s4074_s2] sm:$0x1]  ;;  %v3103_v61 = vld [vmem:[%s3428_s10 + $0x12] sm:$0x3]  ;;  %v2164_v62 = vrot.slane %v3268_v46, %v3431_v16 }
  0x21   : > { %v1656_v53 = vrot.slane %v1649_v44, %v3431_v16  ;;  %v3270_v60 = vld [vmem:[%s3428_s10 + $0x14] ss:$0 sps:$4 sm:$0x33]   ;;  %v1106_v3 = vld [vmem:[%s4074_s2] sm:$0x1]  ;;  %v1666_v5 = vpack.i.b16 %v1664_v57, %v1664_v57 }
  0x22   : > { %v1236_v4 = vrot.slane %v1231_v55, %v3420_v11  ;;  %v3076_v7 = vld [vmem:[%s3428_s10 + $0xc] sm:$0x3]  ;;  %v2582_v13 = vrot.slane %v3270_v60, %v3431_v16  ;;  %v3271_v14 = vld [vmem:[%s3428_s10 + $0x1a] ss:$0 sps:$4 sm:$0x33]  }
  0x23   : > { %907 = vrot.lane.b32.xlu0 %v906_v52, %s3339_s8  ;;  %1147 = vrot.lane.b32.xlu1 %v1146_v56, %s3335_s15  ;;  %v695_v52 = vrot.slane %v690_v48, %v3420_v11  ;;  %v1541_v56 = vld [vmem:[%s4074_s2] sm:$0x1]  ;;  %v1671_v17 = vrot.slane %v1666_v5, %v3420_v11  ;;  %v3108_v19 = vld [vmem:[%s3428_s10 + $0x1c] sm:$0x3]  ;;  %v951_v24 = vrot.slane %v3271_v14, %v3431_v16 }
  0x24   : > { %v1543_v59 = vpack.i.b16 %v1541_v56, %v1541_v56  ;;  %v3592_v25 = vld.sshfl [vmem:[%s3428_s10 + $0x1a] sm:$0x3 pattern:$0x76325410]  ;;  %v1989_v29 = vld [vmem:[%s4074_s2] sm:$0x1] }
  0x25   : > { %v696_v58 = vmul.bf16 %v3039_v49, %v695_v52  ;;  %v3272_v30 = vld [vmem:[%s3428_s10 + $0x4] ss:$0 sps:$4 sm:$0x33]   ;;  %v1991_v34 = vpack.i.b16 %v1989_v29, %v1989_v29  ;;  %v2407_v35 = vld [vmem:[%s4074_s2] sm:$0x1] }
  0x26   : > { %v1548_v2 = vrot.slane %v1543_v59, %v3420_v11  ;;  %v3604_v31 = vld.sshfl [vmem:[%s3428_s10 + $0x4] sm:$0x3 pattern:$0x76325410]  ;;  %v1437_v36 = vrot.slane %v3272_v30, %v3431_v16  ;;  %v2409_v41 = vpack.i.b16 %v2407_v35, %v2407_v35  ;;  %v1254_v44 = vld [vmem:[%s4074_s2] sm:$0x1] }
  0x27   : > { %1172 = vrot.lane.b32.xlu0 %v1171_v0, %s3338_s28  ;;  %1022 = vrot.lane.b32.xlu1 %v3491_v1, %s3340_s9  ;;  %v805_v0 = vmul.bf16 %v3044_v54, %v804_v51  ;;  %698 = vst.msk [vmem:[#allocation2 + $0x4] sm:$0x3] %vm697_vm0, %v696_v58  ;;  %v1996_v39 = vrot.slane %v1991_v34, %v3420_v11  ;;  %v1976_v45 = vld [vmem:[%s4074_s2] sm:$0x1]  ;;  %v3135_v49 = vld [vmem:[%s3428_s10 + $0x4] sm:$0x3] }
  0x28   : > { %v1549_v8 = vmul.bf16 %v3103_v61, %v1548_v2  ;;  %v3274_v47 = vld [vmem:[%s3428_s10 + $0x6] ss:$0 sps:$4 sm:$0x33]   ;;  %v1978_v50 = vpack.i.b16 %v1976_v45, %v1976_v45  ;;  %v2414_v52 = vrot.slane %v2409_v41, %v3420_v11  ;;  %v2394_v54 = vld [vmem:[%s4074_s2] sm:$0x1] }
  0x29   : > { %v813_v12 = vrot.slane %v805_v0, %v3431_v16  ;;  %v3168_v55 = vld [vmem:[%s3428_s10 + $0x16] sm:$0x3]  ;;  %v2396_v57 = vpack.i.b16 %v2394_v54, %v2394_v54  ;;  %v3167_v58 = vld [vmem:[%s3428_s10 + $0x14] sm:$0x3]  ;;  %v2179_v59 = vrot.slane %v3274_v47, %v3431_v16  ;;  %v3077_v5 = vld [vmem:[%s3428_s10 + $0xe] sm:$0x3] }
  0x2a   : > { %v1551_v15 = vcombine.low %v1549_v8, %v1549_v8  ;;  %v1983_v56 = vrot.slane %v1978_v50, %v3420_v11  ;;  %v3275_v60 = vld [vmem:[%s3428_s10 + $0x16] ss:$0 sps:$4 sm:$0x33]   ;;  %v2415_v2 = vmul.bf16 %v3168_v55, %v2414_v52  ;;  %v1279_v45 = vld [vmem:[%s4074_s2] sm:$0x1] }
  0x2b   : > { %766 = vrot.lane.b32.xlu0 %v765_v6, %s3341_s16  ;;  %1607 = vrot.lane.b32.xlu1 %v1606_v9, %s3338_s28  ;;  %v1108_v6 = vpack.i.b16 %v1106_v3, %v1106_v3  ;;  %v3071_v9 = vld [vmem:[%s3428_s10 + $0x2] sm:$0x3]  ;;  %v3045_v3 = vld [vmem:[%s3428_s10 + $0x1c] sm:$0x3]  ;;  %v2597_v8 = vrot.slane %v3275_v60, %v3431_v16 }
  0x2c   : > { %v1558_v20 = vrot.slane %v1551_v15, %v3431_v16  ;;  %v3677_v29 = vld.sshfl [vmem:[%s3428_s10 + $0x1c] sm:$0x3 pattern:$0x76325410]  ;;  %v3046_v52 = vld [vmem:[%s3428_s10 + $0x1e] sm:$0x3] }
  0x2d   : > { %v1113_v10 = vrot.slane %v1108_v6, %v3420_v11  ;;  %v1689_v6 = vld [vmem:[%s4074_s2] sm:$0x1] }
  0x2e   : > { %1561 = vst.msk [vmem:[#allocation2 + $0xc] sm:$0xc] %vm880_vm1, %v1558_v20  ;;  %v1691_v14 = vpack.i.b16 %v1689_v6, %v1689_v6  ;;  %v2013_v20 = vld [vmem:[%s4074_s2] sm:$0x1] }
  0x2f   : > { %1035 = vrot.lane.b32.xlu0 %v3512_v23, %s3342_s17  ;;  %922 = vrot.lane.b32.xlu1 %v921_v18, %s3343_s24  ;;  %v1114_v18 = vmul.bf16 %v3071_v9, %v1113_v10  ;;  %v3276_v9 = vld [vmem:[%s3428_s10 + $0x1c] ss:$0 sps:$4 sm:$0x33]  }
  0x30   : > { %v966_v15 = vrot.slane %v3276_v9, %v3431_v16  ;;  %v2037_v9 = vld [vmem:[%s4074_s2] sm:$0x1] }
  0x31   : > { %v1116_v21 = vcombine.low %v1114_v18, %v1114_v18  ;;  %v1696_v18 = vrot.slane %v1691_v14, %v3420_v11  ;;  %v2039_v14 = vpack.i.b16 %v2037_v9, %v2037_v9 }
  0x33   : > { %1632 = vrot.lane.b32.xlu0 %v1631_v27, %s3341_s16  ;;  %1197 = vrot.lane.b32.xlu1 %v1196_v28, %s3341_s16  ;;  %v1672_v27 = vmul.bf16 %v3108_v19, %v1671_v17  ;;  %v1123_v28 = vrot.slane %v1116_v21, %v3431_v16  ;;  %v3109_v19 = vld [vmem:[%s3428_s10 + $0x1e] sm:$0x3] }
  0x35   : > { %1126 = vst.msk [vmem:[#allocation2 + $0x8] sm:$0xc] %vm880_vm1, %v1123_v28  ;;  %v2431_v28 = vld [vmem:[%s4074_s2] sm:$0x1] }
  0x36   : > { %v2433_v30 = vpack.i.b16 %v2431_v28, %v2431_v28 }
  0x37   : > { %937 = vrot.lane.b32.xlu0 %v936_v32, %s3344_s25  ;;  %790 = vrot.lane.b32.xlu1 %v789_v33, %s3345_s26  ;;  %v1674_v33 = vcombine.low %v1672_v27, %v1672_v27  ;;  %v2015_v27 = vpack.i.b16 %v2013_v20, %v2013_v20  ;;  %v3283_v20 = vld [vmem:[%s3428_s10 + $0x18] ss:$0 sps:$4 sm:$0x33]  }
  0x39   : > { %v1681_v38 = vrot.slane %v1674_v33, %v3431_v16  ;;  %v3684_v33 = vld.sshfl [vmem:[%s3428_s10 + $0x6] sm:$0x3 pattern:$0x76325410]  ;;  %v2020_v35 = vrot.slane %v2015_v27, %v3420_v11 }
  0x3b   : > { %1222 = vrot.lane.b32.xlu0 %v1221_v37, %s3345_s26  ;;  %1048 = vrot.lane.b32.xlu1 %v3535_v40, %s3346_s30  ;;  %v3273_v37 = vld [vmem:[%s3428_s10 + $0x14] ss:$0 sps:$4 sm:$0x33]  }
  0x3c   : > { %v1872_v46 = vrot.slane %v3273_v37, %v3431_v16  ;;  %v845_v37 = vld [vmem:[%s4074_s2] sm:$0x1] }
  0x3f   : > { %1424 = vrot.lane.b32.xlu0 %v1423_v42, %s3333_s13  ;;  %1311 = vrot.lane.b32.xlu1 %v3080_v43, %s3336_s22  ;;  %v821_v42 = vld [vmem:[%s4074_s2] sm:$0x1]  ;;  %v3136_v43 = vld [vmem:[%s3428_s10 + $0x6] sm:$0x3] }
  0x40   : > { %v823_v48 = vpack.i.b16 %v821_v42, %v821_v42  ;;  %v1997_v51 = vmul.bf16 %v3136_v43, %v1996_v39  ;;  %v2438_v39 = vrot.slane %v2433_v30, %v3420_v11  ;;  %v3169_v43 = vld [vmem:[%s3428_s10 + $0x18] sm:$0x3]  ;;  %v1900_v30 = vrot.slane %v3283_v20, %v3431_v16  ;;  %v3290_v20 = vld [vmem:[%s3428_s10 + $0xc] ss:$0 sps:$4 sm:$0x33]  }
  0x42   : > { %v828_v61 = vrot.slane %v823_v48, %v3420_v11  ;;  %v2005_v0 = vrot.slane %v1997_v51, %v3431_v16  ;;  %v2439_v47 = vmul.bf16 %v3169_v43, %v2438_v39  ;;  %v3279_v48 = vld [vmem:[%s3428_s10 + $0x8] ss:$0 sps:$4 sm:$0x33]   ;;  %v1281_v51 = vpack.i.b16 %v1279_v45, %v1279_v45 }
  0x43   : > { %1746 = vrot.lane.b32.xlu0 %v3441_v22, %s3336_s22  ;;  %1657 = vrot.lane.b32.xlu1 %v1656_v53, %s3345_s26  ;;  %v1237_v22 = vmul.bf16 %v3076_v7, %v1236_v4  ;;  %v1256_v53 = vpack.i.b16 %v1254_v44, %v1254_v44  ;;  %v847_v44 = vpack.i.b16 %v845_v37, %v845_v37 }
  0x44   : > { %v829_v10 = vmul.bf16 %v3045_v3, %v828_v61  ;;  %v2447_v54 = vrot.slane %v2439_v47, %v3431_v16  ;;  %v2194_v55 = vrot.slane %v3279_v48, %v3431_v16  ;;  %v3078_v61 = vld [vmem:[%s3428_s10 + $0x10] sm:$0x3] }
  0x45   : > { %v1239_v26 = vcombine.low %v1237_v22, %v1237_v22  ;;  %v1261_v4 = vrot.slane %v1256_v53, %v3420_v11  ;;  %v852_v50 = vrot.slane %v847_v44, %v3420_v11  ;;  %v1714_v53 = vld [vmem:[%s4074_s2] sm:$0x1] }
  0x46   : > { %v837_v22 = vrot.slane %v829_v10, %v3431_v16  ;;  %v1716_v60 = vpack.i.b16 %v1714_v53, %v1714_v53  ;;  %v3282_v10 = vld [vmem:[%s3428_s10 + $0x8] ss:$0 sps:$4 sm:$0x33]   ;;  %v2061_v44 = vld [vmem:[%s4074_s2] sm:$0x1] }
  0x47   : > { %2165 = vrot.lane.b32.xlu0 %v2164_v62, %s3336_s22  ;;  %1859 = vrot.lane.b32.xlu1 %v1858_v63, %s3333_s13  ;;  %v1246_v32 = vrot.slane %v1239_v26, %v3431_v16  ;;  %v1984_v62 = vmul.bf16 %v3135_v49, %v1983_v56  ;;  %v2401_v63 = vrot.slane %v2396_v57, %v3420_v11  ;;  %v3280_v56 = vld [vmem:[%s3428_s10 + $0x18] ss:$0 sps:$4 sm:$0x33]   ;;  %v3353_v57 = vmov 0  }
  0x48   : > { %v1697_v26 = vmul.bf16 %v3109_v19, %v1696_v18  ;;  %676 = vst [vmem:[#allocation2] sm:$0x3] %v3353_v57  ;;  %677 = vst [vmem:[#allocation2] sm:$0xc] %v3353_v57  ;;  %2877 = vmatprep.mubr.bf16.mxu0 %v3353_v57  ;;  %3260 = vset.pattern.permute.xlu1 %v3353_v57  ;;  %v1721_v3 = vrot.slane %v1716_v60, %v3420_v11 }
  0x49   : > { %1986 = vst.msk [vmem:[#allocation2 + $0x18] sm:$0x3] %vm697_vm0, %v1984_v62  ;;  %v2402_v7 = vmul.bf16 %v3167_v58, %v2401_v63  ;;  %678 = vst [vmem:[#allocation2 + $0x8] sm:$0x3] %v3353_v57  ;;  %v853_v58 = vmul.bf16 %v3046_v52, %v852_v50  ;;  %3261 = vset.pattern.permute.xlu0 %v3353_v57  ;;  %v2612_v62 = vrot.slane %v3280_v56, %v3431_v16 }
  0x4a   : > { %v1699_v34 = vcombine.low %v1697_v26, %v1697_v26  ;;  %v1465_v18 = vrot.slane %v3282_v10, %v3431_v16  ;;  %v3138_v26 = vld [vmem:[%s3428_s10 + $0xa] sm:$0x3]  ;;  %v2063_v50 = vpack.i.b16 %v2061_v44, %v2061_v44 }
  0x4b   : > { %814 = vrot.lane.b32.xlu0 %v813_v12, %s3347_s27  ;;  %2583 = vrot.lane.b32.xlu1 %v2582_v13, %s3336_s22  ;;  %s4078_s22 = smov 79   ;;  %2404 = vst.msk [vmem:[#allocation2 + $0x1c] sm:$0x3] %vm697_vm0, %v2402_v7  ;;  %v2423_v12 = vrot.slane %v2415_v2, %v3431_v16  ;;  %v1262_v13 = vmul.bf16 %v3077_v5, %v1261_v4  ;;  %v3110_v4 = vld [vmem:[%s3428_s10 + $0x20] sm:$0x3] }
  0x4c   : > { %v1706_v41 = vrot.slane %v1699_v34, %v3431_v16  ;;  %v861_v63 = vrot.slane %v853_v58, %v3431_v16  ;;  %v1722_v7 = vmul.bf16 %v3110_v4, %v1721_v3  ;;  %v2068_v56 = vrot.slane %v2063_v50, %v3420_v11  ;;  %v3792_v58 = vld.sshfl [vmem:[%s3428_s10 + $0xa] sm:$0x3 pattern:$0x76325410]  ;;  %v3171_v3 = vld [vmem:[%s3428_s10 + $0x1c] sm:$0x3] }
  0x4d   : > { %v1264_v17 = vcombine.low %v1262_v13, %v1262_v13 }
  0x4e   : > { %v1724_v13 = vcombine.low %v1722_v7, %v1722_v7 }
  0x4f   : > { %1061 = vrot.lane.b32.xlu0 %v3592_v25, %s4080_s7  ;;  %952 = vrot.lane.b32.xlu1 %v951_v24, %s4078_s22  ;;  %s3351_s7 = smov 96   ;;  %v1271_v21 = vrot.slane %v1264_v17, %v3431_v16  ;;  %v3277_v24 = vld [vmem:[%s3428_s10 + $0x6] ss:$0 sps:$4 sm:$0x33]   ;;  %s3352_s22 = smov 94  }
  0x50   : > { %v1731_v19 = vrot.slane %v1724_v13, %v3431_v16 }
  0x53   : > { %1325 = vrot.lane.b32.xlu0 %v3604_v31, %s3337_s23  ;;  %1247 = vrot.lane.b32.xlu1 %v1246_v32, %s3347_s27  ;;  %v1451_v32 = vrot.slane %v3277_v24, %v3431_v16 }
  0x57   : > { %1682 = vrot.lane.b32.xlu0 %v1681_v38, %s3347_s27  ;;  %1438 = vrot.lane.b32.xlu1 %v1437_v36, %s3334_s14  ;;  %v3137_v36 = vld [vmem:[%s3428_s10 + $0x8] sm:$0x3]  ;;  %v3278_v38 = vld [vmem:[%s3428_s10 + $0x16] ss:$0 sps:$4 sm:$0x33]  }
  0x58   : > { %v2021_v42 = vmul.bf16 %v3137_v36, %v2020_v35  ;;  %v3170_v36 = vld [vmem:[%s3428_s10 + $0x1a] sm:$0x3] }
  0x5a   : > { %v2029_v49 = vrot.slane %v2021_v42, %v3431_v16  ;;  %v3285_v42 = vld [vmem:[%s3428_s10 + $0x1a] ss:$0 sps:$4 sm:$0x33]  }
  0x5b   : > { %1873 = vrot.lane.b32.xlu0 %v1872_v46, %s3334_s14  ;;  %1760 = vrot.lane.b32.xlu1 %v3491_v1, %s3337_s23  ;;  %v1886_v46 = vrot.slane %v3278_v38, %v3431_v16  ;;  %v2627_v47 = vrot.slane %v3285_v42, %v3431_v16  ;;  %v3172_v42 = vld [vmem:[%s3428_s10 + $0x1e] sm:$0x3] }
  0x5f   : > { %2180 = vrot.lane.b32.xlu0 %v2179_v59, %s3337_s23  ;;  %2006 = vrot.lane.b32.xlu1 %v2005_v0, %s3335_s15  ;;  %v1286_v59 = vrot.slane %v1281_v51, %v3420_v11  ;;  %v3281_v0 = vld [vmem:[%s3428_s10 + $0x1e] ss:$0 sps:$4 sm:$0x33]   ;;  %v2479_v51 = vld [vmem:[%s4074_s2] sm:$0x1] }
  0x60   : > { %v981_v5 = vrot.slane %v3281_v0, %v3431_v16  ;;  %v2481_v57 = vpack.i.b16 %v2479_v51, %v2479_v51  ;;  %v3293_v51 = vld [vmem:[%s3428_s10 + $0x1e] ss:$0 sps:$4 sm:$0x33]  }
  0x61   : > { %v1287_v2 = vmul.bf16 %v3078_v61, %v1286_v59  ;;  %v3139_v59 = vld [vmem:[%s3428_s10 + $0xc] sm:$0x3] }
  0x62   : > { %v2069_v0 = vmul.bf16 %v3139_v59, %v2068_v56  ;;  %v3294_v56 = vld [vmem:[%s3428_s10 + $0xe] ss:$0 sps:$4 sm:$0x33]   ;;  %v2527_v59 = vld [vmem:[%s4074_s2] sm:$0x1] }
  0x63   : > { %2598 = vrot.lane.b32.xlu0 %v2597_v8, %s3337_s23  ;;  %2424 = vrot.lane.b32.xlu1 %v2423_v12, %s3335_s15  ;;  %v1289_v6 = vcombine.low %v1287_v2, %v1287_v2  ;;  %v3730_v8 = vld.sshfl [vmem:[%s3428_s10 + $0x1e] sm:$0x3 pattern:$0x76325410]  ;;  %s3355_s15 = smov 110   ;;  %s3356_s23 = smov 111   ;;  %v2486_v2 = vrot.slane %v2481_v57, %v3420_v11 }
  0x64   : > { %v2077_v7 = vrot.slane %v2069_v0, %v3431_v16  ;;  %v2529_v0 = vpack.i.b16 %v2527_v59, %v2527_v59 }
  0x65   : > { %v1296_v12 = vrot.slane %v1289_v6, %v3431_v16  ;;  %v2487_v9 = vmul.bf16 %v3171_v3, %v2486_v2  ;;  %v3886_v2 = vld.sshfl [vmem:[%s3428_s10 + $0xe] sm:$0x3 pattern:$0x76325410]  ;;  %v3141_v3 = vld [vmem:[%s3428_s10 + $0x10] sm:$0x3] }
  0x67   : > { %967 = vrot.lane.b32.xlu0 %v966_v15, %s3350_s29  ;;  %838 = vrot.lane.b32.xlu1 %v837_v22, %s3351_s7  ;;  %v3741_v15 = vld.sshfl [vmem:[%s3428_s10 + $0x8] sm:$0x3 pattern:$0x76325410]  ;;  %v2455_v22 = vld [vmem:[%s4074_s2] sm:$0x1]  ;;  %v2495_v13 = vrot.slane %v2487_v9, %v3431_v16  ;;  %v2534_v9 = vrot.slane %v2529_v0, %v3420_v11 }
  0x68   : > { %v2457_v24 = vpack.i.b16 %v2455_v22, %v2455_v22  ;;  %v2085_v22 = vld [vmem:[%s4074_s2] sm:$0x1]  ;;  %v3166_v0 = vld.sshfl [vmem:[%s3428_s10 + $0x12] sm:$0x3 pattern:$0x76325410] }
  0x6a   : > { %v2462_v35 = vrot.slane %v2457_v24, %v3420_v11  ;;  %v2503_v24 = vld [vmem:[%s4074_s2] sm:$0x1] }
  0x6b   : > { %1272 = vrot.lane.b32.xlu0 %v1271_v21, %s3351_s7  ;;  %1074 = vrot.lane.b32.xlu1 %v3677_v29, %s3352_s22  ;;  %v2044_v21 = vrot.slane %v2039_v14, %v3420_v11  ;;  %v3289_v14 = vld [vmem:[%s3428_s10 + $0x1c] ss:$0 sps:$4 sm:$0x33]  }
  0x6c   : > { %v2463_v43 = vmul.bf16 %v3170_v36, %v2462_v35  ;;  %v3140_v35 = vld [vmem:[%s3428_s10 + $0xe] sm:$0x3] }
  0x6d   : > { %v2045_v34 = vmul.bf16 %v3138_v26, %v2044_v21  ;;  %v2087_v21 = vpack.i.b16 %v2085_v22, %v2085_v22 }
  0x6e   : > { %v2471_v48 = vrot.slane %v2463_v43, %v3431_v16 }
  0x6f   : > { %1452 = vrot.lane.b32.xlu0 %v1451_v32, %s3340_s9  ;;  %1339 = vrot.lane.b32.xlu1 %v3684_v33, %s3339_s8  ;;  %v3284_v32 = vld [vmem:[%s3428_s10 + $0xa] ss:$0 sps:$4 sm:$0x33]  }
  0x70   : > { %v2209_v39 = vrot.slane %v3284_v32, %v3431_v16  ;;  %v2505_v32 = vpack.i.b16 %v2503_v24, %v2503_v24  ;;  %v2133_v24 = vld [vmem:[%s4074_s2] sm:$0x1] }
  0x73   : > { %1774 = vrot.lane.b32.xlu0 %v3512_v23, %s3339_s8  ;;  %1707 = vrot.lane.b32.xlu1 %v1706_v41, %s3351_s7  ;;  %v2053_v41 = vrot.slane %v2045_v34, %v3431_v16  ;;  %v3839_v34 = vld.sshfl [vmem:[%s3428_s10 + $0xc] sm:$0x3 pattern:$0x76325410] }
  0x77   : > { %2030 = vrot.lane.b32.xlu0 %v2029_v49, %s3338_s28  ;;  %1887 = vrot.lane.b32.xlu1 %v1886_v46, %s3340_s9  ;;  %v3286_v49 = vld [vmem:[%s3428_s10 + $0xa] ss:$0 sps:$4 sm:$0x33]  }
  0x7b   : > { %2448 = vrot.lane.b32.xlu0 %v2447_v54, %s3338_s28  ;;  %2195 = vrot.lane.b32.xlu1 %v2194_v55, %s3339_s8  ;;  %v1479_v54 = vrot.slane %v3286_v49, %v3431_v16  ;;  %v3287_v55 = vld [vmem:[%s3428_s10 + $0x1a] ss:$0 sps:$4 sm:$0x33]  }
  0x7f   : > { %862 = vrot.lane.b32.xlu0 %v861_v63, %s3354_s11  ;;  %2613 = vrot.lane.b32.xlu1 %v2612_v62, %s3339_s8  ;;  %v1914_v62 = vrot.slane %v3287_v55, %v3431_v16  ;;  %v3288_v63 = vld [vmem:[%s3428_s10 + $0xc] ss:$0 sps:$4 sm:$0x33]   ;;  %v2657_v55 = vrot.slane %v3293_v51, %v3431_v16 }
  0x80   : > { %v2224_v6 = vrot.slane %v3288_v63, %v3431_v16 }
  0x83   : > { %1087 = vrot.lane.b32.xlu0 %v3730_v8, %s3355_s15  ;;  %982 = vrot.lane.b32.xlu1 %v981_v5, %s3356_s23 }
  0x85   : > { %v997_v17 = vpop.permute.xlu0 %996 }
  0x86   : > { %999 = vst.msk [vmem:[#allocation2 + $0xc] sm:$0x3] %vm697_vm0, %v997_v17 }
  0x87   : > { %1353 = vrot.lane.b32.xlu0 %v3741_v15, %s3343_s24  ;;  %1297 = vrot.lane.b32.xlu1 %v1296_v12, %s3354_s11 }
  0x89   : > { %v1010_v27 = vpop.permute.xlu0 %1009  ;;  %v719_v28 = vpop.permute.xlu1 %718 }
  0x8a   : > { %1012 = vst.msk [vmem:[#allocation2 + $0xc] sm:$0x3] %vm721_vm2, %v1010_v27  ;;  %722 = vst.msk [vmem:[#allocation2 + $0x4] sm:$0x3] %vm721_vm2, %v719_v28 }
  0x8b   : > { %1732 = vrot.lane.b32.xlu0 %v1731_v19, %s3354_s11  ;;  %1466 = vrot.lane.b32.xlu1 %v1465_v18, %s3342_s17  ;;  %v2642_v19 = vrot.slane %v3289_v14, %v3431_v16  ;;  %v3291_v28 = vld [vmem:[%s3428_s10 + $0x1c] ss:$0 sps:$4 sm:$0x33]  }
  0x8d   : > { %v878_v37 = vpop.permute.xlu0 %877  ;;  %v893_v38 = vpop.permute.xlu1 %892 }
  0x8e   : > { %881 = vst.msk [vmem:[#allocation2 + $0x4] sm:$0xc] %vm880_vm1, %v878_v37 }
  0x8f   : > { %896 = vst.msk [vmem:[#allocation2 + $0x4] sm:$0xc] %vm895_vm3, %v893_v38  ;;  %1901 = vrot.lane.b32.xlu0 %v1900_v30, %s3342_s17  ;;  %1788 = vrot.lane.b32.xlu1 %v3535_v40, %s3343_s24  ;;  %v2092_v30 = vrot.slane %v2087_v21, %v3420_v11  ;;  %v3292_v38 = vld [vmem:[%s3428_s10 + $0xe] ss:$0 sps:$4 sm:$0x33]  }
  0x90   : > { %v3297_v21 = vld [vmem:[%s3428_s10 + $0x20] ss:$0 sps:$4 sm:$0x33]  }
  0x91   : > { %v1583_v45 = vpop.permute.xlu0 %1582  ;;  %v743_v46 = vpop.permute.xlu1 %742 }
  0x92   : > { %1586 = vst.msk [vmem:[#allocation2 + $0xc] sm:$0xc] %vm895_vm3, %v1583_v45  ;;  %v2239_v45 = vrot.slane %v3292_v38, %v3431_v16 }
  0x93   : > { %746 = vst.msk [vmem:[#allocation2 + $0x4] sm:$0x3] %vm745_vm4, %v743_v46  ;;  %2210 = vrot.lane.b32.xlu0 %v2209_v39, %s3343_s24  ;;  %2054 = vrot.lane.b32.xlu1 %v2053_v41, %s3341_s16  ;;  %v2093_v39 = vmul.bf16 %v3140_v35, %v2092_v30  ;;  %v2510_v41 = vrot.slane %v2505_v32, %v3420_v11  ;;  %v2551_v32 = vld [vmem:[%s4074_s2] sm:$0x1] }
  0x94   : > { %v2135_v30 = vpack.i.b16 %v2133_v24, %v2133_v24  ;;  %v2553_v38 = vpack.i.b16 %v2551_v32, %v2551_v32 }
  0x95   : > { %v908_v52 = vpop.permute.xlu0 %907  ;;  %v1148_v53 = vpop.permute.xlu1 %1147  ;;  %v2101_v46 = vrot.slane %v2093_v39, %v3431_v16  ;;  %v3933_v39 = vld.sshfl [vmem:[%s3428_s10 + $0x10] sm:$0x3 pattern:$0x76325410] }
  0x96   : > { %911 = vst.msk [vmem:[#allocation2 + $0x4] sm:$0xc] %vm910_vm5, %v908_v52  ;;  %v2109_v52 = vld [vmem:[%s4074_s2] sm:$0x1] }
  0x97   : > { %1151 = vst.msk [vmem:[#allocation2 + $0x8] sm:$0xc] %vm895_vm3, %v1148_v53  ;;  %2628 = vrot.lane.b32.xlu0 %v2627_v47, %s3343_s24  ;;  %2472 = vrot.lane.b32.xlu1 %v2471_v48, %s3341_s16  ;;  %v2511_v47 = vmul.bf16 %v3172_v42, %v2510_v41  ;;  %v2111_v57 = vpack.i.b16 %v2109_v52, %v2109_v52  ;;  %v3142_v41 = vld [vmem:[%s3428_s10 + $0x12] sm:$0x3] }
  0x99   : > { %v1173_v60 = vpop.permute.xlu0 %1172  ;;  %v1023_v61 = vpop.permute.xlu1 %1022  ;;  %v2519_v50 = vrot.slane %v2511_v47, %v3431_v16  ;;  %v2116_v63 = vrot.slane %v2111_v57, %v3420_v11  ;;  %v3126_v47 = vld.sshfl [vmem:[%s3428_s10 + $0x20] sm:$0x3 pattern:$0x76325410] }
  0x9a   : > { %1176 = vst.msk [vmem:[#allocation2 + $0x8] sm:$0xc] %vm910_vm5, %v1173_v60 }
  0x9b   : > { %1025 = vst.msk [vmem:[#allocation2 + $0xc] sm:$0x3] %vm745_vm4, %v1023_v61  ;;  %1480 = vrot.lane.b32.xlu0 %v1479_v54, %s3346_s30  ;;  %1367 = vrot.lane.b32.xlu1 %v3792_v58, %s3344_s25 }
  0x9d   : > { %v767_v4 = vpop.permute.xlu0 %766  ;;  %v1608_v5 = vpop.permute.xlu1 %1607 }
  0x9e   : > { %770 = vst.msk [vmem:[#allocation2 + $0x4] sm:$0x3] %vm769_vm6, %v767_v4 }
  0x9f   : > { %1611 = vst.msk [vmem:[#allocation2 + $0xc] sm:$0xc] %vm910_vm5, %v1608_v5  ;;  %1915 = vrot.lane.b32.xlu0 %v1914_v62, %s3346_s30  ;;  %1802 = vrot.lane.b32.xlu1 %v3592_v25, %s3344_s25  ;;  %v3295_v62 = vld [vmem:[%s3428_s10 + $0x1e] ss:$0 sps:$4 sm:$0x33]  }
  0xa1   : > { %v1036_v10 = vpop.permute.xlu0 %1035  ;;  %v923_v12 = vpop.permute.xlu1 %922 }
  0xa2   : > { %1038 = vst.msk [vmem:[#allocation2 + $0xc] sm:$0x3] %vm769_vm6, %v1036_v10  ;;  %v3173_v10 = vld [vmem:[%s3428_s10 + $0x20] sm:$0x3] }
  0xa3   : > { %926 = vst.msk [vmem:[#allocation2 + $0x4] sm:$0xc] %vm925_vm7, %v923_v12  ;;  %2225 = vrot.lane.b32.xlu0 %v2224_v6, %s3344_s25  ;;  %2078 = vrot.lane.b32.xlu1 %v2077_v7, %s3345_s26  ;;  %v3296_v6 = vld [vmem:[%s3428_s10 + $0x10] ss:$0 sps:$4 sm:$0x33]   ;;  %v2117_v7 = vmul.bf16 %v3141_v3, %v2116_v63 }
  0xa4   : > { %v2254_v14 = vrot.slane %v3296_v6, %v3431_v16 }
  0xa5   : > { %v1633_v17 = vpop.permute.xlu0 %1632  ;;  %v1198_v18 = vpop.permute.xlu1 %1197  ;;  %v2125_v22 = vrot.slane %v2117_v7, %v3431_v16 }
  0xa6   : > { %1636 = vst.msk [vmem:[#allocation2 + $0xc] sm:$0xc] %vm925_vm7, %v1633_v17  ;;  %1201 = vst.msk [vmem:[#allocation2 + $0x8] sm:$0xc] %vm925_vm7, %v1198_v18  ;;  %v2535_v17 = vmul.bf16 %v3173_v10, %v2534_v9 }
  0xa7   : > { %2496 = vrot.lane.b32.xlu0 %v2495_v13, %s3345_s26  ;;  %2284 = vrot.lane.b32.xlu1 %v3604_v31, %s3333_s13  ;;  %v1493_v31 = vrot.slane %v3290_v20, %v3431_v16  ;;  %s4082_s26 = smov 78  }
  0xa8   : > { %v2543_v20 = vrot.slane %v2535_v17, %v3431_v16 }
  0xa9   : > { %v938_v26 = vpop.permute.xlu0 %937  ;;  %v791_v27 = vpop.permute.xlu1 %790 }
  0xaa   : > { %941 = vst.msk [vmem:[#allocation2 + $0x4] sm:$0xc] %vm940_vm8, %v938_v26 }
  0xab   : > { %794 = vst.msk [vmem:[#allocation2 + $0x4] sm:$0x3] %vm793_vm9, %v791_v27  ;;  %2702 = vrot.lane.b32.xlu0 %v3491_v1, %s3333_s13  ;;  %2643 = vrot.lane.b32.xlu1 %v2642_v19, %s3344_s25  ;;  %s4083_s13 = smov 79   ;;  %v1928_v1 = vrot.slane %v3291_v28, %v3431_v16  ;;  %v3298_v28 = vld [vmem:[%s3428_s10 + $0x10] ss:$0 sps:$4 sm:$0x33]  }
  0xad   : > { %v1223_v36 = vpop.permute.xlu0 %1222  ;;  %v1049_v37 = vpop.permute.xlu1 %1048 }
  0xae   : > { %1226 = vst.msk [vmem:[#allocation2 + $0x8] sm:$0xc] %vm940_vm8, %v1223_v36 }
  0xaf   : > { %1051 = vst.msk [vmem:[#allocation2 + $0xc] sm:$0x3] %vm793_vm9, %v1049_v37  ;;  %1494 = vrot.lane.b32.xlu0 %v1493_v31, %s4082_s26  ;;  %1381 = vrot.lane.b32.xlu1 %v3839_v34, %s4083_s13  ;;  %v2672_v31 = vrot.slane %v3297_v21, %v3431_v16  ;;  %v3299_v37 = vld [vmem:[%s3428_s10 + $0x20] ss:$0 sps:$4 sm:$0x33]  }
  0xb1   : > { %v1425_v43 = vpop.permute.xlu0 %1424  ;;  %v1312_v44 = vpop.permute.xlu1 %1311 }
  0xb2   : > { %1427 = vst.msk [vmem:[#allocation2 + $0x10] sm:$0xc] %vm880_vm1, %v1425_v43 }
  0xb3   : > { %1315 = vst.msk [vmem:[#allocation2 + $0x10] sm:$0x3] %vm697_vm0, %v1312_v44  ;;  %1929 = vrot.lane.b32.xlu0 %v1928_v1, %s4082_s26  ;;  %1816 = vrot.lane.b32.xlu1 %v3677_v29, %s4083_s13  ;;  %v2140_v1 = vrot.slane %v2135_v30, %v3420_v11  ;;  %v3300_v44 = vld [vmem:[%s3428_s10 + $0x12] ss:$0 sps:$4 sm:$0x33]  }
  0xb4   : > { %v2269_v51 = vrot.slane %v3300_v44, %v3431_v16 }
  0xb5   : > { %v1747_v48 = vpop.permute.xlu0 %1746  ;;  %v1658_v49 = vpop.permute.xlu1 %1657 }
  0xb6   : > { %1750 = vst.msk [vmem:[#allocation2 + $0x14] sm:$0x3] %vm697_vm0, %v1747_v48  ;;  %v3174_v48 = vld [vmem:[%s3428_s10 + $0x22] sm:$0x3] }
  0xb7   : > { %1661 = vst.msk [vmem:[#allocation2 + $0xc] sm:$0xc] %vm940_vm8, %v1658_v49  ;;  %2240 = vrot.lane.b32.xlu0 %v2239_v45, %s4083_s13  ;;  %2102 = vrot.lane.b32.xlu1 %v2101_v46, %s3347_s27  ;;  %v2141_v45 = vmul.bf16 %v3142_v41, %v2140_v1  ;;  %v2558_v46 = vrot.slane %v2553_v38, %v3420_v11 }
  0xb9   : > { %v2166_v53 = vpop.permute.xlu0 %2165  ;;  %v1860_v54 = vpop.permute.xlu1 %1859  ;;  %v2149_v52 = vrot.slane %v2141_v45, %v3431_v16 }
  0xba   : > { %2169 = vst.msk [vmem:[#allocation2 + $0x18] sm:$0xc] %vm880_vm1, %v2166_v53  ;;  %1862 = vst.msk [vmem:[#allocation2 + $0x14] sm:$0xc] %vm880_vm1, %v1860_v54  ;;  %v2559_v53 = vmul.bf16 %v3174_v48, %v2558_v46 }
  0xbb   : > { %2520 = vrot.lane.b32.xlu0 %v2519_v50, %s3347_s27  ;;  %2297 = vrot.lane.b32.xlu1 %v3684_v33, %s3334_s14  ;;  %v1507_v33 = vrot.slane %v3294_v56, %v3431_v16  ;;  %v3301_v56 = vld [vmem:[%s3428_s10 + $0x22] ss:$0 sps:$4 sm:$0x33]  }
  0xbd   : > { %v815_v60 = vpop.permute.xlu0 %814  ;;  %v2584_v61 = vpop.permute.xlu1 %2583 }
  0xbe   : > { %818 = vst.msk [vmem:[#allocation2 + $0x4] sm:$0x3] %vm817_vm10, %v815_v60  ;;  %v2687_v60 = vrot.slane %v3301_v56, %v3431_v16 }
  0xbf   : > { %2587 = vst.msk [vmem:[#allocation2 + $0x1c] sm:$0xc] %vm880_vm1, %v2584_v61  ;;  %2715 = vrot.lane.b32.xlu0 %v3512_v23, %s3334_s14  ;;  %2658 = vrot.lane.b32.xlu1 %v2657_v55, %s4083_s13  ;;  %v1942_v23 = vrot.slane %v3295_v62, %v3431_v16  ;;  %v2567_v55 = vrot.slane %v2559_v53, %v3431_v16  ;;  %vm2834_vm1 = vcmask 293888  }
  0xc1   : > { %v1062_v4 = vpop.permute.xlu0 %1061  ;;  %v953_v5 = vpop.permute.xlu1 %952 }
  0xc2   : > { %1064 = vst.msk [vmem:[#allocation2 + $0xc] sm:$0x3] %vm817_vm10, %v1062_v4  ;;  %v2898_v4 = vld [vmem:[%s4076_s4] sm:$0xff] }
  0xc3   : > { %956 = vst.msk [vmem:[#allocation2 + $0x4] sm:$0xc] %vm955_vm11, %v953_v5  ;;  %1508 = vrot.lane.b32.xlu0 %v1507_v33, %s3352_s22  ;;  %1395 = vrot.lane.b32.xlu1 %v3886_v2, %s3350_s29 }
  0xc5   : > { %v1326_v12 = vpop.permute.xlu0 %1325  ;;  %v1248_v13 = vpop.permute.xlu1 %1247 }
  0xc6   : > { %1329 = vst.msk [vmem:[#allocation2 + $0x10] sm:$0x3] %vm721_vm2, %v1326_v12 }
  0xc7   : > { %1251 = vst.msk [vmem:[#allocation2 + $0x8] sm:$0xc] %vm955_vm11, %v1248_v13  ;;  %1943 = vrot.lane.b32.xlu0 %v1942_v23, %s3352_s22  ;;  %1830 = vrot.lane.b32.xlu1 %v3730_v8, %s3350_s29 }
  0xc9   : > { %v1683_v18 = vpop.permute.xlu0 %1682  ;;  %v1439_v19 = vpop.permute.xlu1 %1438 }
  0xca   : > { %1686 = vst.msk [vmem:[#allocation2 + $0xc] sm:$0xc] %vm955_vm11, %v1683_v18 }
  0xcb   : > { %1441 = vst.msk [vmem:[#allocation2 + $0x10] sm:$0xc] %vm895_vm3, %v1439_v19  ;;  %2255 = vrot.lane.b32.xlu0 %v2254_v14, %s3350_s29  ;;  %2126 = vrot.lane.b32.xlu1 %v2125_v22, %s3351_s7 }
  0xcd   : > { %v1874_v26 = vpop.permute.xlu0 %1873  ;;  %v1761_v27 = vpop.permute.xlu1 %1760 }
  0xce   : > { %1876 = vst.msk [vmem:[#allocation2 + $0x14] sm:$0xc] %vm895_vm3, %v1874_v26 }
  0xcf   : > { %1764 = vst.msk [vmem:[#allocation2 + $0x14] sm:$0x3] %vm721_vm2, %v1761_v27  ;;  %2544 = vrot.lane.b32.xlu0 %v2543_v20, %s3351_s7  ;;  %2310 = vrot.lane.b32.xlu1 %v3741_v15, %s3340_s9  ;;  %v1521_v15 = vrot.slane %v3298_v28, %v3431_v16 }
  0xd1   : > { %v2181_v35 = vpop.permute.xlu0 %2180  ;;  %v2007_v36 = vpop.permute.xlu1 %2006 }
  0xd2   : > { %2184 = vst.msk [vmem:[#allocation2 + $0x18] sm:$0xc] %vm895_vm3, %v2181_v35 }
  0xd3   : > { %2010 = vst.msk [vmem:[#allocation2 + $0x18] sm:$0x3] %vm721_vm2, %v2007_v36  ;;  %2728 = vrot.lane.b32.xlu0 %v3535_v40, %s3340_s9  ;;  %2673 = vrot.lane.b32.xlu1 %v2672_v31, %s3350_s29  ;;  %v1956_v40 = vrot.slane %v3299_v37, %v3431_v16 }
  0xd5   : > { %v2599_v42 = vpop.permute.xlu0 %2598  ;;  %v2425_v43 = vpop.permute.xlu1 %2424 }
  0xd6   : > { %2602 = vst.msk [vmem:[#allocation2 + $0x1c] sm:$0xc] %vm895_vm3, %v2599_v42 }
  0xd7   : > { %2428 = vst.msk [vmem:[#allocation2 + $0x1c] sm:$0x3] %vm721_vm2, %v2425_v43  ;;  %1522 = vrot.lane.b32.xlu0 %v1521_v15, %s3355_s15  ;;  %1409 = vrot.lane.b32.xlu1 %v3933_v39, %s3356_s23 }
  0xd9   : > { %v968_v49 = vpop.permute.xlu0 %967  ;;  %v839_v50 = vpop.permute.xlu1 %838 }
  0xda   : > { %971 = vst.msk [vmem:[#allocation2 + $0x4] sm:$0xc] %vm970_vm12, %v968_v49 }
  0xdb   : > { %842 = vst.msk [vmem:[#allocation2 + $0x4] sm:$0x3] %vm841_vm13, %v839_v50  ;;  %1957 = vrot.lane.b32.xlu0 %v1956_v40, %s3355_s15  ;;  %1844 = vrot.lane.b32.xlu1 %v3126_v47, %s3356_s23 }
  0xdd   : > { %v1273_v54 = vpop.permute.xlu0 %1272  ;;  %v1075_v11 = vpop.permute.xlu1 %1074 }
  0xde   : > { %1276 = vst.msk [vmem:[#allocation2 + $0x8] sm:$0xc] %vm970_vm12, %v1273_v54 }
  0xdf   : > { %1077 = vst.msk [vmem:[#allocation2 + $0xc] sm:$0x3] %vm841_vm13, %v1075_v11  ;;  %2270 = vrot.lane.b32.xlu0 %v2269_v51, %s3356_s23  ;;  %2150 = vrot.lane.b32.xlu1 %v2149_v52, %s3354_s11 }
  0xe1   : > { %v1453_v57 = vpop.permute.xlu0 %1452  ;;  %v1340_v59 = vpop.permute.xlu1 %1339 }
  0xe2   : > { %1455 = vst.msk [vmem:[#allocation2 + $0x10] sm:$0xc] %vm910_vm5, %v1453_v57 }
  0xe3   : > { %1343 = vst.msk [vmem:[#allocation2 + $0x10] sm:$0x3] %vm745_vm4, %v1340_v59  ;;  %2568 = vrot.lane.b32.xlu0 %v2567_v55, %s3354_s11  ;;  %2323 = vrot.lane.b32.xlu1 %v3792_v58, %s3342_s17 }
  0xe5   : > { %v1775_v61 = vpop.permute.xlu0 %1774  ;;  %v1708_v33 = vpop.permute.xlu1 %1707 }
  0xe6   : > { %1778 = vst.msk [vmem:[#allocation2 + $0x14] sm:$0x3] %vm745_vm4, %v1775_v61 }
  0xe7   : > { %1711 = vst.msk [vmem:[#allocation2 + $0xc] sm:$0xc] %vm970_vm12, %v1708_v33  ;;  %2741 = vrot.lane.b32.xlu0 %v3592_v25, %s3342_s17  ;;  %2688 = vrot.lane.b32.xlu1 %v2687_v60, %s3356_s23 }
  0xe9   : > { %v2031_v62 = vpop.permute.xlu0 %2030  ;;  %v1888_v63 = vpop.permute.xlu1 %1887 }
  0xea   : > { %2034 = vst.msk [vmem:[#allocation2 + $0x18] sm:$0x3] %vm745_vm4, %v2031_v62 }
  0xeb   : > { %1890 = vst.msk [vmem:[#allocation2 + $0x14] sm:$0xc] %vm910_vm5, %v1888_v63  ;;  %2754 = vrot.lane.b32.xlu0 %v3677_v29, %s3346_s30  ;;  %2336 = vrot.lane.b32.xlu1 %v3839_v34, %s3346_s30  ;;  %v3198_v34 = vld.sshfl [vmem:[%s3428_s10 + $0x22] sm:$0x3 pattern:$0x76325410] }
  0xed   : > { %v2449_v16 = vpop.permute.xlu0 %2448  ;;  %v2196_v58 = vpop.permute.xlu1 %2195 }
  0xee   : > { %2452 = vst.msk [vmem:[#allocation2 + $0x1c] sm:$0x3] %vm745_vm4, %v2449_v16 }
  0xef   : > { %2199 = vst.msk [vmem:[#allocation2 + $0x18] sm:$0xc] %vm910_vm5, %v2196_v58  ;;  %2767 = vrot.lane.b32.xlu0 %v3730_v8, %s4082_s26  ;;  %2349 = vrot.lane.b32.xlu1 %v3886_v2, %s4082_s26  ;;  %v2890_v2 = vld [vmem:[%s4075_s3] sm:$0xff] }
  0xf1   : > { %v863_v25 = vpop.permute.xlu0 %862  ;;  %v2614_v29 = vpop.permute.xlu1 %2613 }
  0xf2   : > { %866 = vst.msk [vmem:[#allocation2 + $0x4] sm:$0x3] %vm865_vm14, %v863_v25 }
  0xf3   : > { %2617 = vst.msk [vmem:[#allocation2 + $0x1c] sm:$0xc] %vm910_vm5, %v2614_v29  ;;  %2780 = vrot.lane.b32.xlu0 %v3126_v47, %s3352_s22  ;;  %2362 = vrot.lane.b32.xlu1 %v3933_v39, %s3352_s22  ;;  %s3209_s22 = sshll.u32 %s4089_s18, 4 }
  0xf4   : > { %s260_s23 = scalar_lea.vmem %s4077_s5, %s3209_s22 }
  0xf5   : > { %v1088_v3 = vpop.permute.xlu0 %1087  ;;  %v983_v8 = vpop.permute.xlu1 %982 }
  0xf6   : > { %1090 = vst.msk [vmem:[#allocation2 + $0xc] sm:$0x3] %vm865_vm14, %v1088_v3 }
  0xf7   : > { %986 = vst.msk [vmem:[#allocation2 + $0x4] sm:$0xc] %vm985_vm15, %v983_v8  ;;  %2793 = vrot.lane.b32.xlu0 %v3198_v34, %s3355_s15  ;;  %2375 = vrot.lane.b32.xlu1 %v3166_v0, %s3355_s15 }
  0xf9   : > { %v1354_v5 = vpop.permute.xlu0 %1353  ;;  %v1298_v23 = vpop.permute.xlu1 %1297 }
  0xfa   : > { %1357 = vst.msk [vmem:[#allocation2 + $0x10] sm:$0x3] %vm769_vm6, %v1354_v5 }
  0xfb   : > { %1301 = vst.msk [vmem:[#allocation2 + $0x8] sm:$0xc] %vm985_vm15, %v1298_v23  ;;  %2893 = vperm.xlu1 %3260, %v2890_v2   ;;  %2901 = vperm.xlu0 %3261, %v2898_v4  }
  0xfd   : > { %v1733_v6 = vpop.permute.xlu0 %1732  ;;  %v1467_v7 = vpop.permute.xlu1 %1466 }
  0xfe   : > { %1736 = vst.msk [vmem:[#allocation2 + $0xc] sm:$0xc] %vm985_vm15, %v1733_v6  ;;  %v2804_v14 = vld [vmem:[#allocation2] sm:$0xff] }
  0xff   : > { %1469 = vst.msk [vmem:[#allocation2 + $0x10] sm:$0xc] %vm925_vm7, %v1467_v7 }
 0x101   : > { %v1902_v9 = vpop.permute.xlu0 %1901  ;;  %v1789_v10 = vpop.permute.xlu1 %1788 }
 0x102   : > { %1904 = vst.msk [vmem:[#allocation2 + $0x14] sm:$0xc] %vm925_vm7, %v1902_v9 }
 0x103   : > { %1792 = vst.msk [vmem:[#allocation2 + $0x14] sm:$0x3] %vm769_vm6, %v1789_v10 }
 0x105   : > { %v2211_v12 = vpop.permute.xlu0 %2210  ;;  %v2055_v13 = vpop.permute.xlu1 %2054  ;;  %v2805_v22 = vld [vmem:[#allocation2 + $0x8] sm:$0xff] }
 0x106   : > { %v3302_v17 = vld [vmem:[#allocation2 + $0x4] ss:$8 sps:$4 sm:$0xff]   ;;  %2214 = vst.msk [vmem:[#allocation2 + $0x18] sm:$0xc] %vm925_vm7, %v2211_v12  ;;  %v3199_v18 = vcombine.low %v2804_v14, %v2805_v22  ;;  %v2803_v12 = vld [vmem:[%s4073_s1] sm:$0xf] }
 0x107   : > { %2058 = vst.msk [vmem:[#allocation2 + $0x18] sm:$0x3] %vm769_vm6, %v2055_v13  ;;  %2845 = vmatprep.subr.bf16.mxu0 %v3302_v17 }
 0x108   : > { %2846 = vmatpush1.bf16.msra.mxu0 %v3199_v18 }
 0x109   : > { %v2629_v19 = vpop.permute.xlu0 %2628  ;;  %v2473_v20 = vpop.permute.xlu1 %2472 }
 0x10a   : > { %2632 = vst.msk [vmem:[#allocation2 + $0x1c] sm:$0xc] %vm925_vm7, %v2629_v19 }
 0x10b   : > { %2476 = vst.msk [vmem:[#allocation2 + $0x1c] sm:$0x3] %vm769_vm6, %v2473_v20 }
 0x10d   : > { %v1481_v21 = vpop.permute.xlu0 %1480  ;;  %v1368_v24 = vpop.permute.xlu1 %1367 }
 0x10e   : > { %1483 = vst.msk [vmem:[#allocation2 + $0x10] sm:$0xc] %vm940_vm8, %v1481_v21 }
 0x10f   : > { %1371 = vst.msk [vmem:[#allocation2 + $0x10] sm:$0x3] %vm793_vm9, %v1368_v24 }
 0x111   : > { %v1916_v26 = vpop.permute.xlu0 %1915  ;;  %v1803_v27 = vpop.permute.xlu1 %1802 }
 0x112   : > { %1918 = vst.msk [vmem:[#allocation2 + $0x14] sm:$0xc] %vm940_vm8, %v1916_v26 }
 0x113   : > { %1806 = vst.msk [vmem:[#allocation2 + $0x14] sm:$0x3] %vm793_vm9, %v1803_v27 }
 0x115   : > { %v2226_v31 = vpop.permute.xlu0 %2225  ;;  %v2079_v28 = vpop.permute.xlu1 %2078 }
 0x116   : > { %2229 = vst.msk [vmem:[#allocation2 + $0x18] sm:$0xc] %vm940_vm8, %v2226_v31 }
 0x117   : > { %2082 = vst.msk [vmem:[#allocation2 + $0x18] sm:$0x3] %vm793_vm9, %v2079_v28 }
 0x119   : > { %v2497_v30 = vpop.permute.xlu0 %2496  ;;  %v2285_v32 = vpop.permute.xlu1 %2284 }
 0x11a   : > { %2500 = vst.msk [vmem:[#allocation2 + $0x1c] sm:$0x3] %vm793_vm9, %v2497_v30 }
 0x11b   : > { %2287 = vst.msk [vmem:[#allocation2 + $0x20] sm:$0x3] %vm697_vm0, %v2285_v32 }
 0x11d   : > { %v2703_v35 = vpop.permute.xlu0 %2702  ;;  %v2644_v36 = vpop.permute.xlu1 %2643 }
 0x11e   : > { %2705 = vst.msk [vmem:[#allocation2 + $0x24] sm:$0x3] %vm697_vm0, %v2703_v35  ;;  %vm2838_vm0 = vcmask 1041408  }
 0x11f   : > { %2647 = vst.msk [vmem:[#allocation2 + $0x1c] sm:$0xc] %vm940_vm8, %v2644_v36 }
 0x121   : > { %v1495_v15 = vpop.permute.xlu0 %1494  ;;  %v1382_v37 = vpop.permute.xlu1 %1381 }
 0x122   : > { %1497 = vst.msk [vmem:[#allocation2 + $0x10] sm:$0xc] %vm955_vm11, %v1495_v15 }
 0x123   : > { %1385 = vst.msk [vmem:[#allocation2 + $0x10] sm:$0x3] %vm817_vm10, %v1382_v37 }
 0x125   : > { %v1930_v1 = vpop.permute.xlu0 %1929  ;;  %v1817_v38 = vpop.permute.xlu1 %1816 }
 0x126   : > { %1932 = vst.msk [vmem:[#allocation2 + $0x14] sm:$0xc] %vm955_vm11, %v1930_v1 }
 0x127   : > { %1820 = vst.msk [vmem:[#allocation2 + $0x14] sm:$0x3] %vm817_vm10, %v1817_v38 }
 0x129   : > { %v2241_v39 = vpop.permute.xlu0 %2240  ;;  %v2103_v41 = vpop.permute.xlu1 %2102 }
 0x12a   : > { %2244 = vst.msk [vmem:[#allocation2 + $0x18] sm:$0xc] %vm955_vm11, %v2241_v39 }
 0x12b   : > { %2106 = vst.msk [vmem:[#allocation2 + $0x18] sm:$0x3] %vm817_vm10, %v2103_v41 }
 0x12d   : > { %v2521_v42 = vpop.permute.xlu0 %2520  ;;  %v2298_v43 = vpop.permute.xlu1 %2297 }
 0x12e   : > { %2524 = vst.msk [vmem:[#allocation2 + $0x1c] sm:$0x3] %vm817_vm10, %v2521_v42 }
 0x12f   : > { %2300 = vst.msk [vmem:[#allocation2 + $0x20] sm:$0x3] %vm721_vm2, %v2298_v43 }
 0x131   : > { %v2716_v40 = vpop.permute.xlu0 %2715  ;;  %v2659_v44 = vpop.permute.xlu1 %2658 }
 0x132   : > { %2718 = vst.msk [vmem:[#allocation2 + $0x24] sm:$0x3] %vm721_vm2, %v2716_v40 }
 0x133   : > { %2662 = vst.msk [vmem:[#allocation2 + $0x1c] sm:$0xc] %vm955_vm11, %v2659_v44 }
 0x135   : > { %v1509_v45 = vpop.permute.xlu0 %1508  ;;  %v1396_v46 = vpop.permute.xlu1 %1395 }
 0x136   : > { %1511 = vst.msk [vmem:[#allocation2 + $0x10] sm:$0xc] %vm970_vm12, %v1509_v45 }
 0x137   : > { %1399 = vst.msk [vmem:[#allocation2 + $0x10] sm:$0x3] %vm841_vm13, %v1396_v46 }
 0x139   : > { %v1944_v47 = vpop.permute.xlu0 %1943  ;;  %v1831_v48 = vpop.permute.xlu1 %1830 }
 0x13a   : > { %1946 = vst.msk [vmem:[#allocation2 + $0x14] sm:$0xc] %vm970_vm12, %v1944_v47 }
 0x13b   : > { %1834 = vst.msk [vmem:[#allocation2 + $0x14] sm:$0x3] %vm841_vm13, %v1831_v48 }
 0x13d   : > { %v2256_v49 = vpop.permute.xlu0 %2255  ;;  %v2127_v50 = vpop.permute.xlu1 %2126 }
 0x13e   : > { %2259 = vst.msk [vmem:[#allocation2 + $0x18] sm:$0xc] %vm970_vm12, %v2256_v49 }
 0x13f   : > { %2130 = vst.msk [vmem:[#allocation2 + $0x18] sm:$0x3] %vm841_vm13, %v2127_v50 }
 0x141   : > { %v2545_v51 = vpop.permute.xlu0 %2544  ;;  %v2311_v52 = vpop.permute.xlu1 %2310 }
 0x142   : > { %2548 = vst.msk [vmem:[#allocation2 + $0x1c] sm:$0x3] %vm841_vm13, %v2545_v51 }
 0x143   : > { %2313 = vst.msk [vmem:[#allocation2 + $0x20] sm:$0x3] %vm745_vm4, %v2311_v52 }
 0x145   : > { %v2729_v53 = vpop.permute.xlu0 %2728  ;;  %v2674_v54 = vpop.permute.xlu1 %2673 }
 0x146   : > { %2731 = vst.msk [vmem:[#allocation2 + $0x24] sm:$0x3] %vm745_vm4, %v2729_v53 }
 0x147   : > { %2677 = vst.msk [vmem:[#allocation2 + $0x1c] sm:$0xc] %vm970_vm12, %v2674_v54 }
 0x149   : > { %v1523_v11 = vpop.permute.xlu0 %1522  ;;  %v1410_v55 = vpop.permute.xlu1 %1409 }
 0x14a   : > { %1525 = vst.msk [vmem:[#allocation2 + $0x10] sm:$0xc] %vm985_vm15, %v1523_v11 }
 0x14b   : > { %1413 = vst.msk [vmem:[#allocation2 + $0x10] sm:$0x3] %vm865_vm14, %v1410_v55 }
 0x14d   : > { %v1958_v56 = vpop.permute.xlu0 %1957  ;;  %v1845_v57 = vpop.permute.xlu1 %1844 }
 0x14e   : > { %1960 = vst.msk [vmem:[#allocation2 + $0x14] sm:$0xc] %vm985_vm15, %v1958_v56 }
 0x14f   : > { %1848 = vst.msk [vmem:[#allocation2 + $0x14] sm:$0x3] %vm865_vm14, %v1845_v57 }
 0x151   : > { %v2271_v59 = vpop.permute.xlu0 %2270  ;;  %v2151_v60 = vpop.permute.xlu1 %2150 }
 0x152   : > { %2274 = vst.msk [vmem:[#allocation2 + $0x18] sm:$0xc] %vm985_vm15, %v2271_v59 }
 0x153   : > { %2154 = vst.msk [vmem:[#allocation2 + $0x18] sm:$0x3] %vm865_vm14, %v2151_v60 }
 0x155   : > { %v2569_v61 = vpop.permute.xlu0 %2568  ;;  %v2324_v33 = vpop.permute.xlu1 %2323 }
 0x156   : > { %2572 = vst.msk [vmem:[#allocation2 + $0x1c] sm:$0x3] %vm865_vm14, %v2569_v61  ;;  %v2806_v34 = vld [vmem:[#allocation2 + $0x10] sm:$0xff] }
 0x157   : > { %2326 = vst.msk [vmem:[#allocation2 + $0x20] sm:$0x3] %vm769_vm6, %v2324_v33 }
 0x159   : > { %v2742_v62 = vpop.permute.xlu0 %2741  ;;  %v2689_v63 = vpop.permute.xlu1 %2688 }
 0x15a   : > { %2744 = vst.msk [vmem:[#allocation2 + $0x24] sm:$0x3] %vm769_vm6, %v2742_v62 }
 0x15b   : > { %2692 = vst.msk [vmem:[#allocation2 + $0x1c] sm:$0xc] %vm985_vm15, %v2689_v63 }
 0x15d   : > { %v2755_v16 = vpop.permute.xlu0 %2754  ;;  %v2337_v58 = vpop.permute.xlu1 %2336 }
 0x15e   : > { %2757 = vst.msk [vmem:[#allocation2 + $0x24] sm:$0x3] %vm793_vm9, %v2755_v16  ;;  %2339 = vst.msk [vmem:[#allocation2 + $0x20] sm:$0x3] %vm793_vm9, %v2337_v58 }
 0x161   : > { %v2768_v25 = vpop.permute.xlu0 %2767  ;;  %v2350_v29 = vpop.permute.xlu1 %2349 }
 0x162   : > { %v2807_v0 = vld [vmem:[#allocation2 + $0x18] sm:$0xff]  ;;  %2770 = vst.msk [vmem:[#allocation2 + $0x24] sm:$0x3] %vm817_vm10, %v2768_v25  ;;  %2352 = vst.msk [vmem:[#allocation2 + $0x20] sm:$0x3] %vm817_vm10, %v2350_v29 }
 0x163   : > { %v3304_v3 = vld [vmem:[#allocation2 + $0x14] ss:$8 sps:$4 sm:$0xff]   ;;  %v3201_v8 = vcombine.low %v2806_v34, %v2807_v0 }
 0x164   : > { %2847 = vmatprep.subr.bf16.mxu0 %v3304_v3 }
 0x165   : > { %2848 = vmatpush1.bf16.msra.mxu0 %v3201_v8  ;;  %v2781_v2 = vpop.permute.xlu0 %2780  ;;  %v2363_v4 = vpop.permute.xlu1 %2362 }
 0x166   : > { %2783 = vst.msk [vmem:[#allocation2 + $0x24] sm:$0x3] %vm841_vm13, %v2781_v2  ;;  %2365 = vst.msk [vmem:[#allocation2 + $0x20] sm:$0x3] %vm841_vm13, %v2363_v4 }
 0x169   : > { %v2794_v5 = vpop.permute.xlu0 %2793  ;;  %v2376_v23 = vpop.permute.xlu1 %2375 }
 0x16a   : > { %2796 = vst.msk [vmem:[#allocation2 + $0x24] sm:$0x3] %vm865_vm14, %v2794_v5  ;;  %2378 = vst.msk [vmem:[#allocation2 + $0x20] sm:$0x3] %vm865_vm14, %v2376_v23 }
 0x171   : > { %v2808_v6 = vld [vmem:[#allocation2 + $0x20] sm:$0x33] }
 0x172   : > { %v3204_v7 = vcombine.high %v2808_v6, %v2808_v6  ;;  %v3203_v9 = vcombine.low %v2808_v6, %v2808_v6 }
 0x174   : > { %3205 = vmatprep.subr.msk.bf16.mxu0 %vm2838_vm0, %v3204_v7  ;;  %v2840_v10 = vsel %vm2838_vm0, %v3203_v9, 0 }
 0x175   : > { %2850 = vmatpush1.bf16.msra.mxu0 %v2840_v10 }
 0x178   : > { %3206 = vmatmul.mubr.msk.bf16.vlgmr.msra.gmra.mrb[0].mxu0 %vm2834_vm1, %v2803_v12 }
 0x17a   : > { %v2894_v13 = vpop.permute.xlu1 %2893  ;;  %v2902_v22 = vpop.permute.xlu0 %2901 }
 0x24b   : > { %v2879_v14 = vpop.f32.mrb[0].mxu0 }
 0x24c   : > { %v2896_v17 = vmul.f32 %v2894_v13, %v2879_v14  ;;  %v2881_v18 = vpop.f32.mrb[1].mxu0 }
 0x24d   : > { %v2897_v19 = vmul.f32 %v2894_v13, %v2881_v18  ;;  %v2883_v20 = vpop.f32.mrb[2].mxu0 }
 0x24e   : > { %v2904_v21 = vadd.f32 %v2902_v22, %v2896_v17  ;;  %v2884_v24 = vpop.f32.mrb[3].mxu0 }
 0x24f   : > { %v2905_v26 = vadd.f32 %v2902_v22, %v2897_v19 }
 0x250   : > { %v2906_v27 = vmax.f32 %v2904_v21, 0.0 }
 0x251   : > { %v2907_v31 = vmax.f32 %v2905_v26, 0.0 }
 0x252   : > { %2908 = vst [vmem:[%s260_s23] sm:$0xff] %v2906_v27 }
 0x253   : > { %2909 = vst [vmem:[%s260_s23 + $0x8] sm:$0xff] %v2907_v31 }
 0x254 PF: > { %s15_s20 = sadd.s32 1, %s3330_s20   ;;  %s4084_s18 = smov %s3326_s19 }
 0x255   : > { %p12_p5 = scmp.ge.s32.totalorder %s15_s20, 4   ;;  %s4085_s19 = smov %s4087_s21 }
 0x257   :  { %14 = sbr.rel (!%p12_p5) target bundleno = 2 (0x2), region = 165 }

</bundles_post_ra>
